<compile_context>
chip_gen: v6e
topology: v6e:2x2x1
jax: 0.10.0
libtpu: 0.0.40
codegen_flags: <defaults>
</compile_context>

<pallas_src>
import functools

import jax
import jax.numpy as jnp
from jax.experimental import pallas as pl
from jax.experimental.pallas import tpu as pltpu

B = 4          # batch of graphs
GB = 2         # graphs per grid step
N = 128        # nodes per graph (lane-dense adjacency / logits)
D_IN = 32      # input_dim
HEAD = 4       # head
HD = 32        # output_dim (per-head hidden); HEAD*HD = 128 -> lane-dense output
NEG_SLOPE = 0.01   # nn.LeakyReLU default negative_slope
NEG_INF = -1e30    # additive mask value; exp(-1e30 - m) underflows to exact 0


def relation_kernel(h_ref, w_ref, b_ref, mask_ref, out_ref, *, head, hd):
    """One grid step = GB graphs.

    h_ref   : (GB, N, D_IN)        bf16
    w_ref   : (D_IN, H*HD + 2*H)   bf16   [w_linear | w_linear @ a_pack]
    b_ref   : (1,    H*HD + 2*H)   f32    [b_linear | b_linear @ a_pack (+ b_att on dst half)]
    mask_ref: (GB, N, N)           bf16   additive mask: 0 on edge j->i, NEG_INF otherwise
    out_ref : (GB, N, H*HD)        f32
    """
    hh = head * hd
    gb, n, _ = h_ref.shape
    w = w_ref[...]
    bias = b_ref[...]
    ones_col = jnp.ones((n, 1), dtype=jnp.bfloat16)

    for g in range(gb):                               # static unroll over graphs in the block
        # Single bf16 MXU pass -> projection hw AND all per-head src/dst scores.
        proj = jnp.dot(h_ref[g], w, preferred_element_type=jnp.float32) + bias   # (N, hh+2H)
        hw_b = proj[:, :hh].astype(jnp.bfloat16)       # values / numerator RHS (bf16 MXU operand)
        e = proj[:, hh:]                               # (N, 2H): [:,k]=src score, [:,H+k]=dst(+b_att)
        e_t = e.T                                      # (2H, N): one transpose shared by all heads
        madd = mask_ref[g].astype(jnp.float32)         # (N, N) additive edge mask, hoisted

        for k in range(head):                          # static unroll over heads
            # logits[i, j] = leakyrelu(<hw_i_k, a_dst> + <hw_j_k, a_src> + b_att) + mask
            raw = e[:, head + k:head + k + 1] + e_t[k:k + 1, :]        # (N, N)
            leaky = jnp.maximum(raw, NEG_SLOPE * raw)                  # LeakyReLU
            logits = leaky + madd                                      # non-edges -> ~NEG_INF
            m = jnp.max(logits, axis=1, keepdims=True)
            # TODO(synk): bf16 exp path for v6e/v7x EUP once parity budget allows.
            p = jnp.exp(logits - m).astype(jnp.bfloat16)               # (N, N); non-edges exact 0
            # Denominator folded into the numerator matmul via a ones column.
            rhs = jnp.concatenate([hw_b[:, k * hd:(k + 1) * hd], ones_col], axis=1)  # (N, hd+1)
            ns = jnp.dot(p, rhs, preferred_element_type=jnp.float32)   # (N, hd+1)
            inv = pl.reciprocal(ns[:, hd:hd + 1], approx=False)        # 1 / row-sum
            out_ref[g, :, k * hd:(k + 1) * hd] = ns[:, :hd] * inv
    # TODO(synk): if_sum=True variant (sum over heads) not emitted; default path only.


def relation_layer(h, w_lin, b_lin, a_src, a_dst, b_att, adj):
    """h: (B, N, D_IN), adj: (B, N, N); weights shared across the batch."""
    b, n, d_in = h.shape
    hh = HEAD * HD
    hp = jax.lax.Precision.HIGHEST

    # Block-diagonal packing of (a_src | a_dst) (shared over heads, as in the module).
    eye_h = jnp.eye(HEAD, dtype=jnp.float32)
    a_pack = jnp.concatenate(
        [jnp.kron(eye_h, a_src.reshape(HD, 1)),
         jnp.kron(eye_h, a_dst.reshape(HD, 1))], axis=1)                  # (HEAD*HD, 2*HEAD)

    # Fold a_pack (and all biases) into the projection so the kernel needs one matmul.
    wa = jnp.dot(w_lin, a_pack, precision=hp)                             # (D_IN, 2H)
    ba = jnp.dot(b_lin, a_pack, precision=hp)                             # (1, 2H)
    ba = ba.at[:, HEAD:].add(b_att[0, 0])                                 # attention bias -> dst half
    w_big = jnp.concatenate([w_lin, wa], axis=1).astype(jnp.bfloat16)     # (D_IN, hh+2H) bf16
    b_big = jnp.concatenate([b_lin, ba], axis=1)                          # (1, hh+2H)    f32

    # Precomputed additive edge mask, shipped as bf16 (halves dominant DMA).
    mask = jnp.where(adj > 0, 0.0, NEG_INF).astype(jnp.bfloat16)          # (B, N, N)
    h_b = h.astype(jnp.bfloat16)

    kernel = functools.partial(relation_kernel, head=HEAD, hd=HD)
    return pl.pallas_call(
        kernel,
        out_shape=jax.ShapeDtypeStruct((b, n, hh), jnp.float32),
        grid=(b // GB,),
        in_specs=[
            pl.BlockSpec((GB, n, d_in), lambda i: (i, 0, 0)),             # h      (per block of graphs)
            pl.BlockSpec((d_in, hh + 2 * HEAD), lambda i: (0, 0)),        # w_big  (shared)
            pl.BlockSpec((1, hh + 2 * HEAD), lambda i: (0, 0)),           # b_big  (shared)
            pl.BlockSpec((GB, n, n), lambda i: (i, 0, 0)),                # mask   (per block)
        ],
        out_specs=pl.BlockSpec((GB, n, hh), lambda i: (i, 0, 0)),
        compiler_params=pltpu.CompilerParams(
            dimension_semantics=("parallel",)),
    )(h_b, w_big, b_big, mask)


def relation_layer_ref(h, w_lin, b_lin, a_src, a_dst, b_att, adj):
    """Plain-JAX f32/HIGHEST reference mirroring the PyTorch forward (dense, batched)."""
    hp = jax.lax.Precision.HIGHEST
    hw = jnp.einsum("bnd,df->bnf", h, w_lin, precision=hp) + b_lin        # (B, N, H*HD)
    hw3 = hw.reshape(h.shape[0], -1, HEAD, HD)                            # (B, N, H, HD)
    e_src = jnp.einsum("bjkd,d->bjk", hw3, a_src, precision=hp)           # (B, N, H)
    e_dst = jnp.einsum("bikd,d->bik", hw3, a_dst, precision=hp)           # (B, N, H)
    logits = e_dst[:, :, None, :] + e_src[:, None, :, :] + b_att[0, 0]    # (B, i, j, H)
    logits = jnp.where(logits > 0, logits, NEG_SLOPE * logits)
    logits = jnp.where(adj[:, :, :, None] > 0, logits, -jnp.inf)
    alpha = jax.nn.softmax(logits, axis=2)               # softmax over in-neighbours j
    out = jnp.einsum("bijk,bjkd->bikd", alpha, hw3, precision=hp)         # (B, N, H, HD)
    return out.reshape(h.shape[0], -1, HEAD * HD)


if __name__ == "__main__":
    key = jax.random.PRNGKey(0)
    k_h, k_w, k_b, k_a, k_ab, k_adj = jax.random.split(key, 6)

    # Node features for a batch of B graphs.
    h = jax.random.normal(k_h, (B, N, D_IN), dtype=jnp.float32)

    # Deterministic synthetic parameters (shapes per the module __init__).
    # w_linear: Linear(input_dim, output_dim * head)
    w_lin = 0.1 * jax.random.normal(k_w, (D_IN, HEAD * HD), dtype=jnp.float32)
    b_lin = 0.1 * jax.random.normal(k_b, (1, HEAD * HD), dtype=jnp.float32)
    # atten: Linear(2 * hd, 1) -> split into src / dst halves (shared over heads).
    a_full = 0.1 * jax.random.normal(k_a, (2 * HD,), dtype=jnp.float32)
    a_src, a_dst = a_full[:HD], a_full[HD:]
    b_att = 0.1 * jax.random.normal(k_ab, (1, 1), dtype=jnp.float32)

    # Random sparse adjacency + guaranteed self-loops (every node has >= 1
    # in-edge, matching DGL's reduce precondition).
    eye = jnp.eye(N, dtype=jnp.float32)
    rand = (jax.random.uniform(k_adj, (B, N, N)) < 0.05).astype(jnp.float32)
    adj = jnp.clip(rand + eye[None], 0.0, 1.0)

    out = relation_layer(h, w_lin, b_lin, a_src, a_dst, b_att, adj)
    out = jax.block_until_ready(out)

    ref = relation_layer_ref(h, w_lin, b_lin, a_src, a_dst, b_att, adj)
    assert out.shape == (B, N, HEAD * HD)
    err = float(jnp.max(jnp.abs(out - ref)))
    # bf16 MXU operands (f32 accumulation) vs f32/HIGHEST reference -> relaxed tolerance.
    assert jnp.allclose(out, ref, atol=3e-2, rtol=3e-2), f"max abs err={err}"

    print("KERNEL_OK")
</pallas_src>

<mosaic_0001>
module attributes {stable_mosaic.version = 11 : i64} {
  func.func @relation_kernel(%arg0: i32, %arg1: memref<2x128x32xbf16, #tpu.memory_space<vmem>>, %arg2: memref<32x136xbf16, #tpu.memory_space<vmem>>, %arg3: memref<1x136xf32, #tpu.memory_space<vmem>>, %arg4: memref<2x128x128xbf16, #tpu.memory_space<vmem>>, %arg5: memref<2x128x128xf32, #tpu.memory_space<vmem>>) attributes {dimension_semantics = [#tpu.dimension_semantics<parallel>], iteration_bounds = array<i64: 2>, scalar_prefetch = 0 : i64, scratch_operands = 0 : i64, tpu.core_type = #tpu.core_type<tc>, window_params = [{transform_indices = @transform_0, window_bounds = array<i64: 2, 128, 32>}, {pipeline_mode = #tpu.pipeline_mode<synchronous>, transform_indices = @transform_1, window_bounds = array<i64: 32, 136>}, {pipeline_mode = #tpu.pipeline_mode<synchronous>, transform_indices = @transform_2, window_bounds = array<i64: 1, 136>}, {transform_indices = @transform_3, window_bounds = array<i64: 2, 128, 128>}, {transform_indices = @transform_4, window_bounds = array<i64: 2, 128, 128>}]} {
    %c0 = arith.constant 0 : index
    %c0_0 = arith.constant 0 : index
    %0 = vector.load %arg2[%c0, %c0_0] : memref<32x136xbf16, #tpu.memory_space<vmem>>, vector<32x136xbf16>
    %c0_1 = arith.constant 0 : index
    %c0_2 = arith.constant 0 : index
    %1 = vector.load %arg3[%c0_1, %c0_2] : memref<1x136xf32, #tpu.memory_space<vmem>>, vector<1x136xf32>
    %cst = arith.constant 1.000000e+00 : bf16
    %2 = vector.broadcast %cst : bf16 to vector<128x1xbf16>
    %c0_3 = arith.constant 0 : index
    %c0_4 = arith.constant 0 : index
    %c0_5 = arith.constant 0 : index
    %3 = vector.load %arg1[%c0_3, %c0_4, %c0_5] : memref<2x128x32xbf16, #tpu.memory_space<vmem>>, vector<1x128x32xbf16>
    %4 = vector.shape_cast %3 : vector<1x128x32xbf16> to vector<128x32xbf16>
    %cst_6 = arith.constant dense<0.000000e+00> : vector<128x136xf32>
    %5 = tpu.matmul %4, %0, %cst_6 {dimension_numbers = #tpu.dot_dimension_numbers<[1], [0], [0], [1], [0, 0, 1, 1], [], []>} : vector<128x32xbf16>, vector<32x136xbf16>, vector<128x136xf32> -> vector<128x136xf32>
    %6 = vector.broadcast %1 : vector<1x136xf32> to vector<128x136xf32>
    %7 = arith.addf %5, %6 : vector<128x136xf32>
    %8 = vector.extract_strided_slice %7 {offsets = [0, 0], sizes = [128, 128], strides = [1, 1]} : vector<128x136xf32> to vector<128x128xf32>
    %9 = arith.truncf %8 : vector<128x128xf32> to vector<128x128xbf16>
    %10 = vector.extract_strided_slice %7 {offsets = [0, 128], sizes = [128, 8], strides = [1, 1]} : vector<128x136xf32> to vector<128x8xf32>
    %11 = tpu.transpose %10, [1, 0] : vector<128x8xf32> -> vector<8x128xf32>
    %c0_7 = arith.constant 0 : index
    %c0_8 = arith.constant 0 : index
    %c0_9 = arith.constant 0 : index
    %12 = vector.load %arg4[%c0_7, %c0_8, %c0_9] : memref<2x128x128xbf16, #tpu.memory_space<vmem>>, vector<1x128x128xbf16>
    %13 = vector.shape_cast %12 : vector<1x128x128xbf16> to vector<128x128xbf16>
    %14 = arith.extf %13 : vector<128x128xbf16> to vector<128x128xf32>
    %15 = vector.extract_strided_slice %10 {offsets = [0, 4], sizes = [128, 1], strides = [1, 1]} : vector<128x8xf32> to vector<128x1xf32>
    %16 = vector.extract_strided_slice %11 {offsets = [0, 0], sizes = [1, 128], strides = [1, 1]} : vector<8x128xf32> to vector<1x128xf32>
    %17 = vector.broadcast %15 : vector<128x1xf32> to vector<128x128xf32>
    %18 = vector.broadcast %16 : vector<1x128xf32> to vector<128x128xf32>
    %19 = arith.addf %17, %18 : vector<128x128xf32>
    %cst_10 = arith.constant 0.00999999977 : f32
    %20 = vector.broadcast %cst_10 : f32 to vector<128x128xf32>
    %21 = arith.mulf %20, %19 : vector<128x128xf32>
    %22 = arith.maximumf %19, %21 : vector<128x128xf32>
    %23 = arith.addf %22, %14 : vector<128x128xf32>
    %cst_11 = arith.constant dense<0xFF800000> : vector<128xf32>
    %24 = vector.multi_reduction <maximumf>, %23, %cst_11 [1] : vector<128x128xf32> to vector<128xf32>
    %25 = vector.shape_cast %24 : vector<128xf32> to vector<128x1xf32>
    %26 = vector.broadcast %25 : vector<128x1xf32> to vector<128x128xf32>
    %27 = arith.subf %23, %26 : vector<128x128xf32>
    %28 = math.exp %27 : vector<128x128xf32>
    %29 = arith.truncf %28 : vector<128x128xf32> to vector<128x128xbf16>
    %30 = vector.extract_strided_slice %9 {offsets = [0, 0], sizes = [128, 32], strides = [1, 1]} : vector<128x128xbf16> to vector<128x32xbf16>
    %31 = tpu.concatenate %30, %2 in 1 : vector<128x32xbf16>, vector<128x1xbf16> -> vector<128x33xbf16>
    %cst_12 = arith.constant dense<0.000000e+00> : vector<128x33xf32>
    %32 = tpu.matmul %29, %31, %cst_12 {dimension_numbers = #tpu.dot_dimension_numbers<[1], [0], [0], [1], [0, 0, 1, 1], [], []>} : vector<128x128xbf16>, vector<128x33xbf16>, vector<128x33xf32> -> vector<128x33xf32>
    %33 = vector.extract_strided_slice %32 {offsets = [0, 32], sizes = [128, 1], strides = [1, 1]} : vector<128x33xf32> to vector<128x1xf32>
    %34 = tpu.reciprocal %33 : vector<128x1xf32> -> vector<128x1xf32>
    %35 = vector.extract_strided_slice %32 {offsets = [0, 0], sizes = [128, 32], strides = [1, 1]} : vector<128x33xf32> to vector<128x32xf32>
    %36 = vector.broadcast %34 : vector<128x1xf32> to vector<128x32xf32>
    %37 = arith.mulf %35, %36 : vector<128x32xf32>
    %c0_13 = arith.constant 0 : index
    %c0_14 = arith.constant 0 : index
    %c0_15 = arith.constant 0 : index
    %38 = vector.load %arg5[%c0_13, %c0_14, %c0_15] : memref<2x128x128xf32, #tpu.memory_space<vmem>>, vector<1x128x32xf32>
    %39 = vector.shape_cast %38 : vector<1x128x32xf32> to vector<128x32xf32>
    %40 = vector.shape_cast %37 : vector<128x32xf32> to vector<1x128x32xf32>
    tpu.vector_store %arg5[%c0_13, %c0_14, %c0_15], %40 {strides = array<i32>} : memref<2x128x128xf32, #tpu.memory_space<vmem>>, vector<1x128x32xf32>,
    %41 = vector.extract_strided_slice %10 {offsets = [0, 5], sizes = [128, 1], strides = [1, 1]} : vector<128x8xf32> to vector<128x1xf32>
    %42 = vector.extract_strided_slice %11 {offsets = [1, 0], sizes = [1, 128], strides = [1, 1]} : vector<8x128xf32> to vector<1x128xf32>
    %43 = vector.broadcast %41 : vector<128x1xf32> to vector<128x128xf32>
    %44 = vector.broadcast %42 : vector<1x128xf32> to vector<128x128xf32>
    %45 = arith.addf %43, %44 : vector<128x128xf32>
    %cst_16 = arith.constant 0.00999999977 : f32
    %46 = vector.broadcast %cst_16 : f32 to vector<128x128xf32>
    %47 = arith.mulf %46, %45 : vector<128x128xf32>
    %48 = arith.maximumf %45, %47 : vector<128x128xf32>
    %49 = arith.addf %48, %14 : vector<128x128xf32>
    %cst_17 = arith.constant dense<0xFF800000> : vector<128xf32>
    %50 = vector.multi_reduction <maximumf>, %49, %cst_17 [1] : vector<128x128xf32> to vector<128xf32>
    %51 = vector.shape_cast %50 : vector<128xf32> to vector<128x1xf32>
    %52 = vector.broadcast %51 : vector<128x1xf32> to vector<128x128xf32>
    %53 = arith.subf %49, %52 : vector<128x128xf32>
    %54 = math.exp %53 : vector<128x128xf32>
    %55 = arith.truncf %54 : vector<128x128xf32> to vector<128x128xbf16>
    %56 = vector.extract_strided_slice %9 {offsets = [0, 32], sizes = [128, 32], strides = [1, 1]} : vector<128x128xbf16> to vector<128x32xbf16>
    %57 = tpu.concatenate %56, %2 in 1 : vector<128x32xbf16>, vector<128x1xbf16> -> vector<128x33xbf16>
    %cst_18 = arith.constant dense<0.000000e+00> : vector<128x33xf32>
    %58 = tpu.matmul %55, %57, %cst_18 {dimension_numbers = #tpu.dot_dimension_numbers<[1], [0], [0], [1], [0, 0, 1, 1], [], []>} : vector<128x128xbf16>, vector<128x33xbf16>, vector<128x33xf32> -> vector<128x33xf32>
    %59 = vector.extract_strided_slice %58 {offsets = [0, 32], sizes = [128, 1], strides = [1, 1]} : vector<128x33xf32> to vector<128x1xf32>
    %60 = tpu.reciprocal %59 : vector<128x1xf32> -> vector<128x1xf32>
    %61 = vector.extract_strided_slice %58 {offsets = [0, 0], sizes = [128, 32], strides = [1, 1]} : vector<128x33xf32> to vector<128x32xf32>
    %62 = vector.broadcast %60 : vector<128x1xf32> to vector<128x32xf32>
    %63 = arith.mulf %61, %62 : vector<128x32xf32>
    %c0_19 = arith.constant 0 : index
    %c0_20 = arith.constant 0 : index
    %c32 = arith.constant 32 : index
    %64 = vector.load %arg5[%c0_19, %c0_20, %c32] : memref<2x128x128xf32, #tpu.memory_space<vmem>>, vector<1x128x32xf32>
    %65 = vector.shape_cast %64 : vector<1x128x32xf32> to vector<128x32xf32>
    %66 = vector.shape_cast %63 : vector<128x32xf32> to vector<1x128x32xf32>
    tpu.vector_store %arg5[%c0_19, %c0_20, %c32], %66 {strides = array<i32>} : memref<2x128x128xf32, #tpu.memory_space<vmem>>, vector<1x128x32xf32>,
    %67 = vector.extract_strided_slice %10 {offsets = [0, 6], sizes = [128, 1], strides = [1, 1]} : vector<128x8xf32> to vector<128x1xf32>
    %68 = vector.extract_strided_slice %11 {offsets = [2, 0], sizes = [1, 128], strides = [1, 1]} : vector<8x128xf32> to vector<1x128xf32>
    %69 = vector.broadcast %67 : vector<128x1xf32> to vector<128x128xf32>
    %70 = vector.broadcast %68 : vector<1x128xf32> to vector<128x128xf32>
    %71 = arith.addf %69, %70 : vector<128x128xf32>
    %cst_21 = arith.constant 0.00999999977 : f32
    %72 = vector.broadcast %cst_21 : f32 to vector<128x128xf32>
    %73 = arith.mulf %72, %71 : vector<128x128xf32>
    %74 = arith.maximumf %71, %73 : vector<128x128xf32>
    %75 = arith.addf %74, %14 : vector<128x128xf32>
    %cst_22 = arith.constant dense<0xFF800000> : vector<128xf32>
    %76 = vector.multi_reduction <maximumf>, %75, %cst_22 [1] : vector<128x128xf32> to vector<128xf32>
    %77 = vector.shape_cast %76 : vector<128xf32> to vector<128x1xf32>
    %78 = vector.broadcast %77 : vector<128x1xf32> to vector<128x128xf32>
    %79 = arith.subf %75, %78 : vector<128x128xf32>
    %80 = math.exp %79 : vector<128x128xf32>
    %81 = arith.truncf %80 : vector<128x128xf32> to vector<128x128xbf16>
    %82 = vector.extract_strided_slice %9 {offsets = [0, 64], sizes = [128, 32], strides = [1, 1]} : vector<128x128xbf16> to vector<128x32xbf16>
    %83 = tpu.concatenate %82, %2 in 1 : vector<128x32xbf16>, vector<128x1xbf16> -> vector<128x33xbf16>
    %cst_23 = arith.constant dense<0.000000e+00> : vector<128x33xf32>
    %84 = tpu.matmul %81, %83, %cst_23 {dimension_numbers = #tpu.dot_dimension_numbers<[1], [0], [0], [1], [0, 0, 1, 1], [], []>} : vector<128x128xbf16>, vector<128x33xbf16>, vector<128x33xf32> -> vector<128x33xf32>
    %85 = vector.extract_strided_slice %84 {offsets = [0, 32], sizes = [128, 1], strides = [1, 1]} : vector<128x33xf32> to vector<128x1xf32>
    %86 = tpu.reciprocal %85 : vector<128x1xf32> -> vector<128x1xf32>
    %87 = vector.extract_strided_slice %84 {offsets = [0, 0], sizes = [128, 32], strides = [1, 1]} : vector<128x33xf32> to vector<128x32xf32>
    %88 = vector.broadcast %86 : vector<128x1xf32> to vector<128x32xf32>
    %89 = arith.mulf %87, %88 : vector<128x32xf32>
    %c0_24 = arith.constant 0 : index
    %c0_25 = arith.constant 0 : index
    %c64 = arith.constant 64 : index
    %90 = vector.load %arg5[%c0_24, %c0_25, %c64] : memref<2x128x128xf32, #tpu.memory_space<vmem>>, vector<1x128x32xf32>
    %91 = vector.shape_cast %90 : vector<1x128x32xf32> to vector<128x32xf32>
    %92 = vector.shape_cast %89 : vector<128x32xf32> to vector<1x128x32xf32>
    tpu.vector_store %arg5[%c0_24, %c0_25, %c64], %92 {strides = array<i32>} : memref<2x128x128xf32, #tpu.memory_space<vmem>>, vector<1x128x32xf32>,
    %93 = vector.extract_strided_slice %10 {offsets = [0, 7], sizes = [128, 1], strides = [1, 1]} : vector<128x8xf32> to vector<128x1xf32>
    %94 = vector.extract_strided_slice %11 {offsets = [3, 0], sizes = [1, 128], strides = [1, 1]} : vector<8x128xf32> to vector<1x128xf32>
    %95 = vector.broadcast %93 : vector<128x1xf32> to vector<128x128xf32>
    %96 = vector.broadcast %94 : vector<1x128xf32> to vector<128x128xf32>
    %97 = arith.addf %95, %96 : vector<128x128xf32>
    %cst_26 = arith.constant 0.00999999977 : f32
    %98 = vector.broadcast %cst_26 : f32 to vector<128x128xf32>
    %99 = arith.mulf %98, %97 : vector<128x128xf32>
    %100 = arith.maximumf %97, %99 : vector<128x128xf32>
    %101 = arith.addf %100, %14 : vector<128x128xf32>
    %cst_27 = arith.constant dense<0xFF800000> : vector<128xf32>
    %102 = vector.multi_reduction <maximumf>, %101, %cst_27 [1] : vector<128x128xf32> to vector<128xf32>
    %103 = vector.shape_cast %102 : vector<128xf32> to vector<128x1xf32>
    %104 = vector.broadcast %103 : vector<128x1xf32> to vector<128x128xf32>
    %105 = arith.subf %101, %104 : vector<128x128xf32>
    %106 = math.exp %105 : vector<128x128xf32>
    %107 = arith.truncf %106 : vector<128x128xf32> to vector<128x128xbf16>
    %108 = vector.extract_strided_slice %9 {offsets = [0, 96], sizes = [128, 32], strides = [1, 1]} : vector<128x128xbf16> to vector<128x32xbf16>
    %109 = tpu.concatenate %108, %2 in 1 : vector<128x32xbf16>, vector<128x1xbf16> -> vector<128x33xbf16>
    %cst_28 = arith.constant dense<0.000000e+00> : vector<128x33xf32>
    %110 = tpu.matmul %107, %109, %cst_28 {dimension_numbers = #tpu.dot_dimension_numbers<[1], [0], [0], [1], [0, 0, 1, 1], [], []>} : vector<128x128xbf16>, vector<128x33xbf16>, vector<128x33xf32> -> vector<128x33xf32>
    %111 = vector.extract_strided_slice %110 {offsets = [0, 32], sizes = [128, 1], strides = [1, 1]} : vector<128x33xf32> to vector<128x1xf32>
    %112 = tpu.reciprocal %111 : vector<128x1xf32> -> vector<128x1xf32>
    %113 = vector.extract_strided_slice %110 {offsets = [0, 0], sizes = [128, 32], strides = [1, 1]} : vector<128x33xf32> to vector<128x32xf32>
    %114 = vector.broadcast %112 : vector<128x1xf32> to vector<128x32xf32>
    %115 = arith.mulf %113, %114 : vector<128x32xf32>
    %c0_29 = arith.constant 0 : index
    %c0_30 = arith.constant 0 : index
    %c96 = arith.constant 96 : index
    %116 = vector.load %arg5[%c0_29, %c0_30, %c96] : memref<2x128x128xf32, #tpu.memory_space<vmem>>, vector<1x128x32xf32>
    %117 = vector.shape_cast %116 : vector<1x128x32xf32> to vector<128x32xf32>
    %118 = vector.shape_cast %115 : vector<128x32xf32> to vector<1x128x32xf32>
    tpu.vector_store %arg5[%c0_29, %c0_30, %c96], %118 {strides = array<i32>} : memref<2x128x128xf32, #tpu.memory_space<vmem>>, vector<1x128x32xf32>,
    %c1 = arith.constant 1 : index
    %c0_31 = arith.constant 0 : index
    %c0_32 = arith.constant 0 : index
    %119 = vector.load %arg1[%c1, %c0_31, %c0_32] : memref<2x128x32xbf16, #tpu.memory_space<vmem>>, vector<1x128x32xbf16>
    %120 = vector.shape_cast %119 : vector<1x128x32xbf16> to vector<128x32xbf16>
    %cst_33 = arith.constant dense<0.000000e+00> : vector<128x136xf32>
    %121 = tpu.matmul %120, %0, %cst_33 {dimension_numbers = #tpu.dot_dimension_numbers<[1], [0], [0], [1], [0, 0, 1, 1], [], []>} : vector<128x32xbf16>, vector<32x136xbf16>, vector<128x136xf32> -> vector<128x136xf32>
    %122 = vector.broadcast %1 : vector<1x136xf32> to vector<128x136xf32>
    %123 = arith.addf %121, %122 : vector<128x136xf32>
    %124 = vector.extract_strided_slice %123 {offsets = [0, 0], sizes = [128, 128], strides = [1, 1]} : vector<128x136xf32> to vector<128x128xf32>
    %125 = arith.truncf %124 : vector<128x128xf32> to vector<128x128xbf16>
    %126 = vector.extract_strided_slice %123 {offsets = [0, 128], sizes = [128, 8], strides = [1, 1]} : vector<128x136xf32> to vector<128x8xf32>
    %127 = tpu.transpose %126, [1, 0] : vector<128x8xf32> -> vector<8x128xf32>
    %c1_34 = arith.constant 1 : index
    %c0_35 = arith.constant 0 : index
    %c0_36 = arith.constant 0 : index
    %128 = vector.load %arg4[%c1_34, %c0_35, %c0_36] : memref<2x128x128xbf16, #tpu.memory_space<vmem>>, vector<1x128x128xbf16>
    %129 = vector.shape_cast %128 : vector<1x128x128xbf16> to vector<128x128xbf16>
    %130 = arith.extf %129 : vector<128x128xbf16> to vector<128x128xf32>
    %131 = vector.extract_strided_slice %126 {offsets = [0, 4], sizes = [128, 1], strides = [1, 1]} : vector<128x8xf32> to vector<128x1xf32>
    %132 = vector.extract_strided_slice %127 {offsets = [0, 0], sizes = [1, 128], strides = [1, 1]} : vector<8x128xf32> to vector<1x128xf32>
    %133 = vector.broadcast %131 : vector<128x1xf32> to vector<128x128xf32>
    %134 = vector.broadcast %132 : vector<1x128xf32> to vector<128x128xf32>
    %135 = arith.addf %133, %134 : vector<128x128xf32>
    %cst_37 = arith.constant 0.00999999977 : f32
    %136 = vector.broadcast %cst_37 : f32 to vector<128x128xf32>
    %137 = arith.mulf %136, %135 : vector<128x128xf32>
    %138 = arith.maximumf %135, %137 : vector<128x128xf32>
    %139 = arith.addf %138, %130 : vector<128x128xf32>
    %cst_38 = arith.constant dense<0xFF800000> : vector<128xf32>
    %140 = vector.multi_reduction <maximumf>, %139, %cst_38 [1] : vector<128x128xf32> to vector<128xf32>
    %141 = vector.shape_cast %140 : vector<128xf32> to vector<128x1xf32>
    %142 = vector.broadcast %141 : vector<128x1xf32> to vector<128x128xf32>
    %143 = arith.subf %139, %142 : vector<128x128xf32>
    %144 = math.exp %143 : vector<128x128xf32>
    %145 = arith.truncf %144 : vector<128x128xf32> to vector<128x128xbf16>
    %146 = vector.extract_strided_slice %125 {offsets = [0, 0], sizes = [128, 32], strides = [1, 1]} : vector<128x128xbf16> to vector<128x32xbf16>
    %147 = tpu.concatenate %146, %2 in 1 : vector<128x32xbf16>, vector<128x1xbf16> -> vector<128x33xbf16>
    %cst_39 = arith.constant dense<0.000000e+00> : vector<128x33xf32>
    %148 = tpu.matmul %145, %147, %cst_39 {dimension_numbers = #tpu.dot_dimension_numbers<[1], [0], [0], [1], [0, 0, 1, 1], [], []>} : vector<128x128xbf16>, vector<128x33xbf16>, vector<128x33xf32> -> vector<128x33xf32>
    %149 = vector.extract_strided_slice %148 {offsets = [0, 32], sizes = [128, 1], strides = [1, 1]} : vector<128x33xf32> to vector<128x1xf32>
    %150 = tpu.reciprocal %149 : vector<128x1xf32> -> vector<128x1xf32>
    %151 = vector.extract_strided_slice %148 {offsets = [0, 0], sizes = [128, 32], strides = [1, 1]} : vector<128x33xf32> to vector<128x32xf32>
    %152 = vector.broadcast %150 : vector<128x1xf32> to vector<128x32xf32>
    %153 = arith.mulf %151, %152 : vector<128x32xf32>
    %c1_40 = arith.constant 1 : index
    %c0_41 = arith.constant 0 : index
    %c0_42 = arith.constant 0 : index
    %154 = vector.load %arg5[%c1_40, %c0_41, %c0_42] : memref<2x128x128xf32, #tpu.memory_space<vmem>>, vector<1x128x32xf32>
    %155 = vector.shape_cast %154 : vector<1x128x32xf32> to vector<128x32xf32>
    %156 = vector.shape_cast %153 : vector<128x32xf32> to vector<1x128x32xf32>
    tpu.vector_store %arg5[%c1_40, %c0_41, %c0_42], %156 {strides = array<i32>} : memref<2x128x128xf32, #tpu.memory_space<vmem>>, vector<1x128x32xf32>,
    %157 = vector.extract_strided_slice %126 {offsets = [0, 5], sizes = [128, 1], strides = [1, 1]} : vector<128x8xf32> to vector<128x1xf32>
    %158 = vector.extract_strided_slice %127 {offsets = [1, 0], sizes = [1, 128], strides = [1, 1]} : vector<8x128xf32> to vector<1x128xf32>
    %159 = vector.broadcast %157 : vector<128x1xf32> to vector<128x128xf32>
    %160 = vector.broadcast %158 : vector<1x128xf32> to vector<128x128xf32>
    %161 = arith.addf %159, %160 : vector<128x128xf32>
    %cst_43 = arith.constant 0.00999999977 : f32
    %162 = vector.broadcast %cst_43 : f32 to vector<128x128xf32>
    %163 = arith.mulf %162, %161 : vector<128x128xf32>
    %164 = arith.maximumf %161, %163 : vector<128x128xf32>
    %165 = arith.addf %164, %130 : vector<128x128xf32>
    %cst_44 = arith.constant dense<0xFF800000> : vector<128xf32>
    %166 = vector.multi_reduction <maximumf>, %165, %cst_44 [1] : vector<128x128xf32> to vector<128xf32>
    %167 = vector.shape_cast %166 : vector<128xf32> to vector<128x1xf32>
    %168 = vector.broadcast %167 : vector<128x1xf32> to vector<128x128xf32>
    %169 = arith.subf %165, %168 : vector<128x128xf32>
    %170 = math.exp %169 : vector<128x128xf32>
    %171 = arith.truncf %170 : vector<128x128xf32> to vector<128x128xbf16>
    %172 = vector.extract_strided_slice %125 {offsets = [0, 32], sizes = [128, 32], strides = [1, 1]} : vector<128x128xbf16> to vector<128x32xbf16>
    %173 = tpu.concatenate %172, %2 in 1 : vector<128x32xbf16>, vector<128x1xbf16> -> vector<128x33xbf16>
    %cst_45 = arith.constant dense<0.000000e+00> : vector<128x33xf32>
    %174 = tpu.matmul %171, %173, %cst_45 {dimension_numbers = #tpu.dot_dimension_numbers<[1], [0], [0], [1], [0, 0, 1, 1], [], []>} : vector<128x128xbf16>, vector<128x33xbf16>, vector<128x33xf32> -> vector<128x33xf32>
    %175 = vector.extract_strided_slice %174 {offsets = [0, 32], sizes = [128, 1], strides = [1, 1]} : vector<128x33xf32> to vector<128x1xf32>
    %176 = tpu.reciprocal %175 : vector<128x1xf32> -> vector<128x1xf32>
    %177 = vector.extract_strided_slice %174 {offsets = [0, 0], sizes = [128, 32], strides = [1, 1]} : vector<128x33xf32> to vector<128x32xf32>
    %178 = vector.broadcast %176 : vector<128x1xf32> to vector<128x32xf32>
    %179 = arith.mulf %177, %178 : vector<128x32xf32>
    %c1_46 = arith.constant 1 : index
    %c0_47 = arith.constant 0 : index
    %c32_48 = arith.constant 32 : index
    %180 = vector.load %arg5[%c1_46, %c0_47, %c32_48] : memref<2x128x128xf32, #tpu.memory_space<vmem>>, vector<1x128x32xf32>
    %181 = vector.shape_cast %180 : vector<1x128x32xf32> to vector<128x32xf32>
    %182 = vector.shape_cast %179 : vector<128x32xf32> to vector<1x128x32xf32>
    tpu.vector_store %arg5[%c1_46, %c0_47, %c32_48], %182 {strides = array<i32>} : memref<2x128x128xf32, #tpu.memory_space<vmem>>, vector<1x128x32xf32>,
    %183 = vector.extract_strided_slice %126 {offsets = [0, 6], sizes = [128, 1], strides = [1, 1]} : vector<128x8xf32> to vector<128x1xf32>
    %184 = vector.extract_strided_slice %127 {offsets = [2, 0], sizes = [1, 128], strides = [1, 1]} : vector<8x128xf32> to vector<1x128xf32>
    %185 = vector.broadcast %183 : vector<128x1xf32> to vector<128x128xf32>
    %186 = vector.broadcast %184 : vector<1x128xf32> to vector<128x128xf32>
    %187 = arith.addf %185, %186 : vector<128x128xf32>
    %cst_49 = arith.constant 0.00999999977 : f32
    %188 = vector.broadcast %cst_49 : f32 to vector<128x128xf32>
    %189 = arith.mulf %188, %187 : vector<128x128xf32>
    %190 = arith.maximumf %187, %189 : vector<128x128xf32>
    %191 = arith.addf %190, %130 : vector<128x128xf32>
    %cst_50 = arith.constant dense<0xFF800000> : vector<128xf32>
    %192 = vector.multi_reduction <maximumf>, %191, %cst_50 [1] : vector<128x128xf32> to vector<128xf32>
    %193 = vector.shape_cast %192 : vector<128xf32> to vector<128x1xf32>
    %194 = vector.broadcast %193 : vector<128x1xf32> to vector<128x128xf32>
    %195 = arith.subf %191, %194 : vector<128x128xf32>
    %196 = math.exp %195 : vector<128x128xf32>
    %197 = arith.truncf %196 : vector<128x128xf32> to vector<128x128xbf16>
    %198 = vector.extract_strided_slice %125 {offsets = [0, 64], sizes = [128, 32], strides = [1, 1]} : vector<128x128xbf16> to vector<128x32xbf16>
    %199 = tpu.concatenate %198, %2 in 1 : vector<128x32xbf16>, vector<128x1xbf16> -> vector<128x33xbf16>
    %cst_51 = arith.constant dense<0.000000e+00> : vector<128x33xf32>
    %200 = tpu.matmul %197, %199, %cst_51 {dimension_numbers = #tpu.dot_dimension_numbers<[1], [0], [0], [1], [0, 0, 1, 1], [], []>} : vector<128x128xbf16>, vector<128x33xbf16>, vector<128x33xf32> -> vector<128x33xf32>
    %201 = vector.extract_strided_slice %200 {offsets = [0, 32], sizes = [128, 1], strides = [1, 1]} : vector<128x33xf32> to vector<128x1xf32>
    %202 = tpu.reciprocal %201 : vector<128x1xf32> -> vector<128x1xf32>
    %203 = vector.extract_strided_slice %200 {offsets = [0, 0], sizes = [128, 32], strides = [1, 1]} : vector<128x33xf32> to vector<128x32xf32>
    %204 = vector.broadcast %202 : vector<128x1xf32> to vector<128x32xf32>
    %205 = arith.mulf %203, %204 : vector<128x32xf32>
    %c1_52 = arith.constant 1 : index
    %c0_53 = arith.constant 0 : index
    %c64_54 = arith.constant 64 : index
    %206 = vector.load %arg5[%c1_52, %c0_53, %c64_54] : memref<2x128x128xf32, #tpu.memory_space<vmem>>, vector<1x128x32xf32>
    %207 = vector.shape_cast %206 : vector<1x128x32xf32> to vector<128x32xf32>
    %208 = vector.shape_cast %205 : vector<128x32xf32> to vector<1x128x32xf32>
    tpu.vector_store %arg5[%c1_52, %c0_53, %c64_54], %208 {strides = array<i32>} : memref<2x128x128xf32, #tpu.memory_space<vmem>>, vector<1x128x32xf32>,
    %209 = vector.extract_strided_slice %126 {offsets = [0, 7], sizes = [128, 1], strides = [1, 1]} : vector<128x8xf32> to vector<128x1xf32>
    %210 = vector.extract_strided_slice %127 {offsets = [3, 0], sizes = [1, 128], strides = [1, 1]} : vector<8x128xf32> to vector<1x128xf32>
    %211 = vector.broadcast %209 : vector<128x1xf32> to vector<128x128xf32>
    %212 = vector.broadcast %210 : vector<1x128xf32> to vector<128x128xf32>
    %213 = arith.addf %211, %212 : vector<128x128xf32>
    %cst_55 = arith.constant 0.00999999977 : f32
    %214 = vector.broadcast %cst_55 : f32 to vector<128x128xf32>
    %215 = arith.mulf %214, %213 : vector<128x128xf32>
    %216 = arith.maximumf %213, %215 : vector<128x128xf32>
    %217 = arith.addf %216, %130 : vector<128x128xf32>
    %cst_56 = arith.constant dense<0xFF800000> : vector<128xf32>
    %218 = vector.multi_reduction <maximumf>, %217, %cst_56 [1] : vector<128x128xf32> to vector<128xf32>
    %219 = vector.shape_cast %218 : vector<128xf32> to vector<128x1xf32>
    %220 = vector.broadcast %219 : vector<128x1xf32> to vector<128x128xf32>
    %221 = arith.subf %217, %220 : vector<128x128xf32>
    %222 = math.exp %221 : vector<128x128xf32>
    %223 = arith.truncf %222 : vector<128x128xf32> to vector<128x128xbf16>
    %224 = vector.extract_strided_slice %125 {offsets = [0, 96], sizes = [128, 32], strides = [1, 1]} : vector<128x128xbf16> to vector<128x32xbf16>
    %225 = tpu.concatenate %224, %2 in 1 : vector<128x32xbf16>, vector<128x1xbf16> -> vector<128x33xbf16>
    %cst_57 = arith.constant dense<0.000000e+00> : vector<128x33xf32>
    %226 = tpu.matmul %223, %225, %cst_57 {dimension_numbers = #tpu.dot_dimension_numbers<[1], [0], [0], [1], [0, 0, 1, 1], [], []>} : vector<128x128xbf16>, vector<128x33xbf16>, vector<128x33xf32> -> vector<128x33xf32>
    %227 = vector.extract_strided_slice %226 {offsets = [0, 32], sizes = [128, 1], strides = [1, 1]} : vector<128x33xf32> to vector<128x1xf32>
    %228 = tpu.reciprocal %227 : vector<128x1xf32> -> vector<128x1xf32>
    %229 = vector.extract_strided_slice %226 {offsets = [0, 0], sizes = [128, 32], strides = [1, 1]} : vector<128x33xf32> to vector<128x32xf32>
    %230 = vector.broadcast %228 : vector<128x1xf32> to vector<128x32xf32>
    %231 = arith.mulf %229, %230 : vector<128x32xf32>
    %c1_58 = arith.constant 1 : index
    %c0_59 = arith.constant 0 : index
    %c96_60 = arith.constant 96 : index
    %232 = vector.load %arg5[%c1_58, %c0_59, %c96_60] : memref<2x128x128xf32, #tpu.memory_space<vmem>>, vector<1x128x32xf32>
    %233 = vector.shape_cast %232 : vector<1x128x32xf32> to vector<128x32xf32>
    %234 = vector.shape_cast %231 : vector<128x32xf32> to vector<1x128x32xf32>
    tpu.vector_store %arg5[%c1_58, %c0_59, %c96_60], %234 {strides = array<i32>} : memref<2x128x128xf32, #tpu.memory_space<vmem>>, vector<1x128x32xf32>,
    return
  }
  func.func @transform_0(%arg0: i32) -> (i32, i32, i32) {
    %c0_i32 = arith.constant 0 : i32
    %c0_i32_0 = arith.constant 0 : i32
    %c0_i32_1 = arith.constant 0 : i32
    return %arg0, %c0_i32, %c0_i32_0 : i32, i32, i32
  }
  func.func @transform_1(%arg0: i32) -> (i32, i32) {
    %c0_i32 = arith.constant 0 : i32
    %c0_i32_0 = arith.constant 0 : i32
    %c0_i32_1 = arith.constant 0 : i32
    return %c0_i32, %c0_i32_0 : i32, i32
  }
  func.func @transform_2(%arg0: i32) -> (i32, i32) {
    %c0_i32 = arith.constant 0 : i32
    %c0_i32_0 = arith.constant 0 : i32
    %c0_i32_1 = arith.constant 0 : i32
    return %c0_i32, %c0_i32_0 : i32, i32
  }
  func.func @transform_3(%arg0: i32) -> (i32, i32, i32) {
    %c0_i32 = arith.constant 0 : i32
    %c0_i32_0 = arith.constant 0 : i32
    %c0_i32_1 = arith.constant 0 : i32
    return %arg0, %c0_i32, %c0_i32_0 : i32, i32, i32
  }
  func.func @transform_4(%arg0: i32) -> (i32, i32, i32) {
    %c0_i32 = arith.constant 0 : i32
    %c0_i32_0 = arith.constant 0 : i32
    %c0_i32_1 = arith.constant 0 : i32
    return %arg0, %c0_i32, %c0_i32_0 : i32, i32, i32
  }
}

</mosaic_0001>

<bundles_post_ra>
// kernel: tpu_custom_call.1
= control target key start
LH: loop header
LB: loop body
LE: loop exit
PB: predicated region body
PF: predicated region fallthrough
CT: control target
= control target key end

     0   :  { %9 = vsyncpa [#allocation3], 0  ;;  %s10046_s0 = inlined_call_operand.vmem [shape: bf16[4,128,32], index: 0, kind: input, shape index: {}]   ;;  %s10047_s1 = inlined_call_operand.vmem [shape: bf16[32,136], index: 1, kind: input, shape index: {}]   ;;  %s10048_s2 = inlined_call_operand.vmem [shape: f32[1,136], index: 2, kind: input, shape index: {}]   ;;  %s10049_s3 = inlined_call_operand.vmem [shape: bf16[4,128,128], index: 3, kind: input, shape index: {}]   ;;  %s10050_s4 = inlined_call_operand.hbm [shape: f32[4,128,128], index: 4, kind: output, shape index: {}]  }
   0x1   :  { %11 = vsyncpa [#allocation3 + $0x1], 0  ;;  %s6594_s15 = smov 0   ;;  %s6596_s16 = smov 0  }
   0x2   :  { %s6598_s17 = smov 0   ;;  %s6600_s18 = smov 0  }
   0x3 LB: > { %s6615_s19 = sadd.s32 4294967295, %s6555_s18   ;;  %s5172_s20 = sadd.s32 4294967294, %s6555_s18   ;;  %s6555_s18 = sphi %s6600_s18, %s10605_s18   ;;  %s6551_s17 = sphi %s6598_s17, %s10604_s17   ;;  %s6547_s16 = sphi %s6596_s16, %s10603_s16   ;;  %s6543_s15 = sphi %s6594_s15, %s10602_s15  }
   0x4   : > { %s6619_s21 = sadd.s32 1, %s6555_s18   ;;  %s118_s22 = sadd.s32 1, %s6551_s17 }
   0x5   : > { %s115_s23 = ssub.s32 %s6555_s18, %s6619_s21  ;;  %p128_p0 = scmp.ne.s32.totalorder %s6551_s17, %s6547_s16 }
   0x6   : > { %p116_p1 = scmp.eq.s32.totalorder %s115_s23, 0  ;;  %p129_p2 = scmp.eq.s32.totalorder %s6615_s19, 1 }
   0x7   : > { %p134_p3 = scmp.ne.s32.totalorder %s6547_s16, %s6543_s15  ;;  %p135_p4 = scmp.eq.s32.totalorder %s5172_s20, 1 }
   0x8   : > { %s6630_s24 = scalar_select %p116_p1, %s6551_s17, %s118_s22  }
   0x9   : > { %p6632_p5 = por %p129_p2, %p128_p0  ;;  %p6636_p6 = por %p135_p4, %p134_p3 }
   0xa   : > { %p5175_p7 = scmp.ge.s32.totalorder %s6555_s18, 1  ;;  %p179_p8 = scmp.lt.s32.totalorder %s6555_s18, 3 }
   0xc   : > { %p180_p9 = pnand %p5175_p7, %p179_p8 }
   0xe   : > { %183 = sbr.rel (%p180_p9) target bundleno = 3340 (0xd0c), region = 36 }
  0x13   : > { %v5957_v0 = vld [vmem:[%s10047_s1 + $0x14] ss:$8 sps:$4 sm:$0xff]   ;;  %s5177_s29 = sshll.u32 %s6615_s19, 1  ;;  %v5959_v1 = vld [vmem:[%s10047_s1 + $0x10] ss:$8 sps:$4 sm:$0xff]   ;;  %v10057_v2 = vmov 0   ;;  %v251_v15 = vlaneseq }
  0x14   : > { %378 = vmatprep.mubr.bf16.mxu0 %v10057_v2  ;;  %p213_p10 = scmp.lt.s32.totalorder %s5177_s29, 3  ;;  %358 = vmatprep.subr.bf16.mxu0 %v5957_v0  ;;  %v5960_v3 = vld [vmem:[%s10047_s1 + $0x4] ss:$8 sps:$4 sm:$0xff]   ;;  %v5962_v4 = vld [vmem:[%s10047_s1] ss:$8 sps:$4 sm:$0xff]   ;;  %vm321_vm0 = vcmask 261120  }
  0x15   : > { %359 = vmatpush1.bf16.msra.mxu0 %v5959_v1  ;;  %v10055_v13 = vmov 4   ;;  %v10051_v14 = vmov 5   ;;  %v6691_v16 = vshrl.u32 %v251_v15, 7  ;;  %v233_v18 = vld [vmem:[%s10048_s2] sm:$0x3]  ;;  %v10053_v30 = vmov 6  }
  0x16   : > { %s10607_s29 = smov (!%p213_p10, %s5177_s29), 3  ;;  %360 = vmatprep.subr.bf16.mxu0 %v5960_v3  ;;  %5854 = vset.pattern.permute.xlu1 %v10055_v13  ;;  %v10071_v37 = vmov 7   ;;  %s6562_s22 = smov 96   ;;  %vm1558_vm1 = vcmask 523520   ;;  %vm2108_vm2 = vcmask 785920   ;;  %vm2658_vm3 = vcmask 1048320  }
  0x17   : > { %s5321_s10 = sshll.u32 %s10607_s29, 6  ;;  %5859 = vset.pattern.permute.xlu0 %v10051_v14  ;;  %10234 = vst [vmem:[#allocation5_spill] sm:$0xff] %v6691_v16  ;;  %v6694_v17 = vsub.s32 1, %v6691_v16  ;;  %v6713_v28 = vsub.s32 0, %v6691_v16  ;;  %s6563_s23 = smov 64  }
  0x18   : > { %s6664_s13 = scalar_lea.vmem %s10046_s0, %s5321_s10  ;;  %s7084_s30 = scalar_lea.vmem %s10049_s3, %s5321_s10 }
  0x19   : > { %361 = vmatpush1.bf16.msra.mxu0 %v5962_v4  ;;  %v5963_v5 = vld [vmem:[%s6664_s13] sm:$0xff]   ;;  %v5964_v6 = vld [vmem:[%s6664_s13 + $0x8] sm:$0xff]   ;;  %v5965_v7 = vld [vmem:[%s6664_s13 + $0x10] sm:$0xff]   ;;  %10235 = vst [vmem:[#allocation6_spill] sm:$0xff] %v6694_v17  ;;  %v6700_v19 = vrot.slane %v233_v18, %v6694_v17  ;;  %v6721_v32 = vrot.slane %v233_v18, %v6713_v28  ;;  %s6565_s12 = smov 32   ;;  %s6566_s5 = smov [#allocation2]  }
  0x1a   : > { %v5966_v8 = vld [vmem:[%s6664_s13 + $0x18] sm:$0xff]   ;;  %v5967_v9 = vld [vmem:[%s6664_s13 + $0x20] sm:$0xff]   ;;  %v5968_v10 = vld [vmem:[%s6664_s13 + $0x28] sm:$0xff]   ;;  %10237 = vst [vmem:[#allocation8_spill] sm:$0xff] %v6713_v28  ;;  %s6499_s6 = sshll.u32 %s6566_s5, 4  ;;  %s6500_s6 = int_to_ptr.vmem [resolvable:$false] %s6499_s6 }
  0x1b   : > { %v5969_v11 = vld [vmem:[%s6664_s13 + $0x30] sm:$0xff]   ;;  %v5970_v12 = vld [vmem:[%s6664_s13 + $0x38] sm:$0xff]   ;;  %10236 = vst [vmem:[#allocation7_spill] sm:$0xff] %v6700_v19  ;;  %10238 = vst [vmem:[#allocation9_spill] sm:$0xff] %v6721_v32  ;;  %s6501_s7 = scalar_lea.vmem %s6500_s6, 8192 }
  0x1c   : > { %5195 = vmatmul.mubr.msk.bf16.vlgmr.msra.gmra.mxu0 %vm321_vm0, %v5963_v5 }
  0x1d   : > { %388 = vmatprep.mubr.bf16.mxu0 %v10057_v2 }
  0x24   : > { %5196 = vmatmul.mubr.msk.bf16.gmra.mxu0 %vm321_vm0, %v5964_v6 }
  0x25   : > { %398 = vmatprep.mubr.bf16.mxu0 %v10057_v2 }
  0x2c   : > { %5197 = vmatmul.mubr.msk.bf16.gmra.mxu0 %vm321_vm0, %v5965_v7 }
  0x2d   : > { %408 = vmatprep.mubr.bf16.mxu0 %v10057_v2 }
  0x34   : > { %5198 = vmatmul.mubr.msk.bf16.gmra.mxu0 %vm321_vm0, %v5966_v8 }
  0x35   : > { %418 = vmatprep.mubr.bf16.mxu0 %v10057_v2 }
  0x3c   : > { %5199 = vmatmul.mubr.msk.bf16.gmra.mxu0 %vm321_vm0, %v5967_v9 }
  0x3d   : > { %428 = vmatprep.mubr.bf16.mxu0 %v10057_v2 }
  0x44   : > { %5200 = vmatmul.mubr.msk.bf16.gmra.mxu0 %vm321_vm0, %v5968_v10 }
  0x45   : > { %438 = vmatprep.mubr.bf16.mxu0 %v10057_v2 }
  0x4c   : > { %5201 = vmatmul.mubr.msk.bf16.gmra.mxu0 %vm321_vm0, %v5969_v11 }
  0x4d   : > { %448 = vmatprep.mubr.bf16.mxu0 %v10057_v2 }
  0x54   : > { %5202 = vmatmul.mubr.msk.bf16.gmra.mxu0 %vm321_vm0, %v5970_v12 }
  0xdc   : > { %v380_v20 = vpop.f32.mrf.mxu0 }
  0xdd   : > { %v381_v43 = vadd.f32 %v380_v20, %v6721_v32 }
  0xde   : > { %v382_v21 = vpop.f32.mrf.mxu0 }
  0xdf   : > { %v6703_v22 = vadd.f32 %v382_v21, %v6700_v19 }
  0xe0   : > { %v384_v23 = vpop.f32.mrf.mxu0 }
  0xe1   : > { %533 = vperm.xlu1 %5854, %v6703_v22   ;;  %v385_v41 = vadd.f32 %v384_v23, %v6721_v32 }
  0xe2   : > { %v386_v24 = vpop.f32.mrf.mxu0 }
  0xe3   : > { %v6707_v25 = vadd.f32 %v386_v24, %v6700_v19  ;;  %v6747_v45 = vpack.c.bf16 %v385_v41, %v381_v43 }
  0xe4   : > { %v390_v26 = vpop.f32.mrf.mxu0 }
  0xe5   : > { %1022 = vperm.xlu0 %5859, %v6707_v25   ;;  %5855 = vset.pattern.permute.xlu1 %v10051_v14  ;;  %v391_v34 = vadd.f32 %v390_v26, %v6721_v32  ;;  %10240 = vst [vmem:[#allocation11_spill] sm:$0xff] %v6747_v45 }
  0xe6   : > { %v392_v27 = vpop.f32.mrf.mxu0  ;;  %1018 = vperm.xlu1 %5855, %v6703_v22  }
  0xe7   : > { %v6764_v51 = vadd.f32 %v392_v27, %v6700_v19 }
  0xe8   : > { %v394_v29 = vpop.f32.mrf.mxu0 }
  0xe9   : > { %5860 = vset.pattern.permute.xlu0 %v10053_v30  ;;  %v395_v35 = vadd.f32 %v394_v29, %v6721_v32 }
  0xea   : > { %v6716_v31 = vpop.f32.mrf.mxu0  ;;  %1580 = vperm.xlu0 %5860, %v6707_v25   ;;  %5856 = vset.pattern.permute.xlu1 %v10053_v30 }
  0xeb   : > { %1576 = vperm.xlu1 %5856, %v6703_v22   ;;  %v6734_v39 = vpack.c.bf16 %v395_v35, %v391_v34  ;;  %v6797_v3 = vadd.f32 %v6716_v31, %v6700_v19 }
  0xec   : > { %v6724_v33 = vpop.f32.mrf.mxu0 }
  0xed   : > { %10239 = vst [vmem:[#allocation10_spill] sm:$0xff] %v6734_v39  ;;  %v401_v34 = vadd.f32 %v6724_v33, %v6721_v32 }
  0xee   : > { %v402_v36 = vpop.f32.mrf.mxu0  ;;  %5861 = vset.pattern.permute.xlu0 %v10071_v37 }
  0xef   : > { %2130 = vperm.xlu0 %5861, %v6707_v25   ;;  %5857 = vset.pattern.permute.xlu1 %v10071_v37  ;;  %v6754_v47 = vadd.f32 %v402_v36, %v6700_v19 }
  0xf0   : > { %v6731_v38 = vpop.f32.mrf.mxu0  ;;  %2126 = vperm.xlu1 %5857, %v6703_v22  }
  0xf1   : > { %v405_v35 = vadd.f32 %v6731_v38, %v6721_v32 }
  0xf2   : > { %v6736_v40 = vpop.f32.mrf.mxu0 }
  0xf3   : > { %1247 = vrot.lane.b32.xlu0 %v6734_v39, %s6562_s22  ;;  %v6852_v36 = vadd.f32 %v6736_v40, %v6700_v19  ;;  %v6864_v33 = vpack.c.bf16 %v405_v35, %v401_v34 }
  0xf4   : > { %v6741_v42 = vpop.f32.mrf.mxu0  ;;  %5858 = vset.pattern.permute.xlu1 %v10055_v13  ;;  %5869 = vset.pattern.permute.xlu0 %v10051_v14 }
  0xf5   : > { %538 = vperm.xlu1 %5858, %v6707_v25   ;;  %v411_v27 = vadd.f32 %v6741_v42, %v6721_v32  ;;  %10248 = vst [vmem:[#allocation19_spill] sm:$0xff] %v6852_v36  ;;  %10251 = vst [vmem:[#allocation22_spill] sm:$0xff] %v6864_v33  ;;  %v775_v40 = vsel %vm321_vm0, %v6864_v33, 1065369472 }
  0xf6   : > { %v412_v44 = vpop.f32.mrf.mxu0 }
  0xf7   : > { %1797 = vrot.lane.b32.xlu0 %v6734_v39, %s6563_s23  ;;  %v6772_v54 = vadd.f32 %v412_v44, %v6700_v19  ;;  %v772_v44 = vsel %vm321_vm0, %v6734_v39, 1065369472 }
  0xf8   : > { %v6751_v46 = vpop.f32.mrf.mxu0 }
  0xf9   : > { %1245 = vrot.lane.b32.xlu1 %v6747_v45, %s6562_s22  ;;  %10241 = vst [vmem:[#allocation12_spill] sm:$0xff] %v6772_v54  ;;  %v415_v29 = vadd.f32 %v6751_v46, %v6721_v32  ;;  %v769_v46 = vsel %vm321_vm0, %v6747_v45, 1065369472 }
  0xfa   : > { %v6758_v48 = vpop.f32.mrf.mxu0 }
  0xfb   : > { %1034 = vperm.xlu0 %5869, %v6754_v47   ;;  %v6854_v41 = vpack.c.bf16 %v415_v29, %v411_v27 }
  0xfc   : > { %v420_v49 = vpop.f32.mrf.mxu0 }
  0xfd   : > { %1795 = vrot.lane.b32.xlu1 %v6747_v45, %s6563_s23  ;;  %v421_v63 = vadd.f32 %v420_v49, %v6721_v32  ;;  %10249 = vst [vmem:[#allocation20_spill] sm:$0xff] %v6854_v41  ;;  %v778_v38 = vsel %vm321_vm0, %v6854_v41, 1065369472 }
  0xfe   : > { %v422_v50 = vpop.f32.mrf.mxu0 }
  0xff   : > { %5870 = vset.pattern.permute.xlu0 %v10053_v30  ;;  %v6785_v60 = vadd.f32 %v422_v50, %v6700_v19  ;;  %v6899_v50 = vadd.f32 %v6758_v48, %v6700_v19 }
 0x100   : > { %v424_v52 = vpop.f32.mrf.mxu0  ;;  %1592 = vperm.xlu0 %5870, %v6754_v47  }
 0x101   : > { %543 = vperm.xlu1 %5858, %v6764_v51   ;;  %10242 = vst [vmem:[#allocation13_spill] sm:$0xff] %v6785_v60  ;;  %v425_v0 = vadd.f32 %v424_v52, %v6721_v32  ;;  %10253 = vst [vmem:[#allocation24_spill] sm:$0xff] %v6899_v50 }
 0x102   : > { %v6769_v53 = vpop.f32.mrf.mxu0 }
 0x103   : > { %v6805_v7 = vpack.c.bf16 %v425_v0, %v421_v63  ;;  %v6915_v48 = vadd.f32 %v6769_v53, %v6700_v19 }
 0x104   : > { %v430_v55 = vpop.f32.mrf.mxu0  ;;  %5874 = vset.pattern.permute.xlu0 %v10051_v14 }
 0x105   : > { %1042 = vperm.xlu0 %5874, %v6772_v54   ;;  %5862 = vset.pattern.permute.xlu1 %v10051_v14  ;;  %10243 = vst [vmem:[#allocation14_spill] sm:$0xff] %v6805_v7  ;;  %v431_v15 = vadd.f32 %v430_v55, %v6721_v32  ;;  %v781_v42 = vsel %vm321_vm0, %v6805_v7, 1065369472  ;;  %10254 = vst [vmem:[#allocation25_spill] sm:$0xff] %v6915_v48 }
 0x106   : > { %v432_v56 = vpop.f32.mrf.mxu0  ;;  %1026 = vperm.xlu1 %5862, %v6764_v51  }
 0x107   : > { %v6829_v24 = vadd.f32 %v432_v56, %v6700_v19 }
 0x108   : > { %v434_v57 = vpop.f32.mrf.mxu0 }
 0x109   : > { %5875 = vset.pattern.permute.xlu0 %v10053_v30  ;;  %v435_v18 = vadd.f32 %v434_v57, %v6721_v32  ;;  %10246 = vst [vmem:[#allocation17_spill] sm:$0xff] %v6829_v24 }
 0x10a   : > { %v6779_v58 = vpop.f32.mrf.mxu0  ;;  %1600 = vperm.xlu0 %5875, %v6772_v54   ;;  %5863 = vset.pattern.permute.xlu1 %v10053_v30 }
 0x10b   : > { %1584 = vperm.xlu1 %5863, %v6764_v51   ;;  %v6832_v26 = vpack.c.bf16 %v435_v18, %v431_v15 }
 0x10c   : > { %v440_v59 = vpop.f32.mrf.mxu0 }
 0x10d   : > { %v441_v5 = vadd.f32 %v440_v59, %v6721_v32  ;;  %10247 = vst [vmem:[#allocation18_spill] sm:$0xff] %v6832_v26  ;;  %v784_v31 = vsel %vm321_vm0, %v6832_v26, 1065369472 }
 0x10e   : > { %v442_v61 = vpop.f32.mrf.mxu0  ;;  %5879 = vset.pattern.permute.xlu0 %v10051_v14 }
 0x10f   : > { %1050 = vperm.xlu0 %5879, %v6785_v60   ;;  %5864 = vset.pattern.permute.xlu1 %v10071_v37  ;;  %v6859_v43 = vadd.f32 %v442_v61, %v6700_v19 }
 0x110   : > { %v444_v62 = vpop.f32.mrf.mxu0  ;;  %2134 = vperm.xlu1 %5864, %v6764_v51  }
 0x111   : > { %v445_v6 = vadd.f32 %v444_v62, %v6721_v32  ;;  %10250 = vst [vmem:[#allocation21_spill] sm:$0xff] %v6859_v43 }
 0x112   : > { %v6793_v1 = vpop.f32.mrf.mxu0 }
 0x113   : > { %5880 = vset.pattern.permute.xlu0 %v10053_v30  ;;  %v6812_v11 = vpack.c.bf16 %v445_v6, %v441_v5 }
 0x114   : > { %v450_v4 = vpop.f32.mrf.mxu0  ;;  %1608 = vperm.xlu0 %5880, %v6785_v60   ;;  %5865 = vset.pattern.permute.xlu1 %v10055_v13 }
 0x115   : > { %548 = vperm.xlu1 %5865, %v6797_v3   ;;  %v451_v9 = vadd.f32 %v450_v4, %v6721_v32  ;;  %10244 = vst [vmem:[#allocation15_spill] sm:$0xff] %v6812_v11  ;;  %v787_v23 = vsel %vm321_vm0, %v6812_v11, 1065369472 }
 0x116   : > { %v6807_v8 = vpop.f32.mrf.mxu0 }
 0x117   : > { %v6889_v49 = vadd.f32 %v6807_v8, %v6700_v19  ;;  %v6983_v8 = vadd.f32 %v6793_v1, %v6700_v19 }
 0x118   : > { %v454_v10 = vpop.f32.mrf.mxu0  ;;  %1253 = vrot.lane.b32.xlu0 %v6805_v7, %s6562_s22 }
 0x119   : > { %v455_v12 = vadd.f32 %v454_v10, %v6721_v32  ;;  %5866 = vset.pattern.permute.xlu1 %v10051_v14  ;;  %5884 = vset.pattern.permute.xlu0 %v10051_v14  ;;  %10252 = vst [vmem:[#allocation23_spill] sm:$0xff] %v6889_v49  ;;  %10260 = vst [vmem:[#allocation31_spill] sm:$0xff] %v6983_v8 }
 0x11a   : > { %1030 = vperm.xlu1 %5866, %v6797_v3  }
 0x11b   : > { %v6820_v20 = vpack.c.bf16 %v455_v12, %v451_v9 }
 0x11c   : > { %1803 = vrot.lane.b32.xlu0 %v6805_v7, %s6563_s23 }
 0x11d   : > { %10245 = vst [vmem:[#allocation16_spill] sm:$0xff] %v6820_v20  ;;  %v790_v21 = vsel %vm321_vm0, %v6820_v20, 1065369472 }
 0x11e   : > { %5532 = vmatprep.subr.bf16.mxu1 %v790_v21  ;;  %5867 = vset.pattern.permute.xlu1 %v10053_v30 }
 0x11f   : > { %5533 = vmatpush3.bf16.msra.mxu1 %v790_v21  ;;  %1588 = vperm.xlu1 %5867, %v6797_v3   ;;  %v456_v21 = vpop.f32.mrf.mxu0 }
 0x120   : > { %1058 = vperm.xlu0 %5884, %v6829_v24   ;;  %5534 = vmatprep.subr.bf16.mxu1 %v787_v23  ;;  %v7012_v27 = vadd.f32 %v456_v21, %v6700_v19 }
 0x122   : > { %10262 = vst [vmem:[#allocation33_spill] sm:$0xff] %v7012_v27 }
 0x123   : > { %5535 = vmatpush3.bf16.msra.mxu1 %v787_v23  ;;  %5868 = vset.pattern.permute.xlu1 %v10055_v13 }
 0x124   : > { %5536 = vmatprep.subr.bf16.mxu1 %v784_v31  ;;  %5885 = vset.pattern.permute.xlu0 %v10053_v30 }
 0x125   : > { %553 = vperm.xlu1 %5868, %v6754_v47   ;;  %1616 = vperm.xlu0 %5885, %v6829_v24  }
 0x127   : > { %5537 = vmatpush3.bf16.msra.mxu1 %v784_v31 }
 0x128   : > { %5538 = vmatprep.subr.bf16.mxu1 %v781_v42 }
 0x129   : > { %558 = vperm.xlu1 %5868, %v6852_v36   ;;  %5889 = vset.pattern.permute.xlu0 %v10051_v14 }
 0x12a   : > { %1066 = vperm.xlu0 %5889, %v6859_v43  }
 0x12b   : > { %5539 = vmatpush3.bf16.msra.mxu1 %v781_v42 }
 0x12c   : > { %5540 = vmatprep.subr.bf16.mxu1 %v778_v38 }
 0x12d   : > { %5871 = vset.pattern.permute.xlu1 %v10051_v14 }
 0x12e   : > { %1038 = vperm.xlu1 %5871, %v6852_v36   ;;  %5890 = vset.pattern.permute.xlu0 %v10053_v30 }
 0x12f   : > { %5541 = vmatpush3.bf16.msra.mxu1 %v778_v38  ;;  %1624 = vperm.xlu0 %5890, %v6859_v43  }
 0x130   : > { %5542 = vmatprep.subr.bf16.mxu1 %v775_v40 }
 0x132   : > { %1249 = vrot.lane.b32.xlu1 %v6864_v33, %s6562_s22 }
 0x133   : > { %5543 = vmatpush3.bf16.msra.mxu1 %v775_v40  ;;  %1257 = vrot.lane.b32.xlu0 %v6812_v11, %s6562_s22 }
 0x134   : > { %5544 = vmatprep.subr.bf16.mxu1 %v772_v44  ;;  %5872 = vset.pattern.permute.xlu1 %v10053_v30 }
 0x135   : > { %5894 = vset.pattern.permute.xlu0 %v10051_v14 }
 0x136   : > { %1596 = vperm.xlu1 %5872, %v6852_v36  }
 0x137   : > { %5545 = vmatpush3.bf16.msra.mxu1 %v772_v44  ;;  %1807 = vrot.lane.b32.xlu0 %v6812_v11, %s6563_s23 }
 0x138   : > { %5546 = vmatprep.subr.bf16.mxu1 %v769_v46 }
 0x13a   : > { %1799 = vrot.lane.b32.xlu1 %v6864_v33, %s6563_s23 }
 0x13b   : > { %1074 = vperm.xlu0 %5894, %v6889_v49   ;;  %5547 = vmatpush3.bf16.msra.mxu1 %v769_v46 }
 0x13c   : > { %5873 = vset.pattern.permute.xlu1 %v10055_v13 }
 0x13e   : > { %563 = vperm.xlu1 %5873, %v6772_v54  }
 0x13f   : > { %5895 = vset.pattern.permute.xlu0 %v10053_v30 }
 0x140   : > { %1632 = vperm.xlu0 %5895, %v6889_v49  }
 0x142   : > { %568 = vperm.xlu1 %5873, %v6899_v50  }
 0x146   : > { %5876 = vset.pattern.permute.xlu1 %v10051_v14 }
 0x147   : > { %1046 = vperm.xlu1 %5876, %v6899_v50  }
 0x14b   : > { %1251 = vrot.lane.b32.xlu1 %v6854_v41, %s6562_s22 }
 0x14c   : > { %5877 = vset.pattern.permute.xlu1 %v10053_v30 }
 0x14f   : > { %1604 = vperm.xlu1 %5877, %v6899_v50  }
 0x153   : > { %1801 = vrot.lane.b32.xlu1 %v6854_v41, %s6563_s23 }
 0x154   : > { %5878 = vset.pattern.permute.xlu1 %v10055_v13 }
 0x157   : > { %573 = vperm.xlu1 %5878, %v6785_v60  }
 0x15b   : > { %578 = vperm.xlu1 %5878, %v6915_v48  }
 0x15c   : > { %v6918_v52 = vpop.permute.xlu1 %533 }
 0x15e   : > { %467 = vxpose.xlu0.b32.start [1/16] (narrow) %v6703_v22, 8 }
 0x15f   : > { %5881 = vset.pattern.permute.xlu1 %v10051_v14 }
 0x160   : > { %1054 = vperm.xlu1 %5881, %v6915_v48   ;;  %v6923_v55 = vpop.permute.xlu0 %1022 }
 0x161   : > { %v6925_v56 = vpop.permute.xlu1 %1018 }
 0x162   : > { %468 = vxpose.xlu0.b32.cont [2/16] (narrow) %v6707_v25, 8  ;;  %v6944_v25 = vadd.f32 %v6779_v58, %v6700_v19 }
 0x164   : > { %5882 = vset.pattern.permute.xlu1 %v10053_v30  ;;  %10257 = vst [vmem:[#allocation28_spill] sm:$0xff] %v6944_v25 }
 0x165   : > { %1612 = vperm.xlu1 %5882, %v6915_v48   ;;  %v6930_v53 = vpop.permute.xlu0 %1580 }
 0x166   : > { %469 = vxpose.xlu0.b32.cont [3/16] (narrow) %v6764_v51, 8  ;;  %v6933_v57 = vpop.permute.xlu1 %1576 }
 0x169   : > { %5883 = vset.pattern.permute.xlu1 %v10055_v13 }
 0x16a   : > { %583 = vperm.xlu1 %5883, %v6829_v24   ;;  %v6937_v22 = vpop.permute.xlu0 %2130  ;;  %470 = vxpose.xlu0.b32.cont [4/16] (narrow) %v6797_v3, 8 }
 0x16b   : > { %10255 = vst [vmem:[#allocation26_spill] sm:$0xff] %v6937_v22  ;;  %v6940_v59 = vpop.permute.xlu1 %2126 }
 0x16c   : > { %10256 = vst [vmem:[#allocation27_spill] sm:$0xff] %v6940_v59 }
 0x16e   : > { %588 = vperm.xlu1 %5883, %v6944_v25   ;;  %471 = vxpose.xlu0.b32.cont [5/16] (narrow) %v6754_v47, 8  ;;  %v6948_v51 = vpop.permute.xlu0 %1247 }
 0x16f   : > { %10258 = vst [vmem:[#allocation29_spill] sm:$0xff] %v6948_v51 }
 0x170   : > { %v6950_v61 = vpop.permute.xlu1 %538 }
 0x172   : > { %5886 = vset.pattern.permute.xlu1 %v10051_v14  ;;  %472 = vxpose.xlu0.b32.cont [6/16] (narrow) %v6852_v36, 8  ;;  %v6957_v63 = vpop.permute.xlu0 %1797 }
 0x173   : > { %1062 = vperm.xlu1 %5886, %v6944_v25  }
 0x174   : > { %v6955_v62 = vpop.permute.xlu1 %1245 }
 0x175   : > { %10259 = vst [vmem:[#allocation30_spill] sm:$0xff] %v6955_v62 }
 0x176   : > { %473 = vxpose.xlu0.b32.cont [7/16] (narrow) %v6772_v54, 8  ;;  %v6967_v0 = vpop.permute.xlu0 %1034 }
 0x177   : > { %1255 = vrot.lane.b32.xlu1 %v6832_v26, %s6562_s22 }
 0x178   : > { %v6962_v58 = vpop.permute.xlu1 %1795  ;;  %5887 = vset.pattern.permute.xlu1 %v10053_v30 }
 0x17a   : > { %474 = vxpose.xlu0.b32.cont [8/16] (narrow) %v6899_v50, 8 }
 0x17b   : > { %1620 = vperm.xlu1 %5887, %v6944_v25   ;;  %v6977_v6 = vpop.permute.xlu0 %1592 }
 0x17c   : > { %v6969_v4 = vpop.permute.xlu1 %543 }
 0x17e   : > { %475 = vxpose.xlu0.b32.cont [9/16] (narrow) %v6785_v60, 8 }
 0x17f   : > { %1805 = vrot.lane.b32.xlu1 %v6832_v26, %s6563_s23 }
 0x180   : > { %5888 = vset.pattern.permute.xlu1 %v10055_v13  ;;  %v6989_v10 = vpop.permute.xlu0 %1042 }
 0x181   : > { %v6975_v5 = vpop.permute.xlu1 %1026 }
 0x182   : > { %476 = vxpose.xlu0.b32.cont [10/16] (narrow) %v6915_v48, 8 }
 0x183   : > { %593 = vperm.xlu1 %5888, %v6859_v43  }
 0x185   : > { %v6996_v15 = vpop.permute.xlu0 %1600 }
 0x186   : > { %477 = vxpose.xlu0.b32.cont [11/16] (narrow) %v6829_v24, 8  ;;  %v6986_v9 = vpop.permute.xlu1 %1584 }
 0x187   : > { %598 = vperm.xlu1 %5888, %v6983_v8  }
 0x18a   : > { %478 = vxpose.xlu0.b32.cont [12/16] (narrow) %v6944_v25, 8  ;;  %v7004_v18 = vpop.permute.xlu0 %1050 }
 0x18b   : > { %5891 = vset.pattern.permute.xlu1 %v10051_v14  ;;  %v6993_v12 = vpop.permute.xlu1 %2134 }
 0x18c   : > { %10261 = vst [vmem:[#allocation32_spill] sm:$0xff] %v6993_v12  ;;  %1070 = vperm.xlu1 %5891, %v6983_v8  }
 0x18e   : > { %479 = vxpose.xlu0.b32.cont [13/16] (narrow) %v6859_v43, 8 }
 0x18f   : > { %v7014_v29 = vpop.permute.xlu0 %1608 }
 0x190   : > { %5892 = vset.pattern.permute.xlu1 %v10053_v30  ;;  %v7000_v1 = vpop.permute.xlu1 %548 }
 0x191   : > { %1628 = vperm.xlu1 %5892, %v6983_v8  }
 0x192   : > { %480 = vxpose.xlu0.b32.cont [14/16] (narrow) %v6983_v8, 8 }
 0x193   : > { %v7022_v34 = vpop.permute.xlu0 %1253 }
 0x194   : > { %10263 = vst [vmem:[#allocation34_spill] sm:$0xff] %v7022_v34 }
 0x195   : > { %5893 = vset.pattern.permute.xlu1 %v10055_v13  ;;  %v7007_v23 = vpop.permute.xlu1 %1030 }
 0x196   : > { %603 = vperm.xlu1 %5893, %v6889_v49   ;;  %481 = vxpose.xlu0.b32.cont [15/16] (narrow) %v6889_v49, 8  ;;  %v5326_v49 = vld [vmem:[%s7084_s30] sm:$0xff]  }
 0x197   : > { %v7031_v38 = vpop.permute.xlu0 %1803  ;;  %v7116_v22 = vunpack.c.l.bf16 %v5326_v49 }
 0x199   : > { %10268 = vst [vmem:[#allocation39_spill] sm:$0xff] %v7116_v22 }
 0x19a   : > { %608 = vperm.xlu1 %5893, %v7012_v27   ;;  %482 = vxpose.xlu0.b32.end [16/16] (narrow) %v7012_v27, 8  ;;  %v7018_v31 = vpop.permute.xlu1 %1588 }
 0x19b   : > { %v7038_v44 = vpop.permute.xlu0 %1058 }
 0x19e   : > { %5896 = vset.pattern.permute.xlu1 %v10051_v14 }
 0x19f   : > { %1078 = vperm.xlu1 %5896, %v7012_v27  }
 0x1a0   : > { %v7024_v35 = vpop.permute.xlu1 %553  ;;  %v7045_v14 = vpop.permute.xlu0 %1616 }
 0x1a3   : > { %1259 = vrot.lane.b32.xlu1 %v6820_v20, %s6562_s22 }
 0x1a4   : > { %v7028_v42 = vpop.permute.xlu1 %558  ;;  %5897 = vset.pattern.permute.xlu1 %v10053_v30 }
 0x1a5   : > { %v7049_v13 = vpop.permute.xlu0 %1066 }
 0x1a7   : > { %1636 = vperm.xlu1 %5897, %v7012_v27  }
 0x1a9   : > { %v7034_v40 = vpop.permute.xlu1 %1038 }
 0x1aa   : > { %v7055_v32 = vpop.permute.xlu0 %1624 }
 0x1ab   : > { %1809 = vrot.lane.b32.xlu1 %v6820_v20, %s6563_s23 }
 0x1ac   : > { %5898 = vset.pattern.permute.xlu1 %v10071_v37 }
 0x1ad   : > { %v7041_v46 = vpop.permute.xlu1 %1249 }
 0x1ae   : > { %10264 = vst [vmem:[#allocation35_spill] sm:$0xff] %v7041_v46  ;;  %v7060_v26 = vpop.permute.xlu0 %1257 }
 0x1af   : > { %10265 = vst [vmem:[#allocation36_spill] sm:$0xff] %v7060_v26 }
 0x1b1   : > { %v7043_v21 = vpop.permute.xlu1 %1596 }
 0x1b2   : > { %v7064_v33 = vpop.permute.xlu0 %1807 }
 0x1b5   : > { %v7047_v30 = vpop.permute.xlu1 %1799 }
 0x1b6   : > { %v7070_v7 = vpop.permute.xlu0 %1074 }
 0x1b9   : > { %v7051_v2 = vpop.permute.xlu1 %563 }
 0x1bb   : > { %v7074_v12 = vpop.permute.xlu0 %1632 }
 0x1bd   : > { %v7053_v19 = vpop.permute.xlu1 %568 }
 0x1c2   : > { %v7057_v20 = vpop.permute.xlu1 %1046 }
 0x1c3   : > { %5899 = vset.pattern.permute.xlu0 %v10071_v37  ;;  %v10078_v37 = vsub.s32 2, %v6691_v16  ;;  %v7118_v16 = vunpack.c.h.bf16 %v5326_v49 }
 0x1c5   : > { %10269 = vst [vmem:[#allocation40_spill] sm:$0xff] %v7118_v16 }
 0x1c6   : > { %v7062_v41 = vpop.permute.xlu1 %1251 }
 0x1c7   : > { %10266 = vst [vmem:[#allocation37_spill] sm:$0xff] %v7062_v41 }
 0x1ca   : > { %v7066_v45 = vpop.permute.xlu1 %1604 }
 0x1ce   : > { %v7068_v11 = vpop.permute.xlu1 %1801 }
 0x1d2   : > { %v7072_v39 = vpop.permute.xlu1 %573 }
 0x1d6   : > { %v7076_v59 = vpop.permute.xlu1 %578 }
 0x1da   : > { %v7086_v62 = vpop.trf.xlu0 }
 0x1db   : > { %10267 = vst [vmem:[#allocation38_spill] sm:$0xff] %v7086_v62  ;;  %v7090_v51 = vrot.slane %v7086_v62, %v6713_v28  ;;  %v7094_v46 = vrot.slane %v7086_v62, %v6694_v17  ;;  %v7099_v41 = vrot.slane %v7086_v62, %v10078_v37  ;;  %v7101_v34 = vpop.permute.xlu1 %1054 }
 0x1dd   : > { %v615_v43 = vadd.f32 %v7090_v51, %v6918_v52  ;;  %v616_v26 = vadd.f32 %v7090_v51, %v6950_v61  ;;  %v1085_v28 = vadd.f32 %v7094_v46, %v6925_v56  ;;  %v1086_v17 = vadd.f32 %v7094_v46, %v6923_v55 }
 0x1de   : > { %v1643_v24 = vadd.f32 %v7099_v41, %v6933_v57  ;;  %v1644_v37 = vadd.f32 %v7099_v41, %v6930_v53  ;;  %v617_v57 = vadd.f32 %v7090_v51, %v6969_v4  ;;  %v1087_v53 = vadd.f32 %v7094_v46, %v6975_v5 }
 0x1df   : > { %v631_v62 = vmul.f32 0.01, %v615_v43  ;;  %v632_v52 = vmul.f32 0.01, %v616_v26  ;;  %v1101_v61 = vmul.f32 0.01, %v1085_v28  ;;  %v1645_v5 = vadd.f32 %v7099_v41, %v6986_v9 }
 0x1e0   : > { %v7120_v27 = vpop.permute.xlu1 %1612  ;;  %v1102_v8 = vmul.f32 0.01, %v1086_v17  ;;  %v1659_v55 = vmul.f32 0.01, %v1643_v24  ;;  %v1660_v48 = vmul.f32 0.01, %v1644_v37 }
 0x1e1   : > { %v647_v56 = vmax.f32 %v615_v43, %v631_v62  ;;  %v648_v25 = vmax.f32 %v616_v26, %v632_v52  ;;  %v1117_v50 = vmax.f32 %v1085_v28, %v1101_v61  ;;  %v5389_v62 = vld [vmem:[%s7084_s30 + $0x8] sm:$0xff]   ;;  %v633_v4 = vmul.f32 0.01, %v617_v57 }
 0x1e2   : > { %v1118_v54 = vmax.f32 %v1086_v17, %v1102_v8  ;;  %v1675_v26 = vmax.f32 %v1643_v24, %v1659_v55  ;;  %v1676_v43 = vmax.f32 %v1644_v37, %v1660_v48  ;;  %v1103_v17 = vmul.f32 0.01, %v1087_v53 }
 0x1e3   : > { %v7127_v60 = vadd.f32 %v7116_v22, %v647_v56  ;;  %v7130_v49 = vadd.f32 %v7118_v16, %v648_v25  ;;  %v7140_v52 = vadd.f32 %v7116_v22, %v1117_v50  ;;  %v618_v28 = vadd.f32 %v7090_v51, %v7000_v1 }
 0x1e4   : > { %v7143_v25 = vadd.f32 %v7118_v16, %v1118_v54  ;;  %v7151_v37 = vunpack.c.l.bf16 %v5389_v62  ;;  %v7154_v24 = vadd.f32 %v7116_v22, %v1675_v26  ;;  %v649_v50 = vmax.f32 %v617_v57, %v633_v4  ;;  %v5390_v4 = vld [vmem:[%s7084_s30 + $0x10] sm:$0xff]  }
 0x1e5   : > { %v7132_v36 = vpop.permute.xlu1 %583  ;;  %679 = vmax.xlane.f32.xlu0 %v7127_v60  ;;  %681 = vmax.xlane.f32.xlu1 %v7130_v49  ;;  %10270 = vst [vmem:[#allocation41_spill] sm:$0xff] %v7140_v52  ;;  %v1088_v54 = vadd.f32 %v7094_v46, %v7007_v23  ;;  %v619_v48 = vadd.f32 %v7090_v51, %v7024_v35  ;;  %v1661_v61 = vmul.f32 0.01, %v1645_v5  ;;  %v634_v56 = vmul.f32 0.01, %v618_v28 }
 0x1e6   : > { %10271 = vst [vmem:[#allocation42_spill] sm:$0xff] %v7143_v25  ;;  %10272 = vst [vmem:[#allocation43_spill] sm:$0xff] %v7151_v37  ;;  %v7161_v9 = vadd.f32 %v7118_v16, %v1676_v43  ;;  %v1119_v1 = vmax.f32 %v1087_v53, %v1103_v17  ;;  %v7165_v55 = vunpack.c.h.bf16 %v5389_v62  ;;  %v7170_v57 = vadd.f32 %v7151_v37, %v649_v50 }
 0x1e7   : > { %v1104_v23 = vmul.f32 0.01, %v1088_v54  ;;  %v635_v35 = vmul.f32 0.01, %v619_v48  ;;  %v1646_v43 = vadd.f32 %v7099_v41, %v7018_v31  ;;  %v1677_v17 = vmax.f32 %v1645_v5, %v1661_v61 }
 0x1e8   : > { %10273 = vst [vmem:[#allocation44_spill] sm:$0xff] %v7161_v9  ;;  %10274 = vst [vmem:[#allocation45_spill] sm:$0xff] %v7165_v55  ;;  %v7176_v53 = vadd.f32 %v7151_v37, %v1119_v1  ;;  %v1089_v62 = vadd.f32 %v7094_v46, %v6967_v0  ;;  %v7182_v50 = vunpack.c.l.bf16 %v5390_v4  ;;  %v1647_v31 = vadd.f32 %v7099_v41, %v6977_v6 }
 0x1e9   : > { %v7147_v8 = vpop.permute.xlu1 %588  ;;  %1149 = vmax.xlane.f32.xlu0 %v7140_v52  ;;  %1151 = vmax.xlane.f32.xlu1 %v7143_v25  ;;  %v650_v25 = vmax.f32 %v618_v28, %v634_v56  ;;  %v1120_v22 = vmax.f32 %v1088_v54, %v1104_v23  ;;  %v651_v16 = vmax.f32 %v619_v48, %v635_v35 }
 0x1ea   : > { %10275 = vst [vmem:[#allocation46_spill] sm:$0xff] %v7176_v53  ;;  %10276 = vst [vmem:[#allocation47_spill] sm:$0xff] %v7182_v50  ;;  %v7189_v5 = vadd.f32 %v7151_v37, %v1677_v17  ;;  %v1105_v0 = vmul.f32 0.01, %v1089_v62  ;;  %v620_v1 = vadd.f32 %v7090_v51, %v7028_v42  ;;  %v1090_v42 = vadd.f32 %v7094_v46, %v7034_v40 }
 0x1eb   : > { %v7192_v28 = vadd.f32 %v7165_v55, %v650_v25  ;;  %v7201_v48 = vadd.f32 %v7165_v55, %v1120_v22  ;;  %v7204_v6 = vadd.f32 %v7182_v50, %v651_v16  ;;  %v1663_v25 = vmul.f32 0.01, %v1647_v31 }
 0x1ec   : > { %v1121_v56 = vmax.f32 %v1089_v62, %v1105_v0  ;;  %v636_v23 = vmul.f32 0.01, %v620_v1  ;;  %v621_v35 = vadd.f32 %v7090_v51, %v7051_v2  ;;  %v7212_v17 = vunpack.c.h.bf16 %v5390_v4 }
 0x1ed   : > { %1707 = vmax.xlane.f32.xlu0 %v7154_v24  ;;  %1709 = vmax.xlane.f32.xlu1 %v7161_v9  ;;  %v1662_v9 = vmul.f32 0.01, %v1646_v43  ;;  %10277 = vst [vmem:[#allocation48_spill] sm:$0xff] %v7201_v48  ;;  %v1648_v62 = vadd.f32 %v7099_v41, %v7043_v21  ;;  %v1091_v40 = vadd.f32 %v7094_v46, %v6989_v10 }
 0x1ee   : > { %v7167_v26 = vpop.permute.xlu1 %1062  ;;  %10278 = vst [vmem:[#allocation49_spill] sm:$0xff] %v7212_v17  ;;  %v7225_v2 = vadd.f32 %v7182_v50, %v1121_v56  ;;  %v652_v0 = vmax.f32 %v620_v1, %v636_v23  ;;  %v637_v4 = vmul.f32 0.01, %v621_v35  ;;  %v1649_v10 = vadd.f32 %v7099_v41, %v6996_v15 }
 0x1ef   : > { %v1678_v61 = vmax.f32 %v1646_v43, %v1662_v9  ;;  %v1679_v9 = vmax.f32 %v1647_v31, %v1663_v25  ;;  %v5391_v43 = vld [vmem:[%s7084_s30 + $0x18] sm:$0xff]   ;;  %v1664_v21 = vmul.f32 0.01, %v1648_v62  ;;  %v1092_v15 = vadd.f32 %v7094_v46, %v7057_v20 }
 0x1f0   : > { %10279 = vst [vmem:[#allocation50_spill] sm:$0xff] %v7225_v2  ;;  %v7239_v1 = vadd.f32 %v7212_v17, %v652_v0  ;;  %v653_v23 = vmax.f32 %v621_v35, %v637_v4  ;;  %v1665_v37 = vmul.f32 0.01, %v1649_v10  ;;  %v7259_v35 = vunpack.c.h.bf16 %v5391_v43  ;;  %v5392_v4 = vld [vmem:[%s7084_s30 + $0x20] sm:$0xff]  }
 0x1f1   : > { %683 = vmax.xlane.f32.xlu1 %v7170_v57  ;;  %1153 = vmax.xlane.f32.xlu0 %v7176_v53  ;;  %v7217_v16 = vadd.f32 %v7165_v55, %v1678_v61  ;;  %v7229_v61 = vunpack.c.l.bf16 %v5391_v43  ;;  %v7234_v25 = vadd.f32 %v7182_v50, %v1679_v9  ;;  %v1107_v53 = vmul.f32 0.01, %v1091_v40 }
 0x1f2   : > { %v7184_v52 = vpop.permute.xlu1 %1255  ;;  %v1680_v9 = vmax.f32 %v1648_v62, %v1664_v21  ;;  %10282 = vst [vmem:[#allocation53_spill] sm:$0xff] %v7259_v35  ;;  %v1681_v62 = vmax.f32 %v1649_v10, %v1665_v37  ;;  %v1093_v43 = vadd.f32 %v7094_v46, %v7004_v18  ;;  %v624_v10 = vadd.f32 %v7090_v51, %v7076_v59 }
 0x1f3   : > { %10280 = vst [vmem:[#allocation51_spill] sm:$0xff] %v7229_v61  ;;  %v1123_v50 = vmax.f32 %v1091_v40, %v1107_v53  ;;  %v1108_v40 = vmul.f32 0.01, %v1092_v15 }
 0x1f4   : > { %v7262_v53 = vadd.f32 %v7212_v17, %v1680_v9  ;;  %v7276_v9 = vunpack.c.l.bf16 %v5392_v4  ;;  %v7279_v37 = vadd.f32 %v7229_v61, %v1681_v62 }
 0x1f5   : > { %1711 = vmax.xlane.f32.xlu0 %v7189_v5  ;;  %685 = vmax.xlane.f32.xlu1 %v7192_v28  ;;  %v7265_v20 = vadd.f32 %v7229_v61, %v1123_v50  ;;  %v1124_v50 = vmax.f32 %v1092_v15, %v1108_v40  ;;  %v1094_v15 = vadd.f32 %v7094_v46, %v7101_v34  ;;  %v7306_v34 = vunpack.c.h.bf16 %v5392_v4 }
 0x1f6   : > { %v7198_v54 = vpop.permute.xlu1 %1620  ;;  %10284 = vst [vmem:[#allocation55_spill] sm:$0xff] %v7276_v9  ;;  %10285 = vst [vmem:[#allocation56_spill] sm:$0xff] %v7279_v37 }
 0x1f7   : > { %10283 = vst [vmem:[#allocation54_spill] sm:$0xff] %v7265_v20  ;;  %v7297_v59 = vadd.f32 %v7259_v35, %v1124_v50  ;;  %10287 = vst [vmem:[#allocation58_spill] sm:$0xff] %v7306_v34  ;;  %v1652_v50 = vadd.f32 %v7099_v41, %v7120_v27 }
 0x1f9   : > { %1155 = vmax.xlane.f32.xlu0 %v7201_v48  ;;  %687 = vmax.xlane.f32.xlu1 %v7204_v6  ;;  %v1106_v48 = vmul.f32 0.01, %v1090_v42  ;;  %10286 = vst [vmem:[#allocation57_spill] sm:$0xff] %v7297_v59  ;;  %v1668_v4 = vmul.f32 0.01, %v1652_v50 }
 0x1fa   : > { %v7214_v22 = vpop.permute.xlu1 %1805 }
 0x1fb   : > { %v1122_v56 = vmax.f32 %v1090_v42, %v1106_v48  ;;  %v7253_v48 = vadd.f32 %v7229_v61, %v653_v23  ;;  %v623_v42 = vadd.f32 %v7090_v51, %v7072_v39  ;;  %v1650_v39 = vadd.f32 %v7099_v41, %v7066_v45 }
 0x1fd   : > { %1713 = vmax.xlane.f32.xlu0 %v7217_v16  ;;  %1157 = vmax.xlane.f32.xlu1 %v7225_v2  ;;  %v622_v2 = vadd.f32 %v7090_v51, %v7053_v19  ;;  %v7250_v0 = vadd.f32 %v7212_v17, %v1122_v56  ;;  %v639_v23 = vmul.f32 0.01, %v623_v42 }
 0x1fe   : > { %v7231_v31 = vpop.permute.xlu1 %593 }
 0x1ff   : > { %10281 = vst [vmem:[#allocation52_spill] sm:$0xff] %v7250_v0  ;;  %v638_v19 = vmul.f32 0.01, %v622_v2  ;;  %v655_v18 = vmax.f32 %v623_v42, %v639_v23  ;;  %v640_v23 = vmul.f32 0.01, %v624_v10 }
 0x201   : > { %1715 = vmax.xlane.f32.xlu1 %v7234_v25  ;;  %689 = vmax.xlane.f32.xlu0 %v7239_v1  ;;  %v654_v56 = vmax.f32 %v622_v2, %v638_v19  ;;  %v1651_v2 = vadd.f32 %v7099_v41, %v7014_v29  ;;  %v1666_v19 = vmul.f32 0.01, %v1650_v39  ;;  %v625_v29 = vadd.f32 %v7090_v51, %v7132_v36 }
 0x202   : > { %v7245_v55 = vpop.permute.xlu1 %598  ;;  %v7300_v42 = vadd.f32 %v7276_v9, %v655_v18  ;;  %v1110_v36 = vmul.f32 0.01, %v1094_v15 }
 0x203   : > { %v7286_v45 = vadd.f32 %v7259_v35, %v654_v56  ;;  %v1667_v62 = vmul.f32 0.01, %v1651_v2  ;;  %v1682_v40 = vmax.f32 %v1650_v39, %v1666_v19  ;;  %v641_v61 = vmul.f32 0.01, %v625_v29 }
 0x204   : > { %v656_v39 = vmax.f32 %v624_v10, %v640_v23  ;;  %v1653_v23 = vadd.f32 %v7099_v41, %v7045_v14 }
 0x205   : > { %1159 = vmax.xlane.f32.xlu0 %v7250_v0  ;;  %691 = vmax.xlane.f32.xlu1 %v7253_v48  ;;  %v1109_v0 = vmul.f32 0.01, %v1093_v43  ;;  %v7311_v18 = vadd.f32 %v7259_v35, %v1682_v40  ;;  %v657_v27 = vmax.f32 %v625_v29, %v641_v61  ;;  %v5393_v40 = vld [vmem:[%s7084_s30 + $0x28] sm:$0xff]  }
 0x206   : > { %v7329_v10 = vadd.f32 %v7306_v34, %v656_v39  ;;  %v7335_v61 = vunpack.c.l.bf16 %v5393_v40 }
 0x207   : > { %v7268_v21 = vpop.permute.xlu1 %1070  ;;  %v1125_v56 = vmax.f32 %v1093_v43, %v1109_v0  ;;  %v1095_v43 = vadd.f32 %v7094_v46, %v7038_v44 }
 0x208   : > { %10289 = vst [vmem:[#allocation60_spill] sm:$0xff] %v7335_v61  ;;  %v7345_v39 = vadd.f32 %v7335_v61, %v657_v27 }
 0x209   : > { %1717 = vmax.xlane.f32.xlu0 %v7262_v53  ;;  %1161 = vmax.xlane.f32.xlu1 %v7265_v20  ;;  %v7314_v0 = vadd.f32 %v7276_v9, %v1125_v56  ;;  %v1111_v44 = vmul.f32 0.01, %v1095_v43 }
 0x20b   : > { %10288 = vst [vmem:[#allocation59_spill] sm:$0xff] %v7314_v0  ;;  %v1127_v14 = vmax.f32 %v1095_v43, %v1111_v44 }
 0x20c   : > { %v7288_v17 = vpop.permute.xlu1 %1628 }
 0x20d   : > { %1719 = vmax.xlane.f32.xlu1 %v7279_v37  ;;  %693 = vmax.xlane.f32.xlu0 %v7286_v45  ;;  %v1683_v37 = vmax.f32 %v1651_v2, %v1667_v62  ;;  %v626_v2 = vadd.f32 %v7090_v51, %v7147_v8  ;;  %v1126_v62 = vmax.f32 %v1094_v15, %v1110_v36 }
 0x20e   : > { %v1096_v8 = vadd.f32 %v7094_v46, %v7167_v26  ;;  %v1654_v26 = vadd.f32 %v7099_v41, %v7198_v54  ;;  %v1097_v54 = vadd.f32 %v7094_v46, %v7049_v13 }
 0x20f   : > { %v7326_v56 = vadd.f32 %v7276_v9, %v1683_v37  ;;  %v642_v29 = vmul.f32 0.01, %v626_v2  ;;  %v1684_v37 = vmax.f32 %v1652_v50, %v1668_v4  ;;  %v7342_v36 = vadd.f32 %v7306_v34, %v1126_v62 }
 0x210   : > { %v1112_v35 = vmul.f32 0.01, %v1096_v8  ;;  %v7356_v62 = vunpack.c.h.bf16 %v5393_v40  ;;  %v1670_v40 = vmul.f32 0.01, %v1654_v26  ;;  %v1113_v13 = vmul.f32 0.01, %v1097_v54 }
 0x211   : > { %v7302_v20 = vpop.permute.xlu1 %603  ;;  %1163 = vmax.xlane.f32.xlu0 %v7297_v59  ;;  %695 = vmax.xlane.f32.xlu1 %v7300_v42  ;;  %10290 = vst [vmem:[#allocation61_spill] sm:$0xff] %v7342_v36  ;;  %v627_v59 = vadd.f32 %v7090_v51, %v7231_v31  ;;  %v7354_v4 = vadd.f32 %v7306_v34, %v1684_v37 }
 0x212   : > { %v7362_v31 = vadd.f32 %v7335_v61, %v1127_v14  ;;  %v658_v44 = vmax.f32 %v626_v2, %v642_v29  ;;  %v1128_v2 = vmax.f32 %v1096_v8, %v1112_v35  ;;  %v1655_v34 = vadd.f32 %v7099_v41, %v7055_v32 }
 0x213   : > { %v629_v32 = vadd.f32 %v7090_v51, %v7302_v20  ;;  %v1656_v20 = vadd.f32 %v7099_v41, %v7288_v17 }
 0x214   : > { %10291 = vst [vmem:[#allocation62_spill] sm:$0xff] %v7362_v31 }
 0x215   : > { %v7318_v19 = vpop.permute.xlu1 %608  ;;  %1721 = vmax.xlane.f32.xlu0 %v7311_v18  ;;  %1165 = vmax.xlane.f32.xlu1 %v7314_v0  ;;  %v1669_v0 = vmul.f32 0.01, %v1653_v23  ;;  %v1672_v17 = vmul.f32 0.01, %v1656_v20 }
 0x217   : > { %v1685_v27 = vmax.f32 %v1653_v23, %v1669_v0  ;;  %v7377_v0 = vadd.f32 %v7356_v62, %v658_v44  ;;  %v5394_v23 = vld [vmem:[%s7084_s30 + $0x30] sm:$0xff]   ;;  %v1098_v44 = vadd.f32 %v7094_v46, %v7268_v21  ;;  %v1830_v21 = vsel %vm321_vm0, %v7064_v33, 1065369472 }
 0x218   : > { %v7384_v9 = vunpack.c.l.bf16 %v5394_v23  ;;  %v1099_v33 = vadd.f32 %v7094_v46, %v7070_v7 }
 0x219   : > { %1723 = vmax.xlane.f32.xlu1 %v7326_v56  ;;  %697 = vmax.xlane.f32.xlu0 %v7329_v10  ;;  %v7374_v14 = vadd.f32 %v7335_v61, %v1685_v27  ;;  %v1671_v61 = vmul.f32 0.01, %v1655_v34 }
 0x21a   : > { %v7339_v15 = vpop.permute.xlu1 %1078  ;;  %v1115_v7 = vmul.f32 0.01, %v1099_v33 }
 0x21d   : > { %1167 = vmax.xlane.f32.xlu0 %v7342_v36  ;;  %699 = vmax.xlane.f32.xlu1 %v7345_v39  ;;  %v643_v36 = vmul.f32 0.01, %v627_v59 }
 0x21e   : > { %v1260_v50 = vpop.permute.xlu1 %1259 }
 0x21f   : > { %v7359_v43 = vsel %vm321_vm0, %v1260_v50, 1065369472  ;;  %v628_v50 = vadd.f32 %v7090_v51, %v7245_v55  ;;  %v659_v29 = vmax.f32 %v627_v59, %v643_v36  ;;  %v1686_v55 = vmax.f32 %v1654_v26, %v1670_v40 }
 0x220   : > { %5564 = vmatprep.subr.bf16.mxu1 %v7359_v43  ;;  %v7390_v59 = vadd.f32 %v7356_v62, %v1128_v2  ;;  %v1129_v36 = vmax.f32 %v1097_v54, %v1113_v13  ;;  %v7401_v26 = vunpack.c.h.bf16 %v5394_v23  ;;  %v645_v2 = vmul.f32 0.01, %v629_v32 }
 0x221   : > { %1725 = vmax.xlane.f32.xlu0 %v7354_v4  ;;  %1169 = vmax.xlane.f32.xlu1 %v7362_v31  ;;  %v644_v27 = vmul.f32 0.01, %v628_v50  ;;  %v7395_v8 = vadd.f32 %v7384_v9, %v659_v29  ;;  %v7406_v40 = vadd.f32 %v7356_v62, %v1686_v55  ;;  %v1687_v13 = vmax.f32 %v1655_v34, %v1671_v61 }
 0x222   : > { %v7369_v37 = vpop.permute.xlu1 %1636  ;;  %v7409_v29 = vadd.f32 %v7384_v9, %v1129_v36  ;;  %v1827_v23 = vsel %vm321_vm0, %v7214_v22, 1065369472  ;;  %v1657_v61 = vadd.f32 %v7099_v41, %v7074_v12  ;;  %v1824_v22 = vsel %vm321_vm0, %v7031_v38, 1065369472 }
 0x223   : > { %v660_v54 = vmax.f32 %v628_v50, %v644_v27  ;;  %v5395_v27 = vld [vmem:[%s7084_s30 + $0x38] sm:$0xff]   ;;  %v7422_v34 = vadd.f32 %v7384_v9, %v1687_v13  ;;  %v1821_v38 = vsel %vm321_vm0, %v7068_v11, 1065369472  ;;  %v1818_v13 = vsel %vm321_vm0, %v7047_v30, 1065369472 }
 0x224   : > { %v7430_v36 = vunpack.c.l.bf16 %v5395_v27  ;;  %v1673_v12 = vmul.f32 0.01, %v1657_v61  ;;  %v6491_v30 = vld [vmem:[%s10047_s1 + $0x14] ss:$8 sps:$4 sm:$0xff]  }
 0x225   : > { %1727 = vmax.xlane.f32.xlu1 %v7374_v14  ;;  %701 = vmax.xlane.f32.xlu0 %v7377_v0  ;;  %v7418_v50 = vadd.f32 %v7401_v26, %v660_v54 }
 0x226   : > { %v1810_v31 = vpop.permute.xlu1 %1809 }
 0x227   : > { %v1833_v35 = vsel %vm321_vm0, %v1810_v31, 1065369472  ;;  %v1114_v31 = vmul.f32 0.01, %v1098_v44 }
 0x228   : > { %5596 = vmatprep.subr.bf16.mxu0 %v1833_v35 }
 0x229   : > { %5597 = vmatpush3.bf16.msra.mxu0 %v1833_v35  ;;  %1171 = vmax.xlane.f32.xlu0 %v7390_v59  ;;  %v1130_v55 = vmax.f32 %v1098_v44, %v1114_v31  ;;  %v661_v35 = vmax.f32 %v629_v32, %v645_v2  ;;  %v1688_v32 = vmax.f32 %v1656_v20, %v1672_v17  ;;  %v10292_v17 = vld [vmem:[#allocation19_spill] sm:$0xff] }
 0x22a   : > { %703 = vmax.xlane.f32.xlu1 %v7395_v8  ;;  %5598 = vmatprep.subr.bf16.mxu0 %v1830_v21  ;;  %v1131_v31 = vmax.f32 %v1099_v33, %v1115_v7  ;;  %v1689_v20 = vmax.f32 %v1657_v61, %v1673_v12  ;;  %v1815_v33 = vsel %vm321_vm0, %v6957_v63, 1065369472  ;;  %v10293_v63 = vld [vmem:[#allocation12_spill] sm:$0xff]  ;;  %v10298_v61 = vld [vmem:[#allocation31_spill] sm:$0xff] }
 0x22b   : > { %v7433_v44 = vadd.f32 %v7401_v26, %v1130_v55  ;;  %v7443_v54 = vadd.f32 %v7401_v26, %v1688_v32  ;;  %v10294_v55 = vld [vmem:[#allocation24_spill] sm:$0xff]  ;;  %v1100_v32 = vadd.f32 %v7094_v46, %v7339_v15  ;;  %v10300_v15 = vld [vmem:[#allocation5_spill] sm:$0xff] }
 0x22c   : > { %v7446_v2 = vadd.f32 %v7430_v36, %v1131_v31  ;;  %v7453_v11 = vadd.f32 %v7430_v36, %v1689_v20  ;;  %v10297_v7 = vld [vmem:[#allocation28_spill] sm:$0xff] }
 0x22d   : > { %5599 = vmatpush3.bf16.msra.mxu0 %v1830_v21  ;;  %1729 = vmax.xlane.f32.xlu0 %v7406_v40  ;;  %v7436_v21 = vadd.f32 %v7430_v36, %v661_v35  ;;  %v10295_v35 = vld [vmem:[#allocation13_spill] sm:$0xff] }
 0x22e   : > { %1173 = vmax.xlane.f32.xlu1 %v7409_v29  ;;  %5600 = vmatprep.subr.bf16.mxu0 %v1827_v23 }
 0x231   : > { %5601 = vmatpush3.bf16.msra.mxu0 %v1827_v23  ;;  %705 = vmax.xlane.f32.xlu0 %v7418_v50  ;;  %v1812_v23 = vsel %vm321_vm0, %v6962_v58, 1065369472  ;;  %v10296_v58 = vld [vmem:[#allocation25_spill] sm:$0xff] }
 0x232   : > { %1731 = vmax.xlane.f32.xlu1 %v7422_v34  ;;  %5602 = vmatprep.subr.bf16.mxu0 %v1824_v22 }
 0x235   : > { %5603 = vmatpush3.bf16.msra.mxu0 %v1824_v22  ;;  %1175 = vmax.xlane.f32.xlu0 %v7433_v44  ;;  %v10299_v22 = vld [vmem:[#allocation33_spill] sm:$0xff] }
 0x236   : > { %707 = vmax.xlane.f32.xlu1 %v7436_v21  ;;  %5604 = vmatprep.subr.bf16.mxu0 %v1821_v38 }
 0x239   : > { %5605 = vmatpush3.bf16.msra.mxu0 %v1821_v38  ;;  %1733 = vmax.xlane.f32.xlu0 %v7443_v54 }
 0x23a   : > { %1177 = vmax.xlane.f32.xlu1 %v7446_v2  ;;  %5606 = vmatprep.subr.bf16.mxu0 %v1818_v13 }
 0x23d   : > { %5607 = vmatpush3.bf16.msra.mxu0 %v1818_v13  ;;  %v1116_v13 = vmul.f32 0.01, %v1100_v32 }
 0x23e   : > { %1735 = vmax.xlane.f32.xlu1 %v7453_v11  ;;  %5608 = vmatprep.subr.bf16.mxu0 %v1815_v33 }
 0x241   : > { %5609 = vmatpush3.bf16.msra.mxu0 %v1815_v33  ;;  %v1658_v33 = vadd.f32 %v7099_v41, %v7369_v37 }
 0x242   : > { %5610 = vmatprep.subr.bf16.mxu0 %v1812_v23 }
 0x243   : > { %v1674_v46 = vmul.f32 0.01, %v1658_v33 }
 0x245   : > { %5611 = vmatpush3.bf16.msra.mxu0 %v1812_v23  ;;  %v7481_v23 = vunpack.c.h.bf16 %v5395_v27  ;;  %v10301_v27 = vld [vmem:[#allocation44_spill] sm:$0xff] }
 0x246   : > { %2768 = vmatprep.subr.bf16.mxu0 %v6491_v30 }
 0x24f   : > { %2138 = vperm.xlu1 %5898, %v6797_v3   ;;  %2142 = vperm.xlu0 %5899, %v6754_v47   ;;  %v630_v3 = vadd.f32 %v7090_v51, %v7318_v19 }
 0x251   : > { %v646_v47 = vmul.f32 0.01, %v630_v3 }
 0x253   : > { %2146 = vperm.xlu1 %5898, %v10292_v17   ;;  %2150 = vperm.xlu0 %5899, %v10293_v63   ;;  %v662_v30 = vmax.f32 %v630_v3, %v646_v47 }
 0x257   : > { %2154 = vperm.xlu1 %5898, %v10294_v55   ;;  %2158 = vperm.xlu0 %5899, %v10295_v35   ;;  %v10114_v55 = vsub.s32 3, %v10300_v15 }
 0x25b   : > { %2162 = vperm.xlu1 %5898, %v10296_v58  }
 0x25f   : > { %2170 = vperm.xlu1 %5898, %v10297_v7   ;;  %v1690_v7 = vmax.f32 %v1658_v33, %v1674_v46 }
 0x263   : > { %2178 = vperm.xlu1 %5898, %v10298_v61  }
 0x267   : > { %2186 = vperm.xlu1 %5898, %v10299_v22   ;;  %v10302_v22 = vld [vmem:[#allocation38_spill] sm:$0xff] }
 0x268   : > { %v7500_v3 = vrot.slane %v10302_v22, %v10114_v55 }
 0x26e   : > { %v680_v31 = vpop.xlane.xlu0 %679  ;;  %v682_v12 = vpop.xlane.xlu1 %681 }
 0x26f   : > { %v711_v38 = vsub.f32 %v7127_v60, %v680_v31  ;;  %v712_v20 = vsub.f32 %v7130_v49, %v682_v12  ;;  %v7488_v60 = vadd.f32 %v7481_v23, %v662_v30  ;;  %v1132_v49 = vmax.f32 %v1100_v32, %v1116_v13 }
 0x271   : > { %v727_v17 = vmul.f32 1.442695, %v711_v38  ;;  %v729_v63 = vmul.f32 1.442695, %v712_v20  ;;  %v7495_v61 = vadd.f32 %v7481_v23, %v1132_v49  ;;  %v7507_v38 = vadd.f32 %v7481_v23, %v1690_v7  ;;  %v10303_v20 = vld [vmem:[#allocation26_spill] sm:$0xff] }
 0x272   : > { %v7483_v51 = vpop.xlane.xlu0 %1149  ;;  %v7485_v19 = vpop.xlane.xlu1 %1151  ;;  %v2194_v13 = vadd.f32 %v7500_v3, %v10303_v20 }
 0x273   : > { %5979 = vpow2.f32 %v727_v17 }
 0x274   : > { %5981 = vpow2.f32 %v729_v63 }
 0x276   : > { %v1708_v35 = vpop.xlane.xlu0 %1707  ;;  %709 = vmax.xlane.f32.xlu0 %v7488_v60  ;;  %v1710_v41 = vpop.xlane.xlu1 %1709 }
 0x277   : > { %v1739_v37 = vsub.f32 %v7154_v24, %v1708_v35  ;;  %v1740_v58 = vsub.f32 %v10301_v27, %v1710_v41  ;;  %v2210_v41 = vmul.f32 0.01, %v2194_v13 }
 0x279   : > { %v1755_v47 = vmul.f32 1.442695, %v1739_v37  ;;  %v1757_v32 = vmul.f32 1.442695, %v1740_v58  ;;  %v2226_v7 = vmax.f32 %v2194_v13, %v2210_v41 }
 0x27a   : > { %v7502_v31 = vpop.xlane.xlu0 %1153  ;;  %1179 = vmax.xlane.f32.xlu0 %v7495_v61  ;;  %v684_v12 = vpop.xlane.xlu1 %683 }
 0x27b   : > { %5983 = vpow2.f32 %v1755_v47  ;;  %v713_v24 = vsub.f32 %v7170_v57, %v684_v12 }
 0x27c   : > { %5985 = vpow2.f32 %v1757_v32 }
 0x27d   : > { %v731_v17 = vmul.f32 1.442695, %v713_v24 }
 0x27e   : > { %v1712_v33 = vpop.xlane.xlu0 %1711  ;;  %1737 = vmax.xlane.f32.xlu0 %v7507_v38  ;;  %v686_v30 = vpop.xlane.xlu1 %685 }
 0x27f   : > { %v714_v63 = vsub.f32 %v7192_v28, %v686_v30  ;;  %v1741_v57 = vsub.f32 %v7189_v5, %v1712_v33  ;;  %5987 = vpow2.f32 %v731_v17  ;;  %v10304_v5 = vld [vmem:[#allocation40_spill] sm:$0xff] }
 0x280   : > { %v5980_v46 = vpop.eup %5979  ;;  %v7521_v33 = vadd.f32 %v10304_v5, %v2226_v7 }
 0x281   : > { %v5982_v49 = vpop.eup %5981  ;;  %v733_v35 = vmul.f32 1.442695, %v714_v63  ;;  %v1759_v22 = vmul.f32 1.442695, %v1741_v57 }
 0x282   : > { %v7514_v37 = vpop.xlane.xlu0 %1155  ;;  %v688_v27 = vpop.xlane.xlu1 %687  ;;  %v759_v58 = vpack.c.bf16 %v5982_v49, %v5980_v46 }
 0x283   : > { %5989 = vpow2.f32 %v733_v35  ;;  %v715_v47 = vsub.f32 %v7204_v6, %v688_v27 }
 0x284   : > { %5548 = vmatprep.mubr.bf16.mxu1 %v759_v58  ;;  %5991 = vpow2.f32 %v1759_v22 }
 0x285   : > { %v735_v63 = vmul.f32 1.442695, %v715_v47 }
 0x286   : > { %v1714_v32 = vpop.xlane.xlu0 %1713  ;;  %v7517_v12 = vpop.xlane.xlu1 %1157 }
 0x287   : > { %v1742_v28 = vsub.f32 %v7217_v16, %v1714_v32 }
 0x288   : > { %v5984_v24 = vpop.eup %5983 }
 0x289   : > { %v5986_v20 = vpop.eup %5985  ;;  %v1761_v30 = vmul.f32 1.442695, %v1742_v28  ;;  %v10305_v28 = vld [vmem:[#allocation17_spill] sm:$0xff] }
 0x28a   : > { %v690_v17 = vpop.xlane.xlu0 %689  ;;  %v1716_v46 = vpop.xlane.xlu1 %1715  ;;  %v1787_v49 = vpack.c.bf16 %v5986_v20, %v5984_v24 }
 0x28b   : > { %5993 = vpow2.f32 %v1761_v30  ;;  %v716_v13 = vsub.f32 %v7239_v1, %v690_v17  ;;  %2259 = vmax.xlane.f32.xlu1 %v7521_v33  ;;  %v1743_v16 = vsub.f32 %v7234_v25, %v1716_v46  ;;  %v10306_v25 = vld [vmem:[#allocation36_spill] sm:$0xff] }
 0x28c   : > { %5612 = vmatprep.mubr.bf16.mxu0 %v1787_v49  ;;  %5995 = vpow2.f32 %v735_v63  ;;  %v5988_v57 = vpop.eup %5987  ;;  %v1280_v20 = vsel %vm321_vm0, %v10306_v25, 1065369472 }
 0x28d   : > { %v737_v6 = vmul.f32 1.442695, %v716_v13  ;;  %v1763_v58 = vmul.f32 1.442695, %v1743_v16 }
 0x28e   : > { %v7526_v35 = vpop.xlane.xlu0 %1159  ;;  %v692_v41 = vpop.xlane.xlu1 %691 }
 0x28f   : > { %5997 = vpow2.f32 %v737_v6  ;;  %v717_v7 = vsub.f32 %v7253_v48, %v692_v41  ;;  %v10308_v6 = vld [vmem:[#allocation56_spill] sm:$0xff] }
 0x290   : > { %v5990_v27 = vpop.eup %5989  ;;  %5999 = vpow2.f32 %v1763_v58  ;;  %v10309_v58 = vld [vmem:[#allocation23_spill] sm:$0xff] }
 0x291   : > { %v760_v1 = vpack.c.bf16 %v5990_v27, %v5988_v57  ;;  %v739_v30 = vmul.f32 1.442695, %v717_v7  ;;  %v5992_v63 = vpop.eup %5991  ;;  %v6492_v7 = vld [vmem:[%s10047_s1 + $0x10] ss:$8 sps:$4 sm:$0xff]  }
 0x292   : > { %v1718_v22 = vpop.xlane.xlu0 %1717  ;;  %v7529_v47 = vpop.xlane.xlu1 %1161 }
 0x293   : > { %v1744_v32 = vsub.f32 %v7262_v53, %v1718_v22  ;;  %5549 = vmatmul.mubr.bf16.vlgmr.msra.gmra.mxu1 %v760_v1  ;;  %v10307_v53 = vld [vmem:[#allocation21_spill] sm:$0xff] }
 0x294   : > { %2166 = vperm.xlu0 %5899, %v10305_v28   ;;  %5565 = vmatpush3.bf16.msra.mxu1 %v7359_v43  ;;  %v1277_v43 = vsel %vm321_vm0, %v7184_v52, 1065369472  ;;  %v10310_v52 = vld [vmem:[#allocation34_spill] sm:$0xff] }
 0x295   : > { %v1765_v24 = vmul.f32 1.442695, %v1744_v32  ;;  %5566 = vmatprep.subr.bf16.mxu1 %v1280_v20  ;;  %v1274_v22 = vsel %vm321_vm0, %v10310_v52, 1065369472  ;;  %v6493_v32 = vld [vmem:[%s10047_s1 + $0x4] ss:$8 sps:$4 sm:$0xff]  }
 0x296   : > { %v694_v5 = vpop.xlane.xlu0 %693  ;;  %v1720_v48 = vpop.xlane.xlu1 %1719 }
 0x297   : > { %6001 = vpow2.f32 %v1765_v24  ;;  %v718_v17 = vsub.f32 %v7286_v45, %v694_v5  ;;  %v1745_v16 = vsub.f32 %v10308_v6, %v1720_v48  ;;  %v6494_v5 = vld [vmem:[%s10047_s1] ss:$8 sps:$4 sm:$0xff]   ;;  %v10312_v6 = vld [vmem:[#allocation35_spill] sm:$0xff] }
 0x298   : > { %v5994_v46 = vpop.eup %5993  ;;  %2174 = vperm.xlu0 %5899, %v10307_v53   ;;  %5567 = vmatpush3.bf16.msra.mxu1 %v1280_v20  ;;  %6003 = vpow2.f32 %v739_v30 }
 0x299   : > { %v741_v49 = vmul.f32 1.442695, %v718_v17  ;;  %v1788_v13 = vpack.c.bf16 %v5994_v46, %v5992_v63  ;;  %5568 = vmatprep.subr.bf16.mxu1 %v1277_v43  ;;  %v5996_v27 = vpop.eup %5995  ;;  %v1767_v28 = vmul.f32 1.442695, %v1745_v16  ;;  %v10311_v63 = vld [vmem:[#allocation37_spill] sm:$0xff] }
 0x29a   : > { %v7541_v41 = vpop.xlane.xlu0 %1163  ;;  %v696_v57 = vpop.xlane.xlu1 %695  ;;  %v1271_v17 = vsel %vm321_vm0, %v10311_v63, 1065369472  ;;  %v1268_v16 = vsel %vm321_vm0, %v10312_v6, 1065369472  ;;  %v10315_v63 = vld [vmem:[#allocation27_spill] sm:$0xff]  ;;  %v10316_v6 = vld [vmem:[#allocation32_spill] sm:$0xff] }
 0x29b   : > { %6005 = vpow2.f32 %v741_v49  ;;  %5613 = vmatmul.mubr.bf16.vlgmr.msra.gmra.mxu0 %v1788_v13  ;;  %v719_v24 = vsub.f32 %v7300_v42, %v696_v57 }
 0x29c   : > { %v5998_v45 = vpop.eup %5997  ;;  %2182 = vperm.xlu0 %5899, %v10309_v58   ;;  %2769 = vmatpush1.bf16.msra.mxu0 %v6492_v7  ;;  %6007 = vpow2.f32 %v1767_v28 }
 0x29d   : > { %5569 = vmatpush3.bf16.msra.mxu1 %v1277_v43  ;;  %v761_v1 = vpack.c.bf16 %v5998_v45, %v5996_v27  ;;  %2770 = vmatprep.subr.bf16.mxu0 %v6493_v32  ;;  %v743_v46 = vmul.f32 1.442695, %v719_v24  ;;  %v6000_v49 = vpop.eup %5999 }
 0x29e   : > { %5570 = vmatprep.subr.bf16.mxu1 %v1274_v22  ;;  %v1722_v25 = vpop.xlane.xlu0 %1721  ;;  %v7553_v20 = vpop.xlane.xlu1 %1165 }
 0x29f   : > { %v1746_v30 = vsub.f32 %v7311_v18, %v1722_v25  ;;  %5552 = vmatprep.mubr.bf16.mxu1 %v761_v1 }
 0x2a0   : > { %2771 = vmatpush1.bf16.msra.mxu0 %v6494_v5  ;;  %v10314_v5 = vld [vmem:[#allocation30_spill] sm:$0xff] }
 0x2a1   : > { %v1769_v48 = vmul.f32 1.442695, %v1746_v30  ;;  %5571 = vmatpush3.bf16.msra.mxu1 %v1274_v22 }
 0x2a2   : > { %5572 = vmatprep.subr.bf16.mxu1 %v1271_v17  ;;  %v698_v42 = vpop.xlane.xlu0 %697  ;;  %v1724_v53 = vpop.xlane.xlu1 %1723 }
 0x2a3   : > { %6009 = vpow2.f32 %v1769_v48  ;;  %v720_v18 = vsub.f32 %v7329_v10, %v698_v42  ;;  %v1747_v27 = vsub.f32 %v7326_v56, %v1724_v53  ;;  %v10313_v10 = vld [vmem:[#allocation29_spill] sm:$0xff]  ;;  %v1262_v48 = vsel %vm321_vm0, %v10314_v5, 1065369472 }
 0x2a4   : > { %v6002_v43 = vpop.eup %6001  ;;  %6011 = vpow2.f32 %v743_v46  ;;  %v1265_v22 = vsel %vm321_vm0, %v10313_v10, 1065369472 }
 0x2a5   : > { %v745_v13 = vmul.f32 1.442695, %v720_v18  ;;  %5573 = vmatpush3.bf16.msra.mxu1 %v1271_v17  ;;  %v1789_v57 = vpack.c.bf16 %v6002_v43, %v6000_v49  ;;  %v6004_v7 = vpop.eup %6003  ;;  %v1771_v32 = vmul.f32 1.442695, %v1747_v27  ;;  %v2193_v17 = vadd.f32 %v7500_v3, %v10315_v63 }
 0x2a6   : > { %5574 = vmatprep.subr.bf16.mxu1 %v1268_v16  ;;  %v7565_v45 = vpop.xlane.xlu0 %1167  ;;  %v700_v58 = vpop.xlane.xlu1 %699 }
 0x2a7   : > { %6013 = vpow2.f32 %v745_v13  ;;  %5616 = vmatprep.mubr.bf16.mxu0 %v1789_v57  ;;  %v721_v28 = vsub.f32 %v7345_v39, %v700_v58  ;;  %v2209_v13 = vmul.f32 0.01, %v2193_v17 }
 0x2a8   : > { %v6006_v52 = vpop.eup %6005  ;;  %6015 = vpow2.f32 %v1771_v32 }
 0x2a9   : > { %5575 = vmatpush3.bf16.msra.mxu1 %v1268_v16  ;;  %v762_v1 = vpack.c.bf16 %v6006_v52, %v6004_v7  ;;  %v747_v46 = vmul.f32 1.442695, %v721_v28  ;;  %v6008_v53 = vpop.eup %6007  ;;  %v2195_v16 = vadd.f32 %v7500_v3, %v10316_v6 }
 0x2aa   : > { %5576 = vmatprep.subr.bf16.mxu1 %v1265_v22  ;;  %v1726_v24 = vpop.xlane.xlu0 %1725  ;;  %v7570_v25 = vpop.xlane.xlu1 %1169 }
 0x2ab   : > { %v1748_v56 = vsub.f32 %v7354_v4, %v1726_v24  ;;  %5553 = vmatmul.mubr.bf16.gmra.mxu1 %v762_v1 }
 0x2ad   : > { %v1773_v30 = vmul.f32 1.442695, %v1748_v56  ;;  %5577 = vmatpush3.bf16.msra.mxu1 %v1265_v22  ;;  %v2211_v22 = vmul.f32 0.01, %v2195_v16 }
 0x2ae   : > { %5578 = vmatprep.subr.bf16.mxu1 %v1262_v48  ;;  %v702_v42 = vpop.xlane.xlu0 %701  ;;  %v1728_v39 = vpop.xlane.xlu1 %1727 }
 0x2af   : > { %6017 = vpow2.f32 %v1773_v30  ;;  %v722_v49 = vsub.f32 %v7377_v0, %v702_v42  ;;  %v1749_v57 = vsub.f32 %v7374_v14, %v1728_v39  ;;  %v2225_v0 = vmax.f32 %v2193_v17, %v2209_v13  ;;  %v10317_v30 = vld [vmem:[#allocation39_spill] sm:$0xff] }
 0x2b0   : > { %v6010_v18 = vpop.eup %6009  ;;  %6019 = vpow2.f32 %v747_v46 }
 0x2b1   : > { %v749_v4 = vmul.f32 1.442695, %v722_v49  ;;  %5579 = vmatpush3.bf16.msra.mxu1 %v1262_v48  ;;  %v1790_v43 = vpack.c.bf16 %v6010_v18, %v6008_v53  ;;  %v6012_v58 = vpop.eup %6011  ;;  %v1775_v1 = vmul.f32 1.442695, %v1749_v57  ;;  %v7588_v5 = vadd.f32 %v10317_v30, %v2225_v0  ;;  %v10318_v53 = vld [vmem:[#allocation43_spill] sm:$0xff] }
 0x2b2   : > { %v7581_v27 = vpop.xlane.xlu0 %1171  ;;  %v2227_v48 = vmax.f32 %v2195_v16, %v2211_v22 }
 0x2b3   : > { %6021 = vpow2.f32 %v749_v4  ;;  %v704_v7 = vpop.xlane.xlu1 %703  ;;  %5617 = vmatmul.mubr.bf16.gmra.mxu0 %v1790_v43 }
 0x2b4   : > { %v6014_v52 = vpop.eup %6013  ;;  %v723_v32 = vsub.f32 %v7395_v8, %v704_v7  ;;  %6023 = vpow2.f32 %v1775_v1  ;;  %v7593_v49 = vadd.f32 %v10318_v53, %v2227_v48 }
 0x2b5   : > { %v763_v10 = vpack.c.bf16 %v6014_v52, %v6012_v58  ;;  %v6016_v42 = vpop.eup %6015 }
 0x2b6   : > { %v1730_v28 = vpop.xlane.xlu0 %1729  ;;  %v751_v63 = vmul.f32 1.442695, %v723_v32 }
 0x2b7   : > { %v1750_v24 = vsub.f32 %v7406_v40, %v1730_v28  ;;  %v7585_v56 = vpop.xlane.xlu1 %1173  ;;  %5556 = vmatprep.mubr.bf16.mxu1 %v763_v10 }
 0x2b9   : > { %v1777_v14 = vmul.f32 1.442695, %v1750_v24 }
 0x2ba   : > { %v706_v46 = vpop.xlane.xlu0 %705 }
 0x2bb   : > { %6025 = vpow2.f32 %v1777_v14  ;;  %v724_v17 = vsub.f32 %v7418_v50, %v706_v46  ;;  %v1732_v39 = vpop.xlane.xlu1 %1731  ;;  %2257 = vmax.xlane.f32.xlu0 %v7588_v5 }
 0x2bc   : > { %v6018_v8 = vpop.eup %6017  ;;  %6027 = vpow2.f32 %v751_v63  ;;  %v1751_v4 = vsub.f32 %v7422_v34, %v1732_v39 }
 0x2bd   : > { %v753_v40 = vmul.f32 1.442695, %v724_v17  ;;  %v1791_v18 = vpack.c.bf16 %v6018_v8, %v6016_v42  ;;  %v6020_v13 = vpop.eup %6019 }
 0x2be   : > { %v7596_v43 = vpop.xlane.xlu0 %1175  ;;  %v1779_v57 = vmul.f32 1.442695, %v1751_v4  ;;  %v10319_v4 = vld [vmem:[#allocation47_spill] sm:$0xff] }
 0x2bf   : > { %6029 = vpow2.f32 %v753_v40  ;;  %v7598_v6 = vpop.xlane.xlu1 %707  ;;  %2261 = vmax.xlane.f32.xlu0 %v7593_v49  ;;  %5620 = vmatprep.mubr.bf16.mxu0 %v1791_v18 }
 0x2c0   : > { %v6022_v50 = vpop.eup %6021  ;;  %6031 = vpow2.f32 %v1779_v57  ;;  %v10320_v57 = vld [vmem:[#allocation45_spill] sm:$0xff] }
 0x2c1   : > { %v764_v16 = vpack.c.bf16 %v6022_v50, %v6020_v13  ;;  %v6024_v34 = vpop.eup %6023 }
 0x2c2   : > { %v1734_v58 = vpop.xlane.xlu0 %1733 }
 0x2c3   : > { %v1752_v7 = vsub.f32 %v7443_v54, %v1734_v58  ;;  %v7602_v52 = vpop.xlane.xlu1 %1177  ;;  %5557 = vmatmul.mubr.bf16.gmra.mxu1 %v764_v16 }
 0x2c5   : > { %v1781_v10 = vmul.f32 1.442695, %v1752_v7 }
 0x2c7   : > { %6033 = vpow2.f32 %v1781_v10  ;;  %v7604_v0 = vpop.xlane.xlu1 %1735 }
 0x2c8   : > { %v6026_v22 = vpop.eup %6025 }
 0x2c9   : > { %v1792_v1 = vpack.c.bf16 %v6026_v22, %v6024_v34  ;;  %v6028_v28 = vpop.eup %6027 }
 0x2ca   : > { %v2143_v32 = vpop.permute.xlu0 %2142 }
 0x2cb   : > { %v2197_v24 = vadd.f32 %v7500_v3, %v2143_v32  ;;  %v2139_v14 = vpop.permute.xlu1 %2138  ;;  %5621 = vmatmul.mubr.bf16.gmra.mxu0 %v1792_v1 }
 0x2cc   : > { %v6030_v30 = vpop.eup %6029  ;;  %v2196_v54 = vadd.f32 %v7500_v3, %v2139_v14  ;;  %v10321_v14 = vld [vmem:[#allocation51_spill] sm:$0xff] }
 0x2cd   : > { %v2213_v48 = vmul.f32 0.01, %v2197_v24  ;;  %v765_v63 = vpack.c.bf16 %v6030_v30, %v6028_v28  ;;  %v6032_v7 = vpop.eup %6031 }
 0x2ce   : > { %v2212_v46 = vmul.f32 0.01, %v2196_v54  ;;  %v2151_v42 = vpop.permute.xlu0 %2150 }
 0x2cf   : > { %v2229_v17 = vmax.f32 %v2197_v24, %v2213_v48  ;;  %v2199_v39 = vadd.f32 %v7500_v3, %v2151_v42  ;;  %v2147_v8 = vpop.permute.xlu1 %2146  ;;  %5560 = vmatprep.mubr.bf16.mxu1 %v765_v63  ;;  %v10322_v63 = vld [vmem:[#allocation49_spill] sm:$0xff] }
 0x2d0   : > { %v2228_v40 = vmax.f32 %v2196_v54, %v2212_v46  ;;  %v2198_v53 = vadd.f32 %v7500_v3, %v2147_v8 }
 0x2d1   : > { %v2215_v18 = vmul.f32 0.01, %v2199_v39  ;;  %v7611_v13 = vadd.f32 %v10319_v4, %v2229_v17  ;;  %v10324_v4 = vld [vmem:[#allocation53_spill] sm:$0xff] }
 0x2d2   : > { %v2214_v50 = vmul.f32 0.01, %v2198_v53  ;;  %v2159_v16 = vpop.permute.xlu0 %2158  ;;  %v7614_v58 = vadd.f32 %v10320_v57, %v2228_v40  ;;  %v10323_v40 = vld [vmem:[#allocation55_spill] sm:$0xff] }
 0x2d3   : > { %v2231_v10 = vmax.f32 %v2199_v39, %v2215_v18  ;;  %v2201_v34 = vadd.f32 %v7500_v3, %v2159_v16  ;;  %v2155_v22 = vpop.permute.xlu1 %2154  ;;  %2265 = vmax.xlane.f32.xlu1 %v7611_v13 }
 0x2d4   : > { %v6034_v1 = vpop.eup %6033  ;;  %v2230_v32 = vmax.f32 %v2198_v53, %v2214_v50  ;;  %v2200_v28 = vadd.f32 %v7500_v3, %v2155_v22  ;;  %2263 = vmax.xlane.f32.xlu0 %v7614_v58 }
 0x2d5   : > { %v2217_v24 = vmul.f32 0.01, %v2201_v34  ;;  %v7621_v30 = vadd.f32 %v10321_v14, %v2231_v10  ;;  %v1793_v54 = vpack.c.bf16 %v6034_v1, %v6032_v7 }
 0x2d6   : > { %v2216_v48 = vmul.f32 0.01, %v2200_v28  ;;  %v7624_v46 = vadd.f32 %v10322_v63, %v2230_v32 }
 0x2d7   : > { %v2233_v42 = vmax.f32 %v2201_v34, %v2217_v24  ;;  %v2163_v17 = vpop.permute.xlu1 %2162  ;;  %2269 = vmax.xlane.f32.xlu1 %v7621_v30  ;;  %5624 = vmatprep.mubr.bf16.mxu0 %v1793_v54  ;;  %v10325_v34 = vld [vmem:[#allocation58_spill] sm:$0xff] }
 0x2d8   : > { %v2232_v39 = vmax.f32 %v2200_v28, %v2216_v48  ;;  %v2202_v8 = vadd.f32 %v7500_v3, %v2163_v17  ;;  %2267 = vmax.xlane.f32.xlu0 %v7624_v46 }
 0x2d9   : > { %v7630_v53 = vadd.f32 %v10323_v40, %v2233_v42  ;;  %v10326_v40 = vld [vmem:[#allocation41_spill] sm:$0xff] }
 0x2da   : > { %v2218_v18 = vmul.f32 0.01, %v2202_v8  ;;  %v7633_v50 = vadd.f32 %v10324_v4, %v2232_v39  ;;  %v10115_v39 = vmov 32   ;;  %v10327_v4 = vld [vmem:[#allocation42_spill] sm:$0xff] }
 0x2db   : > { %v2171_v16 = vpop.permute.xlu1 %2170  ;;  %2273 = vmax.xlane.f32.xlu1 %v7630_v53  ;;  %5901 = vset.pattern.permute.xlu0 %v10115_v39 }
 0x2dc   : > { %v2234_v57 = vmax.f32 %v2202_v8, %v2218_v18  ;;  %v2204_v7 = vadd.f32 %v7500_v3, %v2171_v16  ;;  %2271 = vmax.xlane.f32.xlu0 %v7633_v50  ;;  %5900 = vset.pattern.permute.xlu1 %v10115_v39  ;;  %v1181_v18 = vsub.f32 %v10326_v40, %v7483_v51  ;;  %v10330_v51 = vld [vmem:[#allocation52_spill] sm:$0xff] }
 0x2dd   : > { %v725_v16 = vsub.f32 %v7436_v21, %v7598_v6  ;;  %v10331_v21 = vld [vmem:[#allocation10_spill] sm:$0xff]  ;;  %v1753_v6 = vsub.f32 %v7453_v11, %v7604_v0  ;;  %v10334_v11 = vld [vmem:[#allocation57_spill] sm:$0xff] }
 0x2de   : > { %v2220_v10 = vmul.f32 0.01, %v2204_v7  ;;  %v7639_v22 = vadd.f32 %v10325_v34, %v2234_v57  ;;  %v1197_v57 = vmul.f32 1.442695, %v1181_v18  ;;  %v1188_v0 = vsub.f32 %v10334_v11, %v7541_v41 }
 0x2df   : > { %v2179_v1 = vpop.permute.xlu1 %2178 }
 0x2e0   : > { %v2236_v32 = vmax.f32 %v2204_v7, %v2220_v10  ;;  %v2206_v28 = vadd.f32 %v7500_v3, %v2179_v1  ;;  %2275 = vmax.xlane.f32.xlu0 %v7639_v22  ;;  %v755_v10 = vmul.f32 1.442695, %v725_v16  ;;  %v10328_v1 = vld [vmem:[#allocation46_spill] sm:$0xff]  ;;  %6035 = vpow2.f32 %v1197_v57  ;;  %v10335_v16 = vld [vmem:[#allocation15_spill] sm:$0xff] }
 0x2e2   : > { %v2222_v24 = vmul.f32 0.01, %v2206_v28  ;;  %v7644_v14 = vadd.f32 %v7356_v62, %v2236_v32  ;;  %v1183_v32 = vsub.f32 %v10328_v1, %v7502_v31 }
 0x2e3   : > { %v2187_v54 = vpop.permute.xlu1 %2186 }
 0x2e4   : > { %v2238_v48 = vmax.f32 %v2206_v28, %v2222_v24  ;;  %v2208_v63 = vadd.f32 %v7500_v3, %v2187_v54  ;;  %2279 = vmax.xlane.f32.xlu0 %v7644_v14  ;;  %v10329_v28 = vld [vmem:[#allocation48_spill] sm:$0xff] }
 0x2e5   : > { %v1184_v24 = vsub.f32 %v10329_v28, %v7514_v37  ;;  %v10332_v37 = vld [vmem:[#allocation50_spill] sm:$0xff] }
 0x2e6   : > { %v2224_v42 = vmul.f32 0.01, %v2208_v63  ;;  %v7649_v17 = vadd.f32 %v7401_v26, %v2238_v48  ;;  %v1182_v26 = vsub.f32 %v10327_v4, %v7485_v19  ;;  %v1186_v19 = vsub.f32 %v10330_v51, %v7526_v35  ;;  %v10333_v35 = vld [vmem:[#allocation14_spill] sm:$0xff] }
 0x2e7   : > { %v1203_v48 = vmul.f32 1.442695, %v1184_v24 }
 0x2e8   : > { %v2240_v8 = vmax.f32 %v2208_v63, %v2224_v42  ;;  %2283 = vmax.xlane.f32.xlu0 %v7649_v17  ;;  %v1199_v7 = vmul.f32 1.442695, %v1182_v26  ;;  %v1185_v63 = vsub.f32 %v10332_v37, %v7517_v12  ;;  %v1207_v42 = vmul.f32 1.442695, %v1186_v19  ;;  %v10336_v12 = vld [vmem:[#allocation61_spill] sm:$0xff]  ;;  %v10339_v37 = vld [vmem:[#allocation62_spill] sm:$0xff] }
 0x2e9   : > { %v1190_v57 = vsub.f32 %v10336_v12, %v7565_v45 }
 0x2ea   : > { %v7655_v62 = vadd.f32 %v7481_v23, %v2240_v8  ;;  %6037 = vpow2.f32 %v1199_v7  ;;  %v1783_v8 = vmul.f32 1.442695, %v1753_v6  ;;  %v1205_v4 = vmul.f32 1.442695, %v1185_v63  ;;  %v10337_v7 = vld [vmem:[#allocation54_spill] sm:$0xff] }
 0x2eb   : > { %6039 = vpow2.f32 %v755_v10  ;;  %v1187_v10 = vsub.f32 %v10337_v7, %v7529_v47  ;;  %v1215_v41 = vmul.f32 1.442695, %v1190_v57  ;;  %v1191_v63 = vsub.f32 %v10339_v37, %v7570_v25 }
 0x2ec   : > { %2287 = vmax.xlane.f32.xlu0 %v7655_v62 }
 0x2ed   : > { %v6036_v1 = vpop.eup %6035  ;;  %v1209_v51 = vmul.f32 1.442695, %v1187_v10 }
 0x2ff   : > { %v710_v34 = vpop.xlane.xlu0 %709 }
 0x300   : > { %v726_v23 = vsub.f32 %v7488_v60, %v710_v34  ;;  %v1201_v60 = vmul.f32 1.442695, %v1183_v32  ;;  %v1211_v32 = vmul.f32 1.442695, %v1188_v0 }
 0x302   : > { %v757_v54 = vmul.f32 1.442695, %v726_v23  ;;  %2347 = vrot.lane.b32.xlu0 %v10331_v21, %s6565_s12  ;;  %v6038_v23 = vpop.eup %6037  ;;  %v1192_v21 = vsub.f32 %v7390_v59, %v7581_v27  ;;  %v1193_v27 = vsub.f32 %v7409_v29, %v7585_v56 }
 0x303   : > { %v7675_v31 = vpop.xlane.xlu0 %1179  ;;  %v6040_v24 = vpop.eup %6039 }
 0x304   : > { %6041 = vpow2.f32 %v757_v54  ;;  %v1219_v59 = vmul.f32 1.442695, %v1192_v21  ;;  %v1221_v7 = vmul.f32 1.442695, %v1193_v27  ;;  %v1196_v10 = vsub.f32 %v7495_v61, %v7675_v31  ;;  %v5974_v27 = vld [vmem:[%s6664_s13 + $0x58] sm:$0xff]  }
 0x305   : > { %6043 = vpow2.f32 %v1201_v60 }
 0x306   : > { %2353 = vrot.lane.b32.xlu0 %v10333_v35, %s6565_s12  ;;  %6045 = vpow2.f32 %v1203_v48  ;;  %v1229_v48 = vpack.c.bf16 %v6038_v23, %v6036_v1  ;;  %v1227_v61 = vmul.f32 1.442695, %v1196_v10 }
 0x307   : > { %v1738_v40 = vpop.xlane.xlu0 %1737  ;;  %6047 = vpow2.f32 %v1207_v42 }
 0x308   : > { %v1754_v18 = vsub.f32 %v7507_v38, %v1738_v40  ;;  %6049 = vpow2.f32 %v1783_v8  ;;  %v10338_v38 = vld [vmem:[#allocation59_spill] sm:$0xff] }
 0x309   : > { %v1189_v34 = vsub.f32 %v10338_v38, %v7553_v20  ;;  %v1194_v20 = vsub.f32 %v7433_v44, %v7596_v43  ;;  %v10340_v44 = vld [vmem:[#allocation60_spill] sm:$0xff] }
 0x30a   : > { %v1785_v26 = vmul.f32 1.442695, %v1754_v18  ;;  %2357 = vrot.lane.b32.xlu0 %v10335_v16, %s6565_s12 }
 0x30b   : > { %v1213_v45 = vmul.f32 1.442695, %v1189_v34  ;;  %v1223_v11 = vmul.f32 1.442695, %v1194_v20 }
 0x30c   : > { %6051 = vpow2.f32 %v1785_v26  ;;  %v1217_v26 = vmul.f32 1.442695, %v1191_v63  ;;  %v10342_v63 = vld [vmem:[#allocation11_spill] sm:$0xff] }
 0x30d   : > { %6053 = vpow2.f32 %v1205_v4 }
 0x30e   : > { %6055 = vpow2.f32 %v1211_v32 }
 0x30f   : > { %v2167_v28 = vpop.permute.xlu0 %2166  ;;  %6057 = vpow2.f32 %v1215_v41 }
 0x310   : > { %v2203_v19 = vadd.f32 %v7500_v3, %v2167_v28  ;;  %6059 = vpow2.f32 %v1209_v51 }
 0x311   : > { %v6042_v54 = vpop.eup %6041  ;;  %6061 = vpow2.f32 %v1213_v45 }
 0x312   : > { %v2219_v47 = vmul.f32 0.01, %v2203_v19  ;;  %v766_v6 = vpack.c.bf16 %v6042_v54, %v6040_v24  ;;  %v6044_v8 = vpop.eup %6043  ;;  %6063 = vpow2.f32 %v1219_v59  ;;  %v10344_v59 = vld [vmem:[#allocation20_spill] sm:$0xff] }
 0x313   : > { %v2175_v60 = vpop.permute.xlu0 %2174  ;;  %v6046_v40 = vpop.eup %6045  ;;  %6065 = vpow2.f32 %v1223_v11  ;;  %v5975_v11 = vld [vmem:[%s6664_s13 + $0x60] sm:$0xff]  }
 0x314   : > { %v2235_v42 = vmax.f32 %v2203_v19, %v2219_v47  ;;  %v2205_v35 = vadd.f32 %v7500_v3, %v2175_v60  ;;  %5561 = vmatmul.mubr.bf16.gmra.mxu1 %v766_v6  ;;  %v6048_v4 = vpop.eup %6047  ;;  %v1230_v29 = vpack.c.bf16 %v6046_v40, %v6044_v8  ;;  %6067 = vpow2.f32 %v1217_v26  ;;  %v5972_v47 = vld [vmem:[%s6664_s13 + $0x48] sm:$0xff]   ;;  %v2260_v40 = vpop.xlane.xlu1 %2259 }
 0x315   : > { %5580 = vmatprep.mubr.bf16.mxu1 %v1229_v48  ;;  %v6050_v25 = vpop.eup %6049  ;;  %6069 = vpow2.f32 %v1221_v7  ;;  %v10343_v8 = vld [vmem:[#allocation22_spill] sm:$0xff] }
 0x316   : > { %v2221_v18 = vmul.f32 0.01, %v2205_v35  ;;  %v7703_v43 = vadd.f32 %v10340_v44, %v2235_v42  ;;  %6071 = vpow2.f32 %v1227_v61  ;;  %v5973_v42 = vld [vmem:[%s6664_s13 + $0x50] sm:$0xff]   ;;  %v2290_v44 = vsub.f32 %v7521_v33, %v2260_v40 }
 0x317   : > { %v2183_v0 = vpop.permute.xlu0 %2182  ;;  %v5977_v33 = vld [vmem:[%s6664_s13 + $0x70] sm:$0xff]  }
 0x318   : > { %v2237_v16 = vmax.f32 %v2205_v35, %v2221_v18  ;;  %v2207_v12 = vadd.f32 %v7500_v3, %v2183_v0  ;;  %2277 = vmax.xlane.f32.xlu1 %v7703_v43  ;;  %v1195_v3 = vsub.f32 %v7446_v2, %v7602_v52  ;;  %v5971_v52 = vld [vmem:[%s6664_s13 + $0x40] sm:$0xff]   ;;  %v10345_v18 = vld [vmem:[#allocation18_spill] sm:$0xff]  ;;  %v2307_v0 = vmul.f32 1.442695, %v2290_v44 }
 0x319   : > { %v6052_v57 = vpop.eup %6051 }
 0x31a   : > { %v6054_v56 = vpop.eup %6053  ;;  %v2223_v38 = vmul.f32 0.01, %v2207_v12  ;;  %v7710_v34 = vadd.f32 %v7384_v9, %v2237_v16  ;;  %v1794_v1 = vpack.c.bf16 %v6052_v57, %v6050_v25  ;;  %v10341_v9 = vmov 0  }
 0x31b   : > { %v1231_v32 = vpack.c.bf16 %v6048_v4, %v6054_v56  ;;  %v6056_v41 = vpop.eup %6055  ;;  %v1225_v24 = vmul.f32 1.442695, %v1195_v3  ;;  %v10346_v4 = vld [vmem:[#allocation16_spill] sm:$0xff] }
 0x31c   : > { %v2239_v23 = vmax.f32 %v2207_v12, %v2223_v38  ;;  %2281 = vmax.xlane.f32.xlu1 %v7710_v34  ;;  %5581 = vmatmul.mubr.bf16.vlgmr.msra.gmra.mxu1 %v1230_v29  ;;  %v6058_v28 = vpop.eup %6057  ;;  %v5976_v12 = vld [vmem:[%s6664_s13 + $0x68] sm:$0xff]   ;;  %v5978_v56 = vld [vmem:[%s6664_s13 + $0x78] sm:$0xff]   ;;  %s209_s13 = sand.u32 1, %s6547_s16  }
 0x31d   : > { %5625 = vmatmul.mubr.bf16.gmra.mxu0 %v1794_v1  ;;  %5584 = vmatprep.mubr.bf16.mxu1 %v1231_v32  ;;  %v6060_v2 = vpop.eup %6059  ;;  %6073 = vpow2.f32 %v1225_v24  ;;  %s5176_s14 = sshll.u32 %s209_s13, 8 }
 0x31e   : > { %v7716_v31 = vadd.f32 %v7430_v36, %v2239_v23  ;;  %2788 = vmatprep.mubr.bf16.mxu0 %v10341_v9  ;;  %v6062_v51 = vpop.eup %6061  ;;  %v1232_v19 = vpack.c.bf16 %v6056_v41, %v6060_v2  ;;  %6075 = vpow2.f32 %v2307_v0  ;;  %s7899_s20 = scalar_lea.vmem [#allocation2], %s5176_s14 }
 0x31f   : > { %v1233_v54 = vpack.c.bf16 %v6058_v28, %v6062_v51  ;;  %v6064_v36 = vpop.eup %6063 }
 0x320   : > { %2285 = vmax.xlane.f32.xlu1 %v7716_v31  ;;  %v6066_v45 = vpop.eup %6065 }
 0x321   : > { %v6068_v21 = vpop.eup %6067 }
 0x322   : > { %v6070_v6 = vpop.eup %6069  ;;  %v1234_v20 = vpack.c.bf16 %v6064_v36, %v6068_v21 }
 0x323   : > { %v1235_v60 = vpack.c.bf16 %v6066_v45, %v6070_v6  ;;  %v6072_v48 = vpop.eup %6071 }
 0x324   : > { %5585 = vmatmul.mubr.bf16.gmra.mxu1 %v1232_v19 }
 0x325   : > { %5227 = vmatmul.mubr.msk.bf16.vlgmr.msra.gmra.mxu0 %vm321_vm0, %v5971_v52  ;;  %5588 = vmatprep.mubr.bf16.mxu1 %v1233_v54 }
 0x326   : > { %2798 = vmatprep.mubr.bf16.mxu0 %v10341_v9 }
 0x32a   : > { %v6074_v37 = vpop.eup %6073 }
 0x32b   : > { %v1236_v35 = vpack.c.bf16 %v6072_v48, %v6074_v37  ;;  %v6076_v7 = vpop.eup %6075 }
 0x32c   : > { %5589 = vmatmul.mubr.bf16.gmra.mxu1 %v1234_v20 }
 0x32d   : > { %5592 = vmatprep.mubr.bf16.mxu1 %v1235_v60  ;;  %5228 = vmatmul.mubr.msk.bf16.gmra.mxu0 %vm321_vm0, %v5972_v47 }
 0x32e   : > { %2808 = vmatprep.mubr.bf16.mxu0 %v10341_v9 }
 0x331   : > { %2345 = vrot.lane.b32.xlu1 %v10342_v63, %s6565_s12 }
 0x334   : > { %5593 = vmatmul.mubr.bf16.gmra.mxu1 %v1236_v35 }
 0x335   : > { %2349 = vrot.lane.b32.xlu1 %v10343_v8, %s6565_s12  ;;  %5229 = vmatmul.mubr.msk.bf16.gmra.mxu0 %vm321_vm0, %v5973_v42 }
 0x336   : > { %2818 = vmatprep.mubr.bf16.mxu0 %v10341_v9 }
 0x339   : > { %2351 = vrot.lane.b32.xlu1 %v10344_v59, %s6565_s12 }
 0x33d   : > { %2355 = vrot.lane.b32.xlu1 %v10345_v18, %s6565_s12  ;;  %5230 = vmatmul.mubr.msk.bf16.gmra.mxu0 %vm321_vm0, %v5974_v27 }
 0x33e   : > { %2828 = vmatprep.mubr.bf16.mxu0 %v10341_v9 }
 0x341   : > { %2359 = vrot.lane.b32.xlu1 %v10346_v4, %s6565_s12 }
 0x344   : > { %v2258_v25 = vpop.xlane.xlu0 %2257 }
 0x345   : > { %v2289_v26 = vsub.f32 %v7588_v5, %v2258_v25  ;;  %5231 = vmatmul.mubr.msk.bf16.gmra.mxu0 %vm321_vm0, %v5975_v11 }
 0x346   : > { %2838 = vmatprep.mubr.bf16.mxu0 %v10341_v9 }
 0x347   : > { %v2305_v16 = vmul.f32 1.442695, %v2289_v26 }
 0x348   : > { %v7802_v63 = vpop.xlane.xlu0 %2261 }
 0x349   : > { %6077 = vpow2.f32 %v2305_v16 }
 0x34d   : > { %5232 = vmatmul.mubr.msk.bf16.gmra.mxu0 %vm321_vm0, %v5976_v12 }
 0x34e   : > { %2848 = vmatprep.mubr.bf16.mxu0 %v10341_v9 }
 0x353   : > { %v7751_v57 = vpop.f32.mrf.mxu1 }
 0x354   : > { %6079 = vrcp.f32 %v7751_v57 }
 0x355   : > { %5233 = vmatmul.mubr.msk.bf16.gmra.mxu0 %vm321_vm0, %v5977_v33  ;;  %v7757_v10 = vpop.f32.mrf.mxu1 }
 0x356   : > { %v6078_v5 = vpop.eup %6077  ;;  %2858 = vmatprep.mubr.bf16.mxu0 %v10341_v9 }
 0x357   : > { %v2337_v29 = vpack.c.bf16 %v6076_v7, %v6078_v5  ;;  %v7766_v32 = vpop.f32.mrf.mxu1 }
 0x359   : > { %5644 = vmatprep.mubr.bf16.mxu1 %v2337_v29  ;;  %v7772_v61 = vpop.f32.mrf.mxu1 }
 0x35b   : > { %v7759_v38 = vpop.f32.mrf.mxu0 }
 0x35c   : > { %10347 = vst [vmem:[#allocation19_spill] sm:$0xff] %v7759_v38  ;;  %6081 = vrcp.f32 %v7759_v38  ;;  %v2266_v33 = vpop.xlane.xlu1 %2265 }
 0x35d   : > { %v7762_v1 = vpop.f32.mrf.mxu0  ;;  %5234 = vmatmul.mubr.msk.bf16.gmra.mxu0 %vm321_vm0, %v5978_v56  ;;  %v7809_v27 = vpop.xlane.xlu0 %2263 }
 0x35e   : > { %10348 = vst [vmem:[#allocation12_spill] sm:$0xff] %v7762_v1  ;;  %6083 = vrcp.f32 %v7762_v1 }
 0x35f   : > { %v7768_v3 = vpop.f32.mrf.mxu0  ;;  %6085 = vrcp.f32 %v7757_v10 }
 0x360   : > { %6087 = vrcp.f32 %v7768_v3 }
 0x361   : > { %v6080_v23 = vpop.eup %6079  ;;  %6089 = vrcp.f32 %v7766_v32  ;;  %v7775_v9 = vpop.f32.mrf.mxu0 }
 0x362   : > { %917 = vperm.xlu1 %5900, %v6080_v23   ;;  %6091 = vrcp.f32 %v7772_v61  ;;  %v7818_v0 = vpop.xlane.xlu0 %2267  ;;  %v7834_v23 = vpop.xlane.xlu1 %2269 }
 0x363   : > { %6093 = vrcp.f32 %v7775_v9 }
 0x366   : > { %v7828_v7 = vpop.xlane.xlu0 %2271 }
 0x369   : > { %v6082_v41 = vpop.eup %6081 }
 0x36a   : > { %1960 = vperm.xlu1 %5900, %v6082_v41  }
 0x36b   : > { %v6084_v28 = vpop.eup %6083  ;;  %v7779_v24 = vpop.f32.mrf.mxu1 }
 0x36c   : > { %6095 = vrcp.f32 %v7779_v24  ;;  %1950 = vperm.xlu0 %5901, %v6084_v28   ;;  %v6086_v2 = vpop.eup %6085  ;;  %v2276_v28 = vpop.xlane.xlu0 %2275 }
 0x36d   : > { %v6088_v52 = vpop.eup %6087  ;;  %v7784_v36 = vpop.f32.mrf.mxu1 }
 0x36e   : > { %907 = vperm.xlu1 %5900, %v6086_v2   ;;  %v6090_v51 = vpop.eup %6089 }
 0x36f   : > { %v6092_v19 = vpop.eup %6091  ;;  %v7797_v60 = vpop.f32.mrf.mxu1 }
 0x370   : > { %1965 = vperm.xlu0 %5901, %v6088_v52   ;;  %v6094_v45 = vpop.eup %6093 }
 0x371   : > { %v7800_v37 = vpop.f32.mrf.mxu1 }
 0x372   : > { %922 = vperm.xlu1 %5900, %v6090_v51   ;;  %v2274_v51 = vpop.xlane.xlu1 %2273 }
 0x373   : > { %v7782_v54 = vpop.f32.mrf.mxu0 }
 0x374   : > { %10349 = vst [vmem:[#allocation24_spill] sm:$0xff] %v7782_v54  ;;  %6097 = vrcp.f32 %v7782_v54  ;;  %912 = vperm.xlu0 %5901, %v6092_v19   ;;  %v7837_v19 = vpop.xlane.xlu0 %2279 }
 0x375   : > { %v7787_v21 = vpop.f32.mrf.mxu0  ;;  %6099 = vrcp.f32 %v7784_v36 }
 0x376   : > { %10350 = vst [vmem:[#allocation13_spill] sm:$0xff] %v7787_v21  ;;  %1955 = vperm.xlu1 %5900, %v6094_v45  }
 0x377   : > { %v7790_v47 = vpop.f32.mrf.mxu0 }
 0x378   : > { %6101 = vrcp.f32 %v7790_v47 }
 0x379   : > { %v6096_v6 = vpop.eup %6095  ;;  %v7793_v20 = vpop.f32.mrf.mxu0  ;;  %6103 = vrcp.f32 %v7787_v21  ;;  %v2291_v21 = vsub.f32 %v7593_v49, %v7802_v63  ;;  %v2298_v49 = vsub.f32 %v7639_v22, %v2276_v28 }
 0x37a   : > { %937 = vperm.xlu1 %5900, %v6096_v6   ;;  %6105 = vrcp.f32 %v7793_v20 }
 0x37b   : > { %6107 = vrcp.f32 %v7797_v60  ;;  %v2309_v54 = vmul.f32 1.442695, %v2291_v21 }
 0x37c   : > { %6109 = vrcp.f32 %v7800_v37 }
 0x381   : > { %v6098_v48 = vpop.eup %6097 }
 0x382   : > { %1980 = vperm.xlu1 %5900, %v6098_v48   ;;  %v6100_v35 = vpop.eup %6099 }
 0x383   : > { %v7804_v42 = vpop.f32.mrf.mxu1 }
 0x384   : > { %6111 = vrcp.f32 %v7804_v42 }
 0x385   : > { %v6102_v8 = vpop.eup %6101  ;;  %v7807_v59 = vpop.f32.mrf.mxu1 }
 0x386   : > { %1985 = vperm.xlu0 %5901, %v6102_v8   ;;  %927 = vperm.xlu1 %5900, %v6100_v35   ;;  %v6104_v18 = vpop.eup %6103  ;;  %v7841_v8 = vpop.xlane.xlu0 %2283 }
 0x387   : > { %v7812_v40 = vpop.f32.mrf.mxu1  ;;  %v6106_v44 = vpop.eup %6105 }
 0x388   : > { %6113 = vrcp.f32 %v7812_v40  ;;  %v6108_v11 = vpop.eup %6107 }
 0x389   : > { %v7825_v16 = vpop.f32.mrf.mxu1  ;;  %v6110_v12 = vpop.eup %6109 }
 0x38a   : > { %1975 = vperm.xlu0 %5901, %v6106_v44   ;;  %1970 = vperm.xlu1 %5900, %v6104_v18  }
 0x38b   : > { %v7815_v4 = vpop.f32.mrf.mxu0 }
 0x38c   : > { %10351 = vst [vmem:[#allocation25_spill] sm:$0xff] %v7815_v4  ;;  %6115 = vrcp.f32 %v7815_v4  ;;  %v2294_v4 = vsub.f32 %v7624_v46, %v7818_v0  ;;  %v2297_v46 = vsub.f32 %v7630_v53, %v2274_v51  ;;  %v2300_v0 = vsub.f32 %v7644_v14, %v7837_v19 }
 0x38d   : > { %v7820_v25 = vpop.f32.mrf.mxu0  ;;  %6117 = vrcp.f32 %v7807_v59 }
 0x38e   : > { %10352 = vst [vmem:[#allocation28_spill] sm:$0xff] %v7820_v25  ;;  %942 = vperm.xlu1 %5900, %v6108_v11   ;;  %v10353_v11 = vmov 4   ;;  %v2327_v28 = vmul.f32 1.442695, %v2300_v0 }
 0x38f   : > { %v7823_v26 = vpop.f32.mrf.mxu0 }
 0x390   : > { %6119 = vrcp.f32 %v7823_v26 }
 0x391   : > { %6121 = vrcp.f32 %v7825_v16  ;;  %v6112_v5 = vpop.eup %6111  ;;  %v7832_v56 = vpop.f32.mrf.mxu0 }
 0x392   : > { %932 = vperm.xlu1 %5900, %v6110_v12   ;;  %6123 = vrcp.f32 %v7820_v25  ;;  %v7848_v12 = vpop.xlane.xlu0 %2287  ;;  %v2292_v25 = vsub.f32 %v7614_v58, %v7809_v27  ;;  %v2296_v58 = vsub.f32 %v7633_v50, %v7828_v7  ;;  %v2323_v50 = vmul.f32 1.442695, %v2298_v49 }
 0x393   : > { %6125 = vrcp.f32 %v7832_v56 }
 0x395   : > { %v6114_v29 = vpop.eup %6113 }
 0x396   : > { %957 = vperm.xlu1 %5900, %v6112_v5   ;;  %962 = vperm.xlu0 %5901, %v6114_v29   ;;  %v2348_v29 = vpop.permute.xlu0 %2347 }
 0x399   : > { %v6116_v41 = vpop.eup %6115 }
 0x39a   : > { %2000 = vperm.xlu1 %5900, %v6116_v41   ;;  %v6118_v2 = vpop.eup %6117 }
 0x39d   : > { %v6120_v52 = vpop.eup %6119 }
 0x39e   : > { %947 = vperm.xlu1 %5900, %v6118_v2   ;;  %2005 = vperm.xlu0 %5901, %v6120_v52   ;;  %v6122_v45 = vpop.eup %6121  ;;  %v2354_v52 = vpop.permute.xlu0 %2353 }
 0x39f   : > { %v6124_v6 = vpop.eup %6123 }
 0x3a0   : > { %v6126_v35 = vpop.eup %6125 }
 0x3a1   : > { %v7839_v48 = vpop.xlane.xlu1 %2277 }
 0x3a2   : > { %1990 = vperm.xlu1 %5900, %v6124_v6   ;;  %952 = vperm.xlu0 %5901, %v6122_v45   ;;  %v2358_v6 = vpop.permute.xlu0 %2357  ;;  %v2299_v22 = vsub.f32 %v7703_v43, %v7839_v48  ;;  %v2302_v43 = vsub.f32 %v7649_v17, %v7841_v8 }
 0x3a4   : > { %v2331_v48 = vmul.f32 1.442695, %v2302_v43 }
 0x3a5   : > { %v7843_v18 = vpop.xlane.xlu1 %2281 }
 0x3a6   : > { %1995 = vperm.xlu0 %5901, %v6126_v35   ;;  %v2380_v35 = vsel %vm321_vm0, %v2358_v6, 1065369472  ;;  %v2311_v6 = vmul.f32 1.442695, %v2292_v25  ;;  %v2301_v53 = vsub.f32 %v7710_v34, %v7843_v18  ;;  %v2325_v25 = vmul.f32 1.442695, %v2299_v22 }
 0x3a7   : > { %v10360_v22 = vld [vmem:[#allocation7_spill] sm:$0xff] }
 0x3a8   : > { %6127 = vpow2.f32 %v2311_v6  ;;  %v2329_v7 = vmul.f32 1.442695, %v2301_v53 }
 0x3a9   : > { %v7845_v44 = vpop.xlane.xlu1 %2285 }
 0x3aa   : > { %5902 = vset.pattern.permute.xlu0 %v10353_v11  ;;  %v2303_v17 = vsub.f32 %v7716_v31, %v7845_v44 }
 0x3ac   : > { %v2333_v44 = vmul.f32 1.442695, %v2303_v17 }
 0x3ad   : > { %v2346_v5 = vpop.permute.xlu1 %2345 }
 0x3b1   : > { %v2350_v41 = vpop.permute.xlu1 %2349 }
 0x3b2   : > { %v2368_v21 = vsel %vm321_vm0, %v2350_v41, 1065369472  ;;  %v2304_v41 = vsub.f32 %v7655_v62, %v7848_v12 }
 0x3b5   : > { %v2352_v2 = vpop.permute.xlu1 %2351  ;;  %v6128_v34 = vpop.eup %6127 }
 0x3b6   : > { %v2371_v27 = vsel %vm321_vm0, %v2352_v2, 1065369472 }
 0x3b9   : > { %v2356_v55 = vpop.permute.xlu1 %2355 }
 0x3ba   : > { %v2377_v15 = vsel %vm321_vm0, %v2356_v55, 1065369472 }
 0x3bd   : > { %v2360_v45 = vpop.permute.xlu1 %2359 }
 0x3be   : > { %v2383_v39 = vsel %vm321_vm0, %v2360_v45, 1065369472  ;;  %v2293_v45 = vsub.f32 %v7611_v13, %v2266_v33  ;;  %v2319_v13 = vmul.f32 1.442695, %v2296_v58  ;;  %v2362_v33 = vsel %vm321_vm0, %v2346_v5, 1065369472 }
 0x3bf   : > { %5628 = vmatprep.subr.bf16.mxu1 %v2383_v39 }
 0x3c0   : > { %5629 = vmatpush3.bf16.msra.mxu1 %v2383_v39  ;;  %v2374_v39 = vsel %vm321_vm0, %v2354_v52, 1065369472  ;;  %v2313_v55 = vmul.f32 1.442695, %v2293_v45 }
 0x3c1   : > { %5630 = vmatprep.subr.bf16.mxu1 %v2380_v35 }
 0x3c4   : > { %5631 = vmatpush3.bf16.msra.mxu1 %v2380_v35  ;;  %v2315_v35 = vmul.f32 1.442695, %v2294_v4  ;;  %v2321_v4 = vmul.f32 1.442695, %v2297_v46 }
 0x3c5   : > { %5632 = vmatprep.subr.bf16.mxu1 %v2377_v15 }
 0x3c6   : > { %6129 = vpow2.f32 %v2315_v35 }
 0x3c7   : > { %6131 = vpow2.f32 %v2309_v54 }
 0x3c8   : > { %5633 = vmatpush3.bf16.msra.mxu1 %v2377_v15  ;;  %v2295_v15 = vsub.f32 %v7621_v30, %v7834_v23  ;;  %6133 = vpow2.f32 %v2313_v55  ;;  %v2365_v30 = vsel %vm321_vm0, %v2348_v29, 1065369472 }
 0x3c9   : > { %5634 = vmatprep.subr.bf16.mxu1 %v2374_v39  ;;  %6135 = vpow2.f32 %v2319_v13 }
 0x3ca   : > { %v2317_v63 = vmul.f32 1.442695, %v2295_v15 }
 0x3cc   : > { %5635 = vmatpush3.bf16.msra.mxu1 %v2374_v39 }
 0x3cd   : > { %5636 = vmatprep.subr.bf16.mxu1 %v2371_v27 }
 0x3d0   : > { %5637 = vmatpush3.bf16.msra.mxu1 %v2371_v27 }
 0x3d1   : > { %5638 = vmatprep.subr.bf16.mxu1 %v2368_v21 }
 0x3d3   : > { %v6130_v23 = vpop.eup %6129 }
 0x3d4   : > { %v7871_v54 = vpop.f32.mrf.mxu1  ;;  %5639 = vmatpush3.bf16.msra.mxu1 %v2368_v21  ;;  %v6132_v51 = vpop.eup %6131 }
 0x3d5   : > { %6137 = vrcp.f32 %v7871_v54  ;;  %5640 = vmatprep.subr.bf16.mxu1 %v2365_v30  ;;  %v6134_v19 = vpop.eup %6133  ;;  %v2338_v18 = vpack.c.bf16 %v6128_v34, %v6132_v51 }
 0x3d6   : > { %6139 = vpow2.f32 %v2323_v50  ;;  %v7885_v14 = vpop.f32.mrf.mxu1  ;;  %v2339_v29 = vpack.c.bf16 %v6130_v23, %v6134_v19  ;;  %v6136_v31 = vpop.eup %6135 }
 0x3d7   : > { %6141 = vpow2.f32 %v2317_v63  ;;  %v10359_v63 = vld [vmem:[#allocation9_spill] sm:$0xff] }
 0x3d8   : > { %6143 = vpow2.f32 %v2321_v4  ;;  %5641 = vmatpush3.bf16.msra.mxu1 %v2365_v30  ;;  %v7897_v45 = vpop.f32.mrf.mxu1 }
 0x3d9   : > { %5642 = vmatprep.subr.bf16.mxu1 %v2362_v33  ;;  %6145 = vpow2.f32 %v2325_v25 }
 0x3da   : > { %6147 = vpow2.f32 %v2329_v7  ;;  %v7908_v55 = vpop.f32.mrf.mxu1 }
 0x3dc   : > { %5643 = vmatpush3.bf16.msra.mxu1 %v2362_v33  ;;  %v7915_v50 = vpop.f32.mrf.mxu1 }
 0x3dd   : > { %v7889_v8 = vpop.f32.mrf.mxu0  ;;  %v918_v5 = vpop.permute.xlu1 %917  ;;  %10358 = vst [vmem:[#allocation26_spill] sm:$0xff] %v7915_v50 }
 0x3de   : > { %10354 = vst [vmem:[#allocation31_spill] sm:$0xff] %v7889_v8  ;;  %6149 = vrcp.f32 %v7889_v8  ;;  %v987_v2 = vmul.f32 %v7751_v57, %v918_v5  ;;  %v2335_v57 = vmul.f32 1.442695, %v2304_v41  ;;  %v10364_v41 = vmov 5  }
 0x3df   : > { %6151 = vpow2.f32 %v2327_v28  ;;  %v7895_v52 = vpop.f32.mrf.mxu0  ;;  %5645 = vmatmul.mubr.bf16.vlgmr.msra.gmra.mxu1 %v2338_v18 }
 0x3e0   : > { %10355 = vst [vmem:[#allocation33_spill] sm:$0xff] %v7895_v52  ;;  %6153 = vpow2.f32 %v2331_v48  ;;  %5648 = vmatprep.mubr.bf16.mxu1 %v2339_v29  ;;  %1003 = vst.msk [vmem:[%s7899_s20 + $0x10] sm:$0xff] %vm321_vm0, %v987_v2  ;;  %v7927_v48 = vpop.f32.mrf.mxu1 }
 0x3e1   : > { %v7903_v39 = vpop.f32.mrf.mxu0  ;;  %6155 = vrcp.f32 %v7885_v14  ;;  %10362 = vst [vmem:[#allocation17_spill] sm:$0xff] %v7927_v48 }
 0x3e2   : > { %v6138_v6 = vpop.eup %6137  ;;  %6157 = vpow2.f32 %v2333_v44 }
 0x3e3   : > { %v6140_v62 = vpop.eup %6139  ;;  %v7906_v12 = vpop.f32.mrf.mxu0  ;;  %977 = vperm.xlu1 %5900, %v6138_v6   ;;  %6159 = vrcp.f32 %v7895_v52 }
 0x3e4   : > { %v6142_v35 = vpop.eup %6141  ;;  %6161 = vpow2.f32 %v2335_v57 }
 0x3e5   : > { %v6144_v58 = vpop.eup %6143  ;;  %v2790_v27 = vpop.f32.mrf.mxu0  ;;  %v2340_v15 = vpack.c.bf16 %v6136_v31, %v6142_v35  ;;  %6163 = vrcp.f32 %v7897_v45 }
 0x3e6   : > { %v7910_v49 = vpop.permute.xlu1 %1960  ;;  %v2341_v13 = vpack.c.bf16 %v6140_v62, %v6144_v58  ;;  %v2791_v4 = vadd.f32 %v2790_v27, %v10359_v63  ;;  %v6146_v53 = vpop.eup %6145  ;;  %6165 = vrcp.f32 %v7903_v39 }
 0x3e7   : > { %10356 = vst [vmem:[#allocation44_spill] sm:$0xff] %v7910_v49  ;;  %v2792_v46 = vpop.f32.mrf.mxu0  ;;  %v7913_v21 = vpop.permute.xlu0 %1950  ;;  %5649 = vmatmul.mubr.bf16.gmra.mxu1 %v2340_v15  ;;  %6167 = vrcp.f32 %v7908_v55 }
 0x3e8   : > { %10357 = vst [vmem:[#allocation38_spill] sm:$0xff] %v7913_v21  ;;  %v7919_v30 = vadd.f32 %v2792_v46, %v10360_v22  ;;  %5652 = vmatprep.mubr.bf16.mxu1 %v2341_v13  ;;  %v6148_v25 = vpop.eup %6147  ;;  %v7937_v62 = vpop.f32.mrf.mxu1  ;;  %6169 = vrcp.f32 %v7915_v50 }
 0x3e9   : > { %v2794_v43 = vpop.f32.mrf.mxu0  ;;  %10365 = vst [vmem:[#allocation21_spill] sm:$0xff] %v7937_v62  ;;  %6171 = vrcp.f32 %v7906_v12 }
 0x3ea   : > { %10361 = vst [vmem:[#allocation40_spill] sm:$0xff] %v7919_v30  ;;  %v908_v0 = vpop.permute.xlu1 %907  ;;  %2944 = vperm.xlu0 %5902, %v7919_v30   ;;  %v2795_v7 = vadd.f32 %v2794_v43, %v10359_v63 }
 0x3eb   : > { %v985_v33 = vmul.f32 %v908_v0, %v7757_v10  ;;  %v6150_v34 = vpop.eup %6149  ;;  %v7925_v23 = vpop.permute.xlu0 %1965 }
 0x3ec   : > { %v2796_v28 = vpop.f32.mrf.mxu0  ;;  %v6152_v51 = vpop.eup %6151  ;;  %2020 = vperm.xlu1 %5900, %v6150_v34   ;;  %v7931_v19 = vpack.c.bf16 %v2795_v7, %v2791_v4 }
 0x3ed   : > { %1001 = vst.msk [vmem:[%s7899_s20] sm:$0xff] %vm321_vm0, %v985_v33  ;;  %v6154_v10 = vpop.eup %6153  ;;  %v2342_v18 = vpack.c.bf16 %v6152_v51, %v6146_v53  ;;  %v7956_v53 = vpop.f32.mrf.mxu1  ;;  %v10369_v51 = vmov 32  }
 0x3ee   : > { %10363 = vst [vmem:[#allocation36_spill] sm:$0xff] %v7931_v19  ;;  %v923_v17 = vpop.permute.xlu1 %922  ;;  %v2800_v5 = vpop.f32.mrf.mxu0  ;;  %5903 = vset.pattern.permute.xlu0 %v10364_v41  ;;  %v2343_v2 = vpack.c.bf16 %v6154_v10, %v6148_v25  ;;  %10367 = vst [vmem:[#allocation23_spill] sm:$0xff] %v7956_v53  ;;  %6173 = vrcp.f32 %v7956_v53 }
 0x3ef   : > { %v988_v29 = vmul.f32 %v7766_v32, %v923_v17  ;;  %v6156_v31 = vpop.eup %6155  ;;  %3429 = vperm.xlu0 %5903, %v7919_v30   ;;  %5653 = vmatmul.mubr.bf16.gmra.mxu1 %v2342_v18  ;;  %v913_v44 = vpop.permute.xlu0 %912  ;;  %v7943_v32 = vadd.f32 %v2796_v28, %v10360_v22  ;;  %v2801_v35 = vadd.f32 %v2800_v5, %v10359_v63  ;;  %6175 = vrcp.f32 %v7927_v48 }
 0x3f0   : > { %v2802_v6 = vpop.f32.mrf.mxu0  ;;  %v986_v57 = vmul.f32 %v913_v44, %v7772_v61  ;;  %967 = vperm.xlu1 %5900, %v6156_v31   ;;  %5656 = vmatprep.mubr.bf16.mxu1 %v2343_v2  ;;  %v6158_v15 = vpop.eup %6157 }
 0x3f1   : > { %1004 = vst.msk [vmem:[%s7899_s20 + $0x18] sm:$0xff] %vm321_vm0, %v988_v29  ;;  %10366 = vst [vmem:[#allocation56_spill] sm:$0xff] %v7943_v32  ;;  %v6160_v46 = vpop.eup %6159  ;;  %v7972_v10 = vadd.f32 %v2802_v6, %v10360_v22  ;;  %v7976_v17 = vpop.f32.mrf.mxu1 }
 0x3f2   : > { %v7946_v58 = vpop.permute.xlu1 %1955  ;;  %v2804_v27 = vpop.f32.mrf.mxu0  ;;  %1002 = vst.msk [vmem:[%s7899_s20 + $0x8] sm:$0xff] %vm321_vm0, %v986_v57  ;;  %10371 = vst [vmem:[#allocation35_spill] sm:$0xff] %v7976_v17  ;;  %6177 = vrcp.f32 %v7976_v17 }
 0x3f3   : > { %v2805_v13 = vadd.f32 %v2804_v27, %v10359_v63  ;;  %5904 = vset.pattern.permute.xlu0 %v10353_v11  ;;  %v6162_v4 = vpop.eup %6161  ;;  %10370 = vst [vmem:[#allocation37_spill] sm:$0xff] %v7972_v10  ;;  %v7985_v31 = vpop.f32.mrf.mxu1 }
 0x3f4   : > { %v7953_v61 = vpop.f32.mrf.mxu0  ;;  %2949 = vperm.xlu0 %5904, %v7943_v32   ;;  %2010 = vperm.xlu1 %5900, %v6160_v46   ;;  %v2344_v25 = vpack.c.bf16 %v6162_v4, %v6158_v15  ;;  %v6164_v28 = vpop.eup %6163  ;;  %10373 = vst [vmem:[#allocation30_spill] sm:$0xff] %v7985_v31  ;;  %6179 = vrcp.f32 %v7985_v31 }
 0x3f5   : > { %v7959_v0 = vpack.c.bf16 %v2805_v13, %v2801_v35  ;;  %v6166_v5 = vpop.eup %6165  ;;  %v7995_v13 = vpop.f32.mrf.mxu1  ;;  %6181 = vrcp.f32 %v7937_v62 }
 0x3f6   : > { %v938_v43 = vpop.permute.xlu1 %937  ;;  %v7961_v33 = vpop.f32.mrf.mxu0 }
 0x3f7   : > { %10368 = vst [vmem:[#allocation34_spill] sm:$0xff] %v7959_v0  ;;  %v991_v7 = vmul.f32 %v7779_v24, %v938_v43  ;;  %5657 = vmatmul.mubr.bf16.gmra.mxu1 %v2344_v25  ;;  %v6168_v44 = vpop.eup %6167 }
 0x3f8   : > { %v2812_v34 = vpop.f32.mrf.mxu0  ;;  %5906 = vset.pattern.permute.xlu0 %v10369_v51  ;;  %5905 = vset.pattern.permute.xlu1 %v10364_v41  ;;  %v6170_v57 = vpop.eup %6169 }
 0x3f9   : > { %1007 = vst.msk [vmem:[%s7899_s20 + $0x30] sm:$0xff] %vm321_vm0, %v991_v7  ;;  %3433 = vperm.xlu1 %5905, %v7943_v32   ;;  %982 = vperm.xlu0 %5906, %v6164_v28   ;;  %v6172_v46 = vpop.eup %6171 }
 0x3fa   : > { %v7974_v24 = vpop.f32.mrf.mxu0 }
 0x3fb   : > { %v6174_v43 = vpop.eup %6173 }
 0x3fc   : > { %v7978_v18 = vpop.f32.mrf.mxu0  ;;  %v6176_v31 = vpop.eup %6175 }
 0x3fd   : > { %3437 = vperm.xlu1 %5905, %v7972_v10   ;;  %2025 = vperm.xlu0 %5906, %v6166_v5   ;;  %v7981_v29 = vpop.permute.xlu1 %1980  ;;  %v8011_v5 = vadd.f32 %v2812_v34, %v10360_v22 }
 0x3fe   : > { %10372 = vst [vmem:[#allocation29_spill] sm:$0xff] %v7981_v29  ;;  %v7983_v2 = vpop.f32.mrf.mxu0 }
 0x3ff   : > { %10375 = vst [vmem:[#allocation32_spill] sm:$0xff] %v8011_v5  ;;  %v6178_v17 = vpop.eup %6177 }
 0x400   : > { %v7987_v6 = vpop.f32.mrf.mxu0 }
 0x401   : > { %5908 = vset.pattern.permute.xlu1 %v10369_v51  ;;  %972 = vperm.xlu0 %5906, %v6168_v44   ;;  %v928_v35 = vpop.permute.xlu1 %927  ;;  %v8008_v28 = vpop.permute.xlu0 %1985 }
 0x402   : > { %v989_v27 = vmul.f32 %v928_v35, %v7784_v36  ;;  %1410 = vperm.xlu1 %5908, %v6170_v57   ;;  %v7993_v15 = vpop.f32.mrf.mxu0  ;;  %v8006_v36 = vpop.f32.mrf.mxu1 }
 0x404   : > { %1005 = vst.msk [vmem:[%s7899_s20 + $0x20] sm:$0xff] %vm321_vm0, %v989_v27  ;;  %v7999_v4 = vpop.f32.mrf.mxu0 }
 0x405   : > { %2015 = vperm.xlu0 %5906, %v6172_v46   ;;  %v8001_v25 = vpop.permute.xlu1 %1970  ;;  %v8021_v46 = vpop.f32.mrf.mxu1 }
 0x406   : > { %10374 = vst [vmem:[#allocation27_spill] sm:$0xff] %v8001_v25  ;;  %1405 = vperm.xlu1 %5908, %v6174_v43   ;;  %v8004_v7 = vpop.f32.mrf.mxu0  ;;  %10376 = vst [vmem:[#allocation39_spill] sm:$0xff] %v8021_v46  ;;  %v8028_v43 = vpop.permute.xlu0 %1975  ;;  %6183 = vrcp.f32 %v8021_v46 }
 0x407   : > { %v8035_v48 = vpop.f32.mrf.mxu1 }
 0x408   : > { %v8013_v44 = vpop.f32.mrf.mxu0  ;;  %10377 = vst [vmem:[#allocation43_spill] sm:$0xff] %v8035_v48  ;;  %6185 = vrcp.f32 %v8035_v48 }
 0x409   : > { %5907 = vset.pattern.permute.xlu0 %v10353_v11  ;;  %v943_v57 = vpop.permute.xlu1 %942  ;;  %v8049_v25 = vpop.f32.mrf.mxu1 }
 0x40a   : > { %v992_v35 = vmul.f32 %v7797_v60, %v943_v57  ;;  %5914 = vset.pattern.permute.xlu1 %v10364_v41  ;;  %2954 = vperm.xlu0 %5907, %v7972_v10   ;;  %v8019_v27 = vpop.f32.mrf.mxu0 }
 0x40b   : > { %3445 = vperm.xlu1 %5914, %v8011_v5  }
 0x40c   : > { %1008 = vst.msk [vmem:[%s7899_s20 + $0x38] sm:$0xff] %vm321_vm0, %v992_v35  ;;  %v8026_v34 = vpop.f32.mrf.mxu0  ;;  %v8041_v35 = vadd.f32 %v7953_v61, %v10360_v22 }
 0x40d   : > { %v933_v53 = vpop.permute.xlu1 %932 }
 0x40e   : > { %v990_v60 = vmul.f32 %v933_v53, %v7800_v37  ;;  %5909 = vset.pattern.permute.xlu0 %v10369_v51  ;;  %v8032_v57 = vpop.f32.mrf.mxu0  ;;  %10378 = vst [vmem:[#allocation47_spill] sm:$0xff] %v8041_v35 }
 0x40f   : > { %5915 = vset.pattern.permute.xlu1 %v10369_v51  ;;  %1400 = vperm.xlu0 %5909, %v6176_v31   ;;  %v6180_v31 = vpop.eup %6179 }
 0x410   : > { %1006 = vst.msk [vmem:[%s7899_s20 + $0x28] sm:$0xff] %vm321_vm0, %v990_v60  ;;  %1430 = vperm.xlu1 %5915, %v6178_v17   ;;  %v8045_v37 = vpop.f32.mrf.mxu0  ;;  %v8066_v17 = vpop.f32.mrf.mxu1 }
 0x411   : > { %v958_v53 = vpop.permute.xlu1 %957  ;;  %v963_v62 = vpop.permute.xlu0 %962 }
 0x412   : > { %v995_v50 = vmul.f32 %v7804_v42, %v958_v53  ;;  %v996_v52 = vmul.f32 %v7812_v40, %v963_v62  ;;  %v2844_v8 = vpop.f32.mrf.mxu0  ;;  %v8062_v42 = vadd.f32 %v7987_v6, %v10360_v22  ;;  %v6182_v48 = vpop.eup %6181 }
 0x413   : > { %5910 = vset.pattern.permute.xlu0 %v10353_v11 }
 0x414   : > { %1011 = vst.msk [vmem:[%s7899_s20 + $0x50] sm:$0xff] %vm321_vm0, %v995_v50  ;;  %1012 = vst.msk [vmem:[%s7899_s20 + $0x58] sm:$0xff] %vm321_vm0, %v996_v52  ;;  %1420 = vperm.xlu1 %5915, %v6180_v31   ;;  %2959 = vperm.xlu0 %5910, %v8041_v35   ;;  %v8058_v61 = vpop.f32.mrf.mxu0  ;;  %v8077_v31 = vpop.f32.mrf.mxu1 }
 0x415   : > { %10379 = vst [vmem:[#allocation45_spill] sm:$0xff] %v8062_v42  ;;  %v8064_v40 = vpop.permute.xlu1 %2000  ;;  %10381 = vst [vmem:[#allocation49_spill] sm:$0xff] %v8077_v31  ;;  %6187 = vrcp.f32 %v8077_v31 }
 0x416   : > { %10380 = vst [vmem:[#allocation51_spill] sm:$0xff] %v8064_v40  ;;  %v2850_v62 = vpop.f32.mrf.mxu0  ;;  %v6184_v40 = vpop.eup %6183  ;;  %6189 = vrcp.f32 %v7995_v13 }
 0x417   : > { %v2851_v1 = vadd.f32 %v2850_v62, %v10359_v63  ;;  %v6186_v49 = vpop.eup %6185 }
 0x418   : > { %5919 = vset.pattern.permute.xlu1 %v10364_v41  ;;  %5911 = vset.pattern.permute.xlu0 %v10364_v41  ;;  %v8070_v52 = vpop.f32.mrf.mxu0 }
 0x419   : > { %3453 = vperm.xlu1 %5919, %v8062_v42   ;;  %3441 = vperm.xlu0 %5911, %v8041_v35   ;;  %v948_v50 = vpop.permute.xlu1 %947  ;;  %v8074_v60 = vpop.permute.xlu0 %2005 }
 0x41a   : > { %v993_v6 = vmul.f32 %v948_v50, %v7807_v59  ;;  %v2854_v53 = vpop.f32.mrf.mxu0  ;;  %v8087_v50 = vpop.f32.mrf.mxu1 }
 0x41b   : > { %6191 = vrcp.f32 %v8087_v50 }
 0x41c   : > { %1009 = vst.msk [vmem:[%s7899_s20 + $0x40] sm:$0xff] %vm321_vm0, %v993_v6  ;;  %v8081_v46 = vpop.f32.mrf.mxu0  ;;  %v2855_v6 = vadd.f32 %v2854_v53, %v10359_v63  ;;  %6193 = vrcp.f32 %v8006_v36 }
 0x41d   : > { %5920 = vset.pattern.permute.xlu1 %v10369_v51  ;;  %5912 = vset.pattern.permute.xlu0 %v10369_v51  ;;  %v953_v29 = vpop.permute.xlu0 %952  ;;  %6195 = vrcp.f32 %v8049_v25 }
 0x41e   : > { %v994_v21 = vmul.f32 %v953_v29, %v7825_v16  ;;  %1450 = vperm.xlu1 %5920, %v6184_v40   ;;  %1415 = vperm.xlu0 %5912, %v6182_v48   ;;  %v2860_v59 = vpop.f32.mrf.mxu0  ;;  %v8100_v16 = vadd.f32 %v7978_v18, %v10360_v22  ;;  %v8105_v48 = vadd.f32 %v8013_v44, %v10360_v22  ;;  %6197 = vrcp.f32 %v8066_v17 }
 0x41f   : > { %v2861_v31 = vadd.f32 %v2860_v59, %v10359_v63  ;;  %v2841_v29 = vadd.f32 %v8032_v57, %v10359_v63  ;;  %v2845_v40 = vadd.f32 %v2844_v8, %v10359_v63  ;;  %v8111_v62 = vpack.c.bf16 %v2855_v6, %v2851_v1 }
 0x420   : > { %1010 = vst.msk [vmem:[%s7899_s20 + $0x48] sm:$0xff] %vm321_vm0, %v994_v21  ;;  %v8093_v38 = vpop.f32.mrf.mxu0  ;;  %10382 = vst [vmem:[#allocation55_spill] sm:$0xff] %v8100_v16  ;;  %v2835_v8 = vadd.f32 %v8019_v27, %v10359_v63  ;;  %v2825_v59 = vadd.f32 %v7993_v15, %v10359_v63  ;;  %v2815_v15 = vadd.f32 %v7974_v24, %v10359_v63 }
 0x421   : > { %10383 = vst [vmem:[#allocation53_spill] sm:$0xff] %v8105_v48  ;;  %10384 = vst [vmem:[#allocation58_spill] sm:$0xff] %v8111_v62  ;;  %v8124_v1 = vpack.c.bf16 %v2845_v40, %v2841_v29  ;;  %v3197_v57 = vsel %vm321_vm0, %v8111_v62, 1065369472 }
 0x422   : > { %1440 = vperm.xlu1 %5920, %v6186_v49   ;;  %5913 = vset.pattern.permute.xlu0 %v10353_v11  ;;  %v2864_v21 = vpop.f32.mrf.mxu0  ;;  %v2831_v49 = vadd.f32 %v8004_v7, %v10359_v63  ;;  %v6188_v7 = vpop.eup %6187 }
 0x423   : > { %2964 = vperm.xlu0 %5913, %v8011_v5   ;;  %v2865_v18 = vadd.f32 %v2864_v21, %v10359_v63  ;;  %10386 = vst [vmem:[#allocation42_spill] sm:$0xff] %v8124_v1  ;;  %v3194_v6 = vsel %vm321_vm0, %v8124_v1, 1065369472  ;;  %v6190_v21 = vpop.eup %6189 }
 0x424   : > { %v8136_v27 = vpack.c.bf16 %v2835_v8, %v2831_v49  ;;  %v8152_v49 = vadd.f32 %v8045_v37, %v10360_v22  ;;  %v8166_v37 = vadd.f32 %v7999_v4, %v10360_v22 }
 0x425   : > { %v8114_v53 = vpack.c.bf16 %v2865_v18, %v2861_v31  ;;  %v2821_v31 = vadd.f32 %v7983_v2, %v10359_v63  ;;  %v2811_v2 = vadd.f32 %v7961_v33, %v10359_v63 }
 0x426   : > { %5924 = vset.pattern.permute.xlu1 %v10364_v41  ;;  %10387 = vst [vmem:[#allocation46_spill] sm:$0xff] %v8136_v27  ;;  %v3191_v18 = vsel %vm321_vm0, %v8136_v27, 1065369472  ;;  %10389 = vst [vmem:[#allocation52_spill] sm:$0xff] %v8152_v49 }
 0x427   : > { %10385 = vst [vmem:[#allocation41_spill] sm:$0xff] %v8114_v53  ;;  %3461 = vperm.xlu1 %5924, %v8105_v48   ;;  %2969 = vperm.xlu0 %5913, %v8100_v16   ;;  %v3200_v44 = vsel %vm321_vm0, %v8114_v53, 1065369472  ;;  %v8145_v40 = vpack.c.bf16 %v2825_v59, %v2821_v31  ;;  %v8154_v33 = vpack.c.bf16 %v2815_v15, %v2811_v2  ;;  %10391 = vst [vmem:[#allocation50_spill] sm:$0xff] %v8166_v37  ;;  %v8179_v31 = vpop.f32.mrf.mxu1  ;;  %v8198_v15 = vpop.permute.xlu0 %1995 }
 0x428   : > { %5660 = vmatprep.subr.bf16.mxu1 %v3200_v44  ;;  %v6192_v29 = vpop.eup %6191  ;;  %10392 = vst [vmem:[#allocation14_spill] sm:$0xff] %v8179_v31  ;;  %6199 = vrcp.f32 %v8179_v31  ;;  %v8185_v59 = vadd.f32 %v8026_v34, %v10360_v22 }
 0x429   : > { %5661 = vmatpush3.bf16.msra.mxu1 %v3200_v44  ;;  %10388 = vst [vmem:[#allocation48_spill] sm:$0xff] %v8145_v40  ;;  %v6194_v8 = vpop.eup %6193  ;;  %10390 = vst [vmem:[#allocation10_spill] sm:$0xff] %v8154_v33  ;;  %v3188_v63 = vsel %vm321_vm0, %v8145_v40, 1065369472  ;;  %v3185_v24 = vsel %vm321_vm0, %v8154_v33, 1065369472 }
 0x42a   : > { %5662 = vmatprep.subr.bf16.mxu1 %v3197_v57  ;;  %v3182_v44 = vsel %vm321_vm0, %v7959_v0, 1065369472  ;;  %v6196_v4 = vpop.eup %6195  ;;  %10393 = vst [vmem:[#allocation57_spill] sm:$0xff] %v8185_v59 }
 0x42b   : > { %5925 = vset.pattern.permute.xlu1 %v10369_v51  ;;  %5916 = vset.pattern.permute.xlu0 %v10364_v41 }
 0x42c   : > { %1470 = vperm.xlu1 %5925, %v6188_v7   ;;  %3449 = vperm.xlu0 %5916, %v8100_v16   ;;  %v6198_v7 = vpop.eup %6197 }
 0x42d   : > { %5663 = vmatpush3.bf16.msra.mxu1 %v3197_v57  ;;  %v3179_v57 = vsel %vm321_vm0, %v7931_v19, 1065369472  ;;  %v8273_v19 = vadd.f32 %v8093_v38, %v10360_v22 }
 0x42e   : > { %5664 = vmatprep.subr.bf16.mxu1 %v3194_v6 }
 0x42f   : > { %10401 = vst [vmem:[#allocation22_spill] sm:$0xff] %v8273_v19 }
 0x430   : > { %1460 = vperm.xlu1 %5925, %v6192_v29   ;;  %5917 = vset.pattern.permute.xlu0 %v10369_v51 }
 0x431   : > { %1435 = vperm.xlu0 %5917, %v6190_v21   ;;  %5665 = vmatpush3.bf16.msra.mxu1 %v3194_v6  ;;  %v8188_v6 = vpop.f32.mrf.mxu1  ;;  %v8193_v21 = vpop.permute.xlu1 %1990 }
 0x432   : > { %5666 = vmatprep.subr.bf16.mxu1 %v3191_v18  ;;  %10394 = vst [vmem:[#allocation15_spill] sm:$0xff] %v8188_v6  ;;  %6201 = vrcp.f32 %v8188_v6 }
 0x434   : > { %5929 = vset.pattern.permute.xlu1 %v10364_v41 }
 0x435   : > { %1425 = vperm.xlu0 %5917, %v6194_v8   ;;  %5667 = vmatpush3.bf16.msra.mxu1 %v3191_v18  ;;  %v6200_v29 = vpop.eup %6199 }
 0x436   : > { %5668 = vmatprep.subr.bf16.mxu1 %v3188_v63  ;;  %3469 = vperm.xlu1 %5929, %v8152_v49  }
 0x439   : > { %5918 = vset.pattern.permute.xlu0 %v10353_v11  ;;  %5669 = vmatpush3.bf16.msra.mxu1 %v3188_v63 }
 0x43a   : > { %2974 = vperm.xlu0 %5918, %v8062_v42   ;;  %5670 = vmatprep.subr.bf16.mxu1 %v3185_v24 }
 0x43b   : > { %5930 = vset.pattern.permute.xlu1 %v10369_v51 }
 0x43d   : > { %5671 = vmatpush3.bf16.msra.mxu1 %v3185_v24 }
 0x43e   : > { %2979 = vperm.xlu0 %5918, %v8166_v37   ;;  %5672 = vmatprep.subr.bf16.mxu1 %v3182_v44 }
 0x43f   : > { %v6202_v18 = vpop.eup %6201 }
 0x441   : > { %5673 = vmatpush3.bf16.msra.mxu1 %v3182_v44 }
 0x442   : > { %5921 = vset.pattern.permute.xlu0 %v10364_v41  ;;  %5674 = vmatprep.subr.bf16.mxu1 %v3179_v57 }
 0x443   : > { %3457 = vperm.xlu0 %5921, %v8166_v37  }
 0x445   : > { %5675 = vmatpush3.bf16.msra.mxu1 %v3179_v57 }
 0x447   : > { %5922 = vset.pattern.permute.xlu0 %v10369_v51 }
 0x448   : > { %1455 = vperm.xlu0 %5922, %v6196_v4  }
 0x44c   : > { %1445 = vperm.xlu0 %5922, %v6198_v7  }
 0x450   : > { %5923 = vset.pattern.permute.xlu0 %v10353_v11 }
 0x451   : > { %2984 = vperm.xlu0 %5923, %v8105_v48  }
 0x455   : > { %2989 = vperm.xlu0 %5923, %v8185_v59  }
 0x459   : > { %5926 = vset.pattern.permute.xlu0 %v10364_v41 }
 0x45a   : > { %3465 = vperm.xlu0 %5926, %v8185_v59  }
 0x45e   : > { %5927 = vset.pattern.permute.xlu0 %v10369_v51  ;;  %v978_v34 = vpop.permute.xlu1 %977 }
 0x45f   : > { %v999_v2 = vmul.f32 %v7871_v54, %v978_v34  ;;  %1475 = vperm.xlu0 %5927, %v6200_v29  }
 0x461   : > { %1015 = vst.msk [vmem:[%s7899_s20 + $0x70] sm:$0xff] %vm321_vm0, %v999_v2 }
 0x463   : > { %1465 = vperm.xlu0 %5927, %v6202_v18  }
 0x465   : > { %v8202_v8 = vpop.permute.xlu0 %2944 }
 0x467   : > { %v8204_v63 = vpop.permute.xlu1 %2020  ;;  %5928 = vset.pattern.permute.xlu0 %v10353_v11 }
 0x468   : > { %2994 = vperm.xlu0 %5928, %v8152_v49  }
 0x46a   : > { %v8208_v24 = vpop.permute.xlu0 %3429 }
 0x46b   : > { %v968_v54 = vpop.permute.xlu1 %967 }
 0x46c   : > { %v997_v44 = vmul.f32 %v968_v54, %v7885_v14  ;;  %5931 = vset.pattern.permute.xlu0 %v10369_v51 }
 0x46e   : > { %1013 = vst.msk [vmem:[%s7899_s20 + $0x60] sm:$0xff] %vm321_vm0, %v997_v44 }
 0x46f   : > { %v8214_v57 = vpop.permute.xlu0 %2949 }
 0x474   : > { %v983_v4 = vpop.permute.xlu0 %982 }
 0x475   : > { %v1000_v7 = vmul.f32 %v7897_v45, %v983_v4 }
 0x477   : > { %1016 = vst.msk [vmem:[%s7899_s20 + $0x78] sm:$0xff] %vm321_vm0, %v1000_v7 }
 0x478   : > { %v8219_v29 = vpop.permute.xlu0 %2025 }
 0x47c   : > { %v973_v34 = vpop.permute.xlu0 %972 }
 0x47d   : > { %v998_v2 = vmul.f32 %v973_v34, %v7908_v55 }
 0x47f   : > { %1014 = vst.msk [vmem:[%s7899_s20 + $0x68] sm:$0xff] %vm321_vm0, %v998_v2  ;;  %v8243_v2 = vadd.f32 %v8058_v61, %v10360_v22 }
 0x481   : > { %10397 = vst [vmem:[#allocation59_spill] sm:$0xff] %v8243_v2 }
 0x49f   : > { %v8224_v18 = vpop.f32.mrf.mxu1 }
 0x4a0   : > { %6203 = vrcp.f32 %v8224_v18 }
 0x4a1   : > { %v8227_v14 = vpop.f32.mrf.mxu1 }
 0x4a2   : > { %6205 = vrcp.f32 %v8227_v14 }
 0x4a3   : > { %v8230_v54 = vpop.f32.mrf.mxu1 }
 0x4a4   : > { %10395 = vst [vmem:[#allocation61_spill] sm:$0xff] %v8230_v54 }
 0x4a5   : > { %v8232_v45 = vpop.f32.mrf.mxu1 }
 0x4a6   : > { %10396 = vst [vmem:[#allocation54_spill] sm:$0xff] %v8232_v45  ;;  %6207 = vrcp.f32 %v8232_v45 }
 0x4a7   : > { %v8235_v44 = vpop.f32.mrf.mxu1 }
 0x4a8   : > { %6209 = vrcp.f32 %v8235_v44 }
 0x4a9   : > { %v8237_v7 = vpop.f32.mrf.mxu1  ;;  %6211 = vrcp.f32 %v8230_v54  ;;  %v2866_v54 = vpop.f32.mrf.mxu0 }
 0x4aa   : > { %6213 = vrcp.f32 %v8237_v7 }
 0x4ab   : > { %v8245_v53 = vpop.f32.mrf.mxu1 }
 0x4ac   : > { %10398 = vst [vmem:[#allocation62_spill] sm:$0xff] %v8245_v53 }
 0x4ad   : > { %v6204_v4 = vpop.eup %6203 }
 0x4ae   : > { %2510 = vperm.xlu1 %5930, %v6204_v4   ;;  %v8252_v4 = vadd.f32 %v8070_v52, %v10360_v22 }
 0x4af   : > { %v6206_v55 = vpop.eup %6205 }
 0x4b0   : > { %2500 = vperm.xlu0 %5931, %v6206_v55   ;;  %10399 = vst [vmem:[#allocation60_spill] sm:$0xff] %v8252_v4  ;;  %v8254_v55 = vpop.f32.mrf.mxu1 }
 0x4b1   : > { %10400 = vst [vmem:[#allocation11_spill] sm:$0xff] %v8254_v55 }
 0x4b2   : > { %v8260_v61 = vpop.f32.mrf.mxu1 }
 0x4b3   : > { %v6208_v34 = vpop.eup %6207  ;;  %6215 = vrcp.f32 %v8260_v61 }
 0x4b4   : > { %2505 = vperm.xlu1 %5930, %v6208_v34   ;;  %5932 = vset.pattern.permute.xlu0 %v10353_v11  ;;  %v8265_v52 = vpop.f32.mrf.mxu1 }
 0x4b5   : > { %2999 = vperm.xlu0 %5932, %v8243_v2   ;;  %v6210_v34 = vpop.eup %6209  ;;  %6217 = vrcp.f32 %v8265_v52 }
 0x4b6   : > { %v6212_v1 = vpop.eup %6211  ;;  %6219 = vrcp.f32 %v8245_v53 }
 0x4b7   : > { %v6214_v40 = vpop.eup %6213  ;;  %6221 = vrcp.f32 %v8254_v55 }
 0x4b8   : > { %5936 = vset.pattern.permute.xlu1 %v10364_v41 }
 0x4b9   : > { %3477 = vperm.xlu1 %5936, %v8252_v4   ;;  %5933 = vset.pattern.permute.xlu0 %v10364_v41 }
 0x4ba   : > { %3473 = vperm.xlu0 %5933, %v8243_v2  }
 0x4bd   : > { %5937 = vset.pattern.permute.xlu1 %v10369_v51 }
 0x4be   : > { %2530 = vperm.xlu1 %5937, %v6210_v34   ;;  %5934 = vset.pattern.permute.xlu0 %v10369_v51  ;;  %v8277_v34 = vadd.f32 %v8081_v46, %v10360_v22 }
 0x4bf   : > { %2515 = vperm.xlu0 %5934, %v6212_v1  }
 0x4c0   : > { %10402 = vst [vmem:[#allocation20_spill] sm:$0xff] %v8277_v34  ;;  %v6216_v1 = vpop.eup %6215 }
 0x4c2   : > { %2520 = vperm.xlu1 %5937, %v6214_v40   ;;  %v6218_v38 = vpop.eup %6217  ;;  %v8286_v40 = vpop.f32.mrf.mxu1 }
 0x4c3   : > { %5935 = vset.pattern.permute.xlu0 %v10353_v11  ;;  %10403 = vst [vmem:[#allocation18_spill] sm:$0xff] %v8286_v40  ;;  %v6220_v46 = vpop.eup %6219  ;;  %6223 = vrcp.f32 %v8286_v40 }
 0x4c4   : > { %3004 = vperm.xlu0 %5935, %v8252_v4   ;;  %v8289_v53 = vpop.f32.mrf.mxu1  ;;  %v6222_v55 = vpop.eup %6221 }
 0x4c5   : > { %10404 = vst [vmem:[#allocation16_spill] sm:$0xff] %v8289_v53  ;;  %6225 = vrcp.f32 %v8289_v53 }
 0x4c6   : > { %5941 = vset.pattern.permute.xlu1 %v10364_v41  ;;  %v8291_v45 = vpop.f32.mrf.mxu1 }
 0x4c7   : > { %3485 = vperm.xlu1 %5941, %v8273_v19  }
 0x4c8   : > { %3009 = vperm.xlu0 %5935, %v8277_v34  }
 0x4cb   : > { %5942 = vset.pattern.permute.xlu1 %v10369_v51 }
 0x4cc   : > { %2550 = vperm.xlu1 %5942, %v6216_v1   ;;  %5938 = vset.pattern.permute.xlu0 %v10364_v41  ;;  %v8296_v1 = vpop.f32.mrf.mxu1 }
 0x4cd   : > { %3481 = vperm.xlu0 %5938, %v8277_v34  }
 0x4d0   : > { %2540 = vperm.xlu1 %5942, %v6218_v38   ;;  %v8299_v38 = vadd.f32 %v2866_v54, %v10360_v22 }
 0x4d1   : > { %5939 = vset.pattern.permute.xlu0 %v10369_v51 }
 0x4d2   : > { %2535 = vperm.xlu0 %5939, %v6220_v46   ;;  %10405 = vst [vmem:[#allocation9_spill] sm:$0xff] %v8299_v38  ;;  %v8303_v46 = vpop.f32.mrf.mxu1 }
 0x4d3   : > { %10406 = vst [vmem:[#allocation7_spill] sm:$0xff] %v8303_v46  ;;  %6227 = vrcp.f32 %v8303_v46  ;;  %v2031_v46 = vmul.f32 %v7768_v3, %v7925_v23  ;;  %v2035_v3 = vmul.f32 %v7790_v47, %v8008_v28  ;;  %v2033_v23 = vmul.f32 %v8028_v43, %v7793_v20 }
 0x4d4   : > { %v2037_v20 = vmul.f32 %v8198_v15, %v7832_v56  ;;  %v2043_v28 = vmul.f32 %v7903_v39, %v8219_v29 }
 0x4d6   : > { %2525 = vperm.xlu0 %5939, %v6222_v55   ;;  %v6224_v55 = vpop.eup %6223 }
 0x4d7   : > { %v6226_v22 = vpop.eup %6225 }
 0x4da   : > { %5940 = vset.pattern.permute.xlu0 %v10353_v11  ;;  %v8307_v11 = vpop.f32.mrf.mxu1 }
 0x4db   : > { %3014 = vperm.xlu0 %5940, %v8273_v19   ;;  %10407 = vst [vmem:[#allocation63_spill] sm:$0xff] %v8307_v11  ;;  %6229 = vrcp.f32 %v8307_v11  ;;  %v10408_v11 = vmov 6  }
 0x4dc   : > { %6231 = vrcp.f32 %v8291_v45 }
 0x4dd   : > { %6233 = vrcp.f32 %v8296_v1 }
 0x4df   : > { %3019 = vperm.xlu0 %5940, %v8299_v38  }
 0x4e0   : > { %v6228_v54 = vpop.eup %6227 }
 0x4e3   : > { %5943 = vset.pattern.permute.xlu0 %v10364_v41  ;;  %v8314_v41 = vpop.permute.xlu1 %2010 }
 0x4e4   : > { %3489 = vperm.xlu0 %5943, %v8299_v38  }
 0x4e7   : > { %v8321_v40 = vpop.permute.xlu1 %3433 }
 0x4e8   : > { %5944 = vset.pattern.permute.xlu0 %v10369_v51  ;;  %v6230_v53 = vpop.eup %6229  ;;  %10409 = vst [vmem:[#allocation64_spill] sm:$0xff] %v8321_v40 }
 0x4e9   : > { %2555 = vperm.xlu0 %5944, %v6224_v55   ;;  %v2029_v55 = vmul.f32 %v7946_v58, %v7775_v9  ;;  %v2039_v9 = vmul.f32 %v7823_v26, %v8074_v60  ;;  %v6232_v51 = vpop.eup %6231 }
 0x4ed   : > { %2545 = vperm.xlu0 %5944, %v6226_v22  }
 0x4f1   : > { %2575 = vperm.xlu0 %5944, %v6228_v54  }
 0x4f5   : > { %2565 = vperm.xlu0 %5944, %v6230_v53   ;;  %v8331_v53 = vpop.permute.xlu1 %3437 }
 0x4f6   : > { %10410 = vst [vmem:[#allocation65_spill] sm:$0xff] %v8331_v53 }
 0x4f9   : > { %2877 = vxpose.xlu1.b32.start [1/16] (narrow) %v7919_v30, 8  ;;  %2066 = vrot.lane.b32.xlu0 %v2031_v46, %s6563_s23  ;;  %v2016_v46 = vpop.permute.xlu0 %2015  ;;  %v8337_v58 = vpop.permute.xlu1 %1410  ;;  %v5397_v30 = vld [vmem:[%s7084_s30 + $0x48] sm:$0xff]  }
 0x4fa   : > { %5946 = vset.pattern.permute.xlu0 %v10408_v11  ;;  %v2041_v60 = vmul.f32 %v2016_v46, %v7906_v12 }
 0x4fd   : > { %2878 = vxpose.xlu1.b32.cont [2/16] (narrow) %v7943_v32, 8  ;;  %2062 = vrot.lane.b32.xlu0 %v2029_v55, %s6563_s23  ;;  %v8339_v47 = vpop.permute.xlu0 %2954  ;;  %v8349_v43 = vpop.permute.xlu1 %1405 }
 0x4fe   : > { %v6234_v32 = vpop.eup %6233 }
 0x501   : > { %2879 = vxpose.xlu1.b32.cont [3/16] (narrow) %v7972_v10, 8  ;;  %2074 = vrot.lane.b32.xlu0 %v2035_v3, %s6563_s23  ;;  %v8351_v26 = vpop.permute.xlu0 %1400  ;;  %v8356_v22 = vpop.permute.xlu1 %3445 }
 0x502   : > { %10411 = vst [vmem:[#allocation66_spill] sm:$0xff] %v8356_v22 }
 0x505   : > { %2880 = vxpose.xlu1.b32.cont [4/16] (narrow) %v8041_v35, 8  ;;  %2070 = vrot.lane.b32.xlu0 %v2033_v23, %s6563_s23  ;;  %v8358_v56 = vpop.permute.xlu0 %2959  ;;  %v8362_v15 = vpop.permute.xlu1 %1430 }
 0x509   : > { %2881 = vxpose.xlu1.b32.cont [5/16] (narrow) %v8011_v5, 8  ;;  %2082 = vrot.lane.b32.xlu0 %v2039_v9, %s6563_s23  ;;  %v8364_v39 = vpop.permute.xlu0 %3441  ;;  %v8368_v29 = vpop.permute.xlu1 %1420 }
 0x50d   : > { %2882 = vxpose.xlu1.b32.cont [6/16] (narrow) %v8100_v16, 8  ;;  %2078 = vrot.lane.b32.xlu0 %v2037_v20, %s6563_s23  ;;  %v8370_v54 = vpop.permute.xlu0 %1415  ;;  %v8373_v12 = vpop.permute.xlu1 %3453 }
 0x50e   : > { %10412 = vst [vmem:[#allocation67_spill] sm:$0xff] %v8373_v12 }
 0x511   : > { %2883 = vxpose.xlu1.b32.cont [7/16] (narrow) %v8062_v42, 8  ;;  %2090 = vrot.lane.b32.xlu0 %v2043_v28, %s6563_s23  ;;  %v8375_v55 = vpop.permute.xlu0 %2964  ;;  %v8378_v3 = vpop.permute.xlu1 %1450 }
 0x515   : > { %2884 = vxpose.xlu1.b32.cont [8/16] (narrow) %v8166_v37, 8  ;;  %2086 = vrot.lane.b32.xlu0 %v2041_v60, %s6563_s23  ;;  %v8380_v23 = vpop.permute.xlu0 %2969  ;;  %v8384_v46 = vpop.permute.xlu1 %1440 }
 0x519   : > { %2885 = vxpose.xlu1.b32.cont [9/16] (narrow) %v8105_v48, 8  ;;  %v8386_v9 = vpop.permute.xlu0 %3449  ;;  %v8389_v20 = vpop.permute.xlu1 %3461 }
 0x51a   : > { %10413 = vst [vmem:[#allocation68_spill] sm:$0xff] %v8389_v20 }
 0x51d   : > { %2886 = vxpose.xlu1.b32.cont [10/16] (narrow) %v8185_v59, 8  ;;  %v8391_v28 = vpop.permute.xlu0 %1435  ;;  %v8394_v60 = vpop.permute.xlu1 %1470 }
 0x521   : > { %2887 = vxpose.xlu1.b32.cont [11/16] (narrow) %v8152_v49, 8  ;;  %v8396_v48 = vpop.permute.xlu0 %1425  ;;  %v8398_v5 = vpop.permute.xlu1 %1460  ;;  %v10422_v49 = vld [vmem:[#allocation38_spill] sm:$0xff] }
 0x525   : > { %2888 = vxpose.xlu1.b32.cont [12/16] (narrow) %v8243_v2, 8  ;;  %v8400_v12 = vpop.permute.xlu0 %2974  ;;  %v8402_v22 = vpop.permute.xlu1 %3469  ;;  %v10418_v2 = vld [vmem:[#allocation44_spill] sm:$0xff] }
 0x526   : > { %10414 = vst [vmem:[#allocation69_spill] sm:$0xff] %v8402_v22 }
 0x529   : > { %2889 = vxpose.xlu1.b32.cont [13/16] (narrow) %v8252_v4, 8  ;;  %v8405_v53 = vpop.permute.xlu0 %2979  ;;  %v8408_v20 = vpop.permute.xlu1 %2510 }
 0x52a   : > { %10415 = vst [vmem:[#allocation70_spill] sm:$0xff] %v8405_v53 }
 0x52d   : > { %2890 = vxpose.xlu1.b32.cont [14/16] (narrow) %v8277_v34, 8  ;;  %v8410_v40 = vpop.permute.xlu0 %3457 }
 0x531   : > { %2891 = vxpose.xlu1.b32.cont [15/16] (narrow) %v8273_v19, 8  ;;  %v8414_v6 = vpop.permute.xlu0 %1455  ;;  %v10419_v19 = vld [vmem:[#allocation19_spill] sm:$0xff] }
 0x532   : > { %v2030_v34 = vmul.f32 %v10419_v19, %v10418_v2  ;;  %v10426_v19 = vld [vmem:[#allocation13_spill] sm:$0xff]  ;;  %v10427_v2 = vld [vmem:[#allocation27_spill] sm:$0xff] }
 0x535   : > { %2892 = vxpose.xlu1.b32.end [16/16] (narrow) %v8299_v38, 8  ;;  %v8412_v38 = vpop.permute.xlu1 %2505  ;;  %v8418_v22 = vpop.permute.xlu0 %1445 }
 0x536   : > { %10416 = vst [vmem:[#allocation71_spill] sm:$0xff] %v8412_v38  ;;  %v10421_v38 = vld [vmem:[#allocation12_spill] sm:$0xff] }
 0x537   : > { %v2028_v59 = vmul.f32 %v10422_v49, %v10421_v38  ;;  %v10429_v49 = vld [vmem:[#allocation51_spill] sm:$0xff]  ;;  %v10430_v38 = vld [vmem:[#allocation25_spill] sm:$0xff] }
 0x539   : > { %v8416_v4 = vpop.permute.xlu1 %3477  ;;  %v8424_v42 = vpop.permute.xlu0 %2984 }
 0x53a   : > { %10417 = vst [vmem:[#allocation72_spill] sm:$0xff] %v8416_v4  ;;  %10420 = vst [vmem:[#allocation44_spill] sm:$0xff] %v8424_v42  ;;  %v2032_v42 = vmul.f32 %v10427_v2, %v10426_v19  ;;  %v10433_v19 = vld [vmem:[#allocation31_spill] sm:$0xff] }
 0x53b   : > { %v2042_v2 = vmul.f32 %v10433_v19, %v8204_v63  ;;  %v5396_v63 = vld [vmem:[%s7084_s30 + $0x40] sm:$0xff]   ;;  %v10439_v19 = vld [vmem:[#allocation26_spill] sm:$0xff] }
 0x53c   : > { %v8500_v53 = vunpack.c.h.bf16 %v5396_v63 }
 0x53d   : > { %v8422_v31 = vpop.permute.xlu1 %2530  ;;  %v8435_v16 = vpop.permute.xlu0 %2989 }
 0x53e   : > { %10425 = vst [vmem:[#allocation19_spill] sm:$0xff] %v8435_v16  ;;  %v10437_v16 = vld [vmem:[#allocation8_spill] sm:$0xff] }
 0x541   : > { %v8430_v4 = vpop.permute.xlu1 %2520 }
 0x553   : > { %2570 = vperm.xlu1 %5942, %v6232_v51   ;;  %v10423_v51 = vld [vmem:[#allocation29_spill] sm:$0xff] }
 0x557   : > { %2560 = vperm.xlu1 %5942, %v6234_v32   ;;  %v10424_v32 = vld [vmem:[#allocation24_spill] sm:$0xff] }
 0x558   : > { %v2034_v37 = vmul.f32 %v10424_v32, %v10423_v51  ;;  %v10431_v51 = vld [vmem:[#allocation28_spill] sm:$0xff] }
 0x559   : > { %10444 = vst [vmem:[#allocation28_spill] sm:$0xff] %v8500_v53 }
 0x55b   : > { %2064 = vrot.lane.b32.xlu1 %v2030_v34, %s6563_s23  ;;  %v8440_v34 = vpop.permute.xlu1 %3485 }
 0x55c   : > { %5945 = vset.pattern.permute.xlu1 %v10408_v11  ;;  %10428 = vst [vmem:[#allocation12_spill] sm:$0xff] %v8440_v34  ;;  %v8442_v11 = vpop.permute.xlu0 %3465 }
 0x55f   : > { %2060 = vrot.lane.b32.xlu1 %v2028_v59, %s6563_s23  ;;  %v2038_v59 = vmul.f32 %v10430_v38, %v10429_v49  ;;  %v8447_v35 = vpop.permute.xlu1 %2550  ;;  %v10435_v49 = vld [vmem:[#allocation33_spill] sm:$0xff] }
 0x560   : > { %v8452_v32 = vpop.permute.xlu0 %1475  ;;  %v2040_v38 = vmul.f32 %v8314_v41, %v10435_v49 }
 0x561   : > { %10432 = vst [vmem:[#allocation38_spill] sm:$0xff] %v8452_v32 }
 0x563   : > { %2072 = vrot.lane.b32.xlu1 %v2034_v37, %s6563_s23  ;;  %v2036_v37 = vmul.f32 %v8193_v21, %v10431_v51  ;;  %v8457_v34 = vpop.permute.xlu1 %2540 }
 0x567   : > { %2068 = vrot.lane.b32.xlu1 %v2032_v42, %s6563_s23  ;;  %v8459_v42 = vpop.permute.xlu0 %1465 }
 0x568   : > { %10434 = vst [vmem:[#allocation29_spill] sm:$0xff] %v8459_v42  ;;  %v8478_v42 = vunpack.c.l.bf16 %v5396_v63 }
 0x56b   : > { %2080 = vrot.lane.b32.xlu1 %v2038_v59, %s6563_s23  ;;  %v8470_v51 = vpop.permute.xlu0 %2994 }
 0x56c   : > { %10438 = vst [vmem:[#allocation13_spill] sm:$0xff] %v8470_v51 }
 0x56f   : > { %2076 = vrot.lane.b32.xlu1 %v2036_v37, %s6563_s23  ;;  %v2501_v49 = vpop.permute.xlu0 %2500 }
 0x573   : > { %2088 = vrot.lane.b32.xlu1 %v2042_v2, %s6563_s23  ;;  %v1480_v2 = vmul.f32 %v10439_v19, %v8337_v58 }
 0x575   : > { %v8464_v59 = vpop.trf.xlu1 }
 0x576   : > { %10436 = vst [vmem:[#allocation24_spill] sm:$0xff] %v8464_v59  ;;  %v8468_v21 = vrot.slane %v8464_v59, %v10437_v16 }
 0x577   : > { %2084 = vrot.lane.b32.xlu1 %v2040_v38, %s6563_s23  ;;  %v8485_v38 = vpop.permute.xlu0 %2999 }
 0x578   : > { %v3026_v37 = vadd.f32 %v8468_v21, %v8202_v8  ;;  %10440 = vst [vmem:[#allocation27_spill] sm:$0xff] %v8485_v38  ;;  %v3027_v58 = vadd.f32 %v8468_v21, %v8214_v57 }
 0x57a   : > { %v3042_v41 = vmul.f32 0.01, %v3026_v37 }
 0x57b   : > { %1514 = vrot.lane.b32.xlu1 %v1480_v2, %s6565_s12  ;;  %v8487_v51 = vpop.permute.xlu0 %3473  ;;  %v10442_v2 = vld [vmem:[#allocation21_spill] sm:$0xff] }
 0x57c   : > { %v3058_v32 = vmax.f32 %v3026_v37, %v3042_v41  ;;  %v1481_v37 = vmul.f32 %v10442_v2, %v8370_v54  ;;  %v3043_v41 = vmul.f32 0.01, %v3027_v58  ;;  %v3028_v54 = vadd.f32 %v8468_v21, %v8339_v47  ;;  %v10448_v47 = vld [vmem:[#allocation30_spill] sm:$0xff] }
 0x57e   : > { %v8482_v16 = vadd.f32 %v8478_v42, %v3058_v32  ;;  %v3059_v38 = vmax.f32 %v3027_v58, %v3043_v41  ;;  %v8517_v58 = vunpack.c.l.bf16 %v5397_v30 }
 0x57f   : > { %v8489_v8 = vpop.permute.xlu0 %2515 }
 0x580   : > { %3090 = vmax.xlane.f32.xlu0 %v8482_v16  ;;  %10441 = vst [vmem:[#allocation51_spill] sm:$0xff] %v8489_v8  ;;  %v8503_v10 = vadd.f32 %v8500_v53, %v3059_v38  ;;  %v10447_v53 = vld [vmem:[#allocation35_spill] sm:$0xff] }
 0x583   : > { %v8493_v19 = vpop.permute.xlu0 %3004 }
 0x587   : > { %v8498_v32 = vpop.permute.xlu0 %3009 }
 0x588   : > { %10443 = vst [vmem:[#allocation25_spill] sm:$0xff] %v8498_v32  ;;  %v10446_v32 = vld [vmem:[#allocation17_spill] sm:$0xff] }
 0x589   : > { %v1478_v63 = vmul.f32 %v8351_v26, %v10446_v32  ;;  %v1482_v26 = vmul.f32 %v8368_v29, %v10448_v47  ;;  %v1490_v47 = vmul.f32 %v8398_v5, %v8087_v50  ;;  %v2584_v5 = vmul.f32 %v8235_v44, %v8422_v31 }
 0x58b   : > { %v8505_v8 = vpop.permute.xlu0 %3481 }
 0x58f   : > { %v8508_v57 = vpop.permute.xlu0 %2535 }
 0x590   : > { %10445 = vst [vmem:[#allocation31_spill] sm:$0xff] %v8508_v57  ;;  %v1484_v57 = vmul.f32 %v10447_v53, %v8362_v15  ;;  %v10451_v15 = vld [vmem:[#allocation43_spill] sm:$0xff] }
 0x593   : > { %v8512_v2 = vpop.permute.xlu0 %2525 }
 0x596   : > { %1516 = vrot.lane.b32.xlu0 %v1481_v37, %s6565_s12  ;;  %v3044_v37 = vmul.f32 0.01, %v3028_v54 }
 0x597   : > { %v8520_v41 = vpop.permute.xlu0 %3014 }
 0x598   : > { %v3060_v38 = vmax.f32 %v3028_v54, %v3044_v37  ;;  %v10450_v54 = vld [vmem:[#allocation39_spill] sm:$0xff] }
 0x599   : > { %v1488_v37 = vmul.f32 %v10450_v54, %v8378_v3  ;;  %v10454_v3 = vld [vmem:[#allocation23_spill] sm:$0xff] }
 0x59a   : > { %v8525_v62 = vadd.f32 %v8517_v58, %v3060_v38 }
 0x59b   : > { %v8531_v32 = vpop.permute.xlu0 %3019 }
 0x59c   : > { %10449 = vst [vmem:[#allocation33_spill] sm:$0xff] %v8531_v32 }
 0x59f   : > { %3092 = vmax.xlane.f32.xlu1 %v8503_v10  ;;  %v8537_v53 = vpop.permute.xlu0 %3489 }
 0x5a3   : > { %v8544_v29 = vpop.permute.xlu0 %2555 }
 0x5a4   : > { %10453 = vst [vmem:[#allocation8_spill] sm:$0xff] %v8544_v29 }
 0x5a7   : > { %v8552_v54 = vpop.permute.xlu0 %2545 }
 0x5a8   : > { %10455 = vst [vmem:[#allocation26_spill] sm:$0xff] %v8552_v54  ;;  %v1485_v54 = vmul.f32 %v7995_v13, %v8391_v28  ;;  %v3030_v13 = vadd.f32 %v8468_v21, %v8375_v55 }
 0x5aa   : > { %v3046_v28 = vmul.f32 0.01, %v3030_v13 }
 0x5b0   : > { %1510 = vrot.lane.b32.xlu1 %v1478_v63, %s6565_s12  ;;  %v1486_v63 = vmul.f32 %v8384_v46, %v10451_v15  ;;  %v2580_v46 = vmul.f32 %v8224_v18, %v8408_v20  ;;  %v8561_v15 = vpop.permute.xlu0 %2575 }
 0x5b1   : > { %10456 = vst [vmem:[#allocation21_spill] sm:$0xff] %v8561_v15 }
 0x5b4   : > { %1522 = vrot.lane.b32.xlu1 %v1484_v57, %s6565_s12  ;;  %v10452_v57 = vld [vmem:[#allocation49_spill] sm:$0xff]  ;;  %v8569_v18 = vpop.permute.xlu0 %2565 }
 0x5b5   : > { %3094 = vmax.xlane.f32.xlu0 %v8525_v62  ;;  %v1492_v38 = vmul.f32 %v10452_v57, %v8394_v60  ;;  %v2578_v60 = vmul.f32 %v2501_v49, %v8227_v14  ;;  %10457 = vst [vmem:[#allocation17_spill] sm:$0xff] %v8569_v18 }
 0x5b8   : > { %1518 = vrot.lane.b32.xlu1 %v1482_v26, %s6565_s12  ;;  %v1479_v26 = vmul.f32 %v8349_v43, %v10454_v3  ;;  %v2582_v43 = vmul.f32 %v8430_v4, %v8237_v7  ;;  %v2067_v49 = vpop.permute.xlu0 %2066 }
 0x5bc   : > { %1530 = vrot.lane.b32.xlu1 %v1488_v37, %s6565_s12  ;;  %v8578_v44 = vpop.permute.xlu0 %2062 }
 0x5c0   : > { %1526 = vrot.lane.b32.xlu1 %v1486_v63, %s6565_s12  ;;  %v3029_v63 = vadd.f32 %v8468_v21, %v8358_v56  ;;  %v8586_v4 = vpop.permute.xlu0 %2074 }
 0x5c2   : > { %v3045_v31 = vmul.f32 0.01, %v3029_v63 }
 0x5c4   : > { %1538 = vrot.lane.b32.xlu1 %v1492_v38, %s6565_s12  ;;  %v3061_v3 = vmax.f32 %v3029_v63, %v3045_v31  ;;  %v8605_v31 = vld [vmem:[%s7084_s30 + $0x70] sm:$0xff]  }
 0x5c5   : > { %v8608_v18 = vunpack.c.l.bf16 %v8605_v31 }
 0x5c7   : > { %10458 = vst [vmem:[#allocation35_spill] sm:$0xff] %v8608_v18 }
 0x5c8   : > { %1534 = vrot.lane.b32.xlu1 %v1490_v47, %s6565_s12  ;;  %v8582_v47 = vunpack.c.h.bf16 %v5397_v30  ;;  %v3038_v30 = vadd.f32 %v8468_v21, %v8493_v19 }
 0x5cb   : > { %1512 = vrot.lane.b32.xlu0 %v1479_v26, %s6565_s12  ;;  %v8589_v26 = vadd.f32 %v8582_v47, %v3061_v3 }
 0x5cc   : > { %2614 = vrot.lane.b32.xlu1 %v2580_v46, %s6562_s22  ;;  %v8594_v46 = vpop.permute.xlu0 %2070 }
 0x5ce   : > { %v8559_v37 = vpop.permute.xlu1 %2570 }
 0x5d0   : > { %2610 = vrot.lane.b32.xlu1 %v2578_v60, %s6562_s22  ;;  %v8602_v63 = vpop.permute.xlu0 %2082 }
 0x5d2   : > { %v8566_v50 = vpop.permute.xlu1 %2560 }
 0x5d4   : > { %2622 = vrot.lane.b32.xlu1 %v2584_v5, %s6562_s22  ;;  %v8614_v19 = vpop.permute.xlu0 %2078 }
 0x5d6   : > { %v2065_v20 = vpop.permute.xlu1 %2064 }
 0x5d8   : > { %2618 = vrot.lane.b32.xlu1 %v2582_v43, %s6562_s22  ;;  %v3054_v43 = vmul.f32 0.01, %v3038_v30  ;;  %v8622_v29 = vpop.permute.xlu0 %2090 }
 0x5da   : > { %v2061_v14 = vpop.permute.xlu1 %2060  ;;  %v3070_v15 = vmax.f32 %v3038_v30, %v3054_v43 }
 0x5dc   : > { %v8617_v32 = vadd.f32 %v8608_v18, %v3070_v15  ;;  %v8625_v30 = vpop.permute.xlu0 %2086 }
 0x5de   : > { %v8576_v57 = vpop.permute.xlu1 %2072 }
 0x5e2   : > { %v8580_v38 = vpop.permute.xlu1 %2068 }
 0x5e6   : > { %v8584_v7 = vpop.permute.xlu1 %2080 }
 0x5ea   : > { %v8591_v56 = vpop.permute.xlu1 %2076  ;;  %3096 = vmax.xlane.f32.xlu0 %v8589_v26 }
 0x5ee   : > { %v8596_v60 = vpop.permute.xlu1 %2088 }
 0x5f2   : > { %v8600_v5 = vpop.permute.xlu1 %2084 }
 0x5f6   : > { %v1515_v3 = vpop.permute.xlu1 %1514 }
 0x5f7   : > { %1561 = vst.msk [vmem:[%s7899_s20 + $0x10] sm:$0xff] %vm1558_vm1, %v1515_v3  ;;  %v2586_v3 = vmul.f32 %v8457_v34, %v8265_v52  ;;  %v3040_v34 = vadd.f32 %v8468_v21, %v8520_v41 }
 0x5f8   : > { %2111 = vst.msk [vmem:[%s7899_s20 + $0x10] sm:$0xff] %vm2108_vm2, %v2065_v20  ;;  %v2588_v20 = vmul.f32 %v8260_v61, %v8447_v35  ;;  %v3062_v61 = vmax.f32 %v3030_v13, %v3046_v28  ;;  %v8651_v28 = vld [vmem:[%s7084_s30 + $0x78] sm:$0xff]  }
 0x5f9   : > { %v3056_v18 = vmul.f32 0.01, %v3040_v34 }
 0x5fb   : > { %v3072_v41 = vmax.f32 %v3040_v34, %v3056_v18 }
 0x5fc   : > { %3114 = vmax.xlane.f32.xlu1 %v8617_v32 }
 0x600   : > { %1524 = vrot.lane.b32.xlu0 %v1485_v54, %s6565_s12  ;;  %v5398_v54 = vld [vmem:[%s7084_s30 + $0x50] sm:$0xff]  }
 0x601   : > { %v8640_v35 = vunpack.c.l.bf16 %v5398_v54 }
 0x609   : > { %v3091_v43 = vpop.xlane.xlu0 %3090 }
 0x60a   : > { %v3122_v52 = vsub.f32 %v8482_v16, %v3091_v43  ;;  %v8658_v16 = vunpack.c.l.bf16 %v8651_v28  ;;  %v1483_v43 = vmul.f32 %v8396_v48, %v8006_v36 }
 0x60c   : > { %v3138_v55 = vmul.f32 1.442695, %v3122_v52 }
 0x60d   : > { %2630 = vrot.lane.b32.xlu1 %v2588_v20, %s6562_s22  ;;  %v1517_v15 = vpop.permute.xlu0 %1516  ;;  %v8643_v20 = vadd.f32 %v8640_v35, %v3062_v61  ;;  %v8668_v61 = vadd.f32 %v8658_v16, %v3072_v41 }
 0x60e   : > { %1562 = vst.msk [vmem:[%s7899_s20 + $0x18] sm:$0xff] %vm1558_vm1, %v1517_v15  ;;  %6235 = vpow2.f32 %v3138_v55 }
 0x60f   : > { %2112 = vst.msk [vmem:[%s7899_s20 + $0x18] sm:$0xff] %vm2108_vm2, %v2067_v49 }
 0x611   : > { %2626 = vrot.lane.b32.xlu1 %v2586_v3, %s6562_s22 }
 0x61f   : > { %3098 = vmax.xlane.f32.xlu0 %v8643_v20 }
 0x628   : > { %v3093_v49 = vpop.xlane.xlu1 %3092 }
 0x629   : > { %v3123_v15 = vsub.f32 %v8503_v10, %v3093_v49 }
 0x62b   : > { %v3140_v3 = vmul.f32 1.442695, %v3123_v15  ;;  %v8714_v15 = vunpack.c.h.bf16 %v5398_v54 }
 0x62c   : > { %v1511_v13 = vpop.permute.xlu1 %1510 }
 0x62d   : > { %6237 = vpow2.f32 %v3140_v3  ;;  %1559 = vst.msk [vmem:[%s7899_s20] sm:$0xff] %vm1558_vm1, %v1511_v13 }
 0x62e   : > { %2109 = vst.msk [vmem:[%s7899_s20] sm:$0xff] %vm2108_vm2, %v2061_v14 }
 0x630   : > { %v1523_v10 = vpop.permute.xlu1 %1522 }
 0x631   : > { %1565 = vst.msk [vmem:[%s7899_s20 + $0x30] sm:$0xff] %vm1558_vm1, %v1523_v10 }
 0x632   : > { %2115 = vst.msk [vmem:[%s7899_s20 + $0x30] sm:$0xff] %vm2108_vm2, %v8576_v57  ;;  %v6236_v57 = vpop.eup %6235 }
 0x634   : > { %v1519_v14 = vpop.permute.xlu1 %1518 }
 0x635   : > { %1563 = vst.msk [vmem:[%s7899_s20 + $0x20] sm:$0xff] %vm1558_vm1, %v1519_v14  ;;  %1520 = vrot.lane.b32.xlu0 %v1483_v43, %s6565_s12  ;;  %3118 = vmax.xlane.f32.xlu1 %v8668_v61  ;;  %v1489_v43 = vmul.f32 %v8049_v25, %v8414_v6 }
 0x636   : > { %2113 = vst.msk [vmem:[%s7899_s20 + $0x20] sm:$0xff] %vm2108_vm2, %v8580_v38 }
 0x638   : > { %v1531_v18 = vpop.permute.xlu1 %1530 }
 0x639   : > { %1569 = vst.msk [vmem:[%s7899_s20 + $0x50] sm:$0xff] %vm1558_vm1, %v1531_v18 }
 0x63a   : > { %v6238_v36 = vpop.eup %6237  ;;  %2119 = vst.msk [vmem:[%s7899_s20 + $0x50] sm:$0xff] %vm2108_vm2, %v8584_v7  ;;  %v2592_v7 = vmul.f32 %v8291_v45, %v8559_v37  ;;  %v2590_v45 = vmul.f32 %v8566_v50, %v8296_v1  ;;  %v10459_v50 = vld [vmem:[#allocation6_spill] sm:$0xff] }
 0x63b   : > { %v3170_v48 = vpack.c.bf16 %v6238_v36, %v6236_v57  ;;  %v8726_v13 = vrot.slane %v8464_v59, %v10459_v50 }
 0x63c   : > { %v1527_v52 = vpop.permute.xlu1 %1526 }
 0x63d   : > { %1567 = vst.msk [vmem:[%s7899_s20 + $0x40] sm:$0xff] %vm1558_vm1, %v1527_v52  ;;  %5676 = vmatprep.mubr.bf16.mxu1 %v3170_v48  ;;  %v3496_v54 = vadd.f32 %v8726_v13, %v8208_v24  ;;  %v3499_v10 = vadd.f32 %v8726_v13, %v8364_v39  ;;  %v3501_v57 = vadd.f32 %v8726_v13, %v8386_v9  ;;  %v5399_v9 = vld [vmem:[%s7084_s30 + $0x58] sm:$0xff]  }
 0x63e   : > { %v3095_v34 = vpop.xlane.xlu0 %3094  ;;  %2117 = vst.msk [vmem:[%s7899_s20 + $0x40] sm:$0xff] %vm2108_vm2, %v8591_v56  ;;  %v3031_v56 = vadd.f32 %v8468_v21, %v8380_v23  ;;  %v3503_v52 = vadd.f32 %v8726_v13, %v8410_v40  ;;  %v8751_v40 = vunpack.c.h.bf16 %v5399_v9 }
 0x63f   : > { %v3512_v41 = vmul.f32 0.01, %v3496_v54  ;;  %v3515_v18 = vmul.f32 0.01, %v3499_v10  ;;  %v3517_v24 = vmul.f32 0.01, %v3501_v57  ;;  %v3124_v25 = vsub.f32 %v8525_v62, %v3095_v34 }
 0x640   : > { %v1539_v38 = vpop.permute.xlu1 %1538  ;;  %10460 = vst [vmem:[#allocation30_spill] sm:$0xff] %v8751_v40 }
 0x641   : > { %1573 = vst.msk [vmem:[%s7899_s20 + $0x70] sm:$0xff] %vm1558_vm1, %v1539_v38  ;;  %v3528_v14 = vmax.f32 %v3496_v54, %v3512_v41  ;;  %v3531_v48 = vmax.f32 %v3499_v10, %v3515_v18  ;;  %v3533_v39 = vmax.f32 %v3501_v57, %v3517_v24  ;;  %v3519_v38 = vmul.f32 0.01, %v3503_v52 }
 0x642   : > { %v1513_v55 = vpop.permute.xlu0 %1512  ;;  %2123 = vst.msk [vmem:[%s7899_s20 + $0x70] sm:$0xff] %vm2108_vm2, %v8596_v60  ;;  %v8795_v57 = vunpack.c.h.bf16 %v8605_v31 }
 0x643   : > { %1560 = vst.msk [vmem:[%s7899_s20 + $0x8] sm:$0xff] %vm1558_vm1, %v1513_v55  ;;  %v8738_v36 = vadd.f32 %v8478_v42, %v3528_v14  ;;  %v8745_v6 = vadd.f32 %v8582_v47, %v3531_v48  ;;  %v3505_v55 = vadd.f32 %v8726_v13, %v8442_v11  ;;  %v8757_v34 = vadd.f32 %v8714_v15, %v3533_v39 }
 0x644   : > { %v1535_v49 = vpop.permute.xlu1 %1534  ;;  %2110 = vst.msk [vmem:[%s7899_s20 + $0x8] sm:$0xff] %vm2108_vm2, %v8578_v44  ;;  %v3047_v44 = vmul.f32 0.01, %v3031_v56  ;;  %v3511_v14 = vadd.f32 %v8726_v13, %v8537_v53  ;;  %v8804_v39 = vunpack.c.h.bf16 %v8651_v28 }
 0x645   : > { %1571 = vst.msk [vmem:[%s7899_s20 + $0x60] sm:$0xff] %vm1558_vm1, %v1535_v49  ;;  %v3521_v11 = vmul.f32 0.01, %v3505_v55 }
 0x646   : > { %2638 = vrot.lane.b32.xlu1 %v2592_v7, %s6562_s22  ;;  %2121 = vst.msk [vmem:[%s7899_s20 + $0x60] sm:$0xff] %vm2108_vm2, %v8600_v5  ;;  %v3063_v3 = vmax.f32 %v3031_v56, %v3047_v44  ;;  %v3142_v7 = vmul.f32 1.442695, %v3124_v25  ;;  %v3507_v56 = vadd.f32 %v8726_v13, %v8487_v51  ;;  %v3509_v51 = vadd.f32 %v8726_v13, %v8505_v8 }
 0x647   : > { %v3032_v8 = vadd.f32 %v8468_v21, %v8400_v12  ;;  %v3527_v24 = vmul.f32 0.01, %v3511_v14  ;;  %v8798_v12 = vunpack.c.l.bf16 %v5399_v9 }
 0x648   : > { %v2615_v37 = vpop.permute.xlu1 %2614  ;;  %v8719_v23 = vadd.f32 %v8714_v15, %v3063_v3  ;;  %6239 = vpow2.f32 %v3142_v7  ;;  %v3523_v50 = vmul.f32 0.01, %v3507_v56 }
 0x649   : > { %2661 = vst.msk [vmem:[%s7899_s20 + $0x10] sm:$0xff] %vm2658_vm3, %v2615_v37  ;;  %v8760_v37 = vld [vmem:[%s7084_s30 + $0x60] sm:$0xff]   ;;  %v3048_v18 = vmul.f32 0.01, %v3032_v8 }
 0x64a   : > { %2634 = vrot.lane.b32.xlu1 %v2590_v45, %s6562_s22  ;;  %v3535_v45 = vmax.f32 %v3503_v52, %v3519_v38  ;;  %v8764_v3 = vunpack.c.h.bf16 %v8760_v37  ;;  %v3539_v10 = vmax.f32 %v3507_v56, %v3523_v50  ;;  %v3543_v38 = vmax.f32 %v3511_v14, %v3527_v24 }
 0x64b   : > { %v3064_v52 = vmax.f32 %v3032_v8, %v3048_v18  ;;  %v10470_v8 = vld [vmem:[#allocation55_spill] sm:$0xff]  ;;  %v10472_v18 = vld [vmem:[#allocation57_spill] sm:$0xff]  ;;  %v10473_v24 = vmov 7  }
 0x64c   : > { %v2611_v60 = vpop.permute.xlu1 %2610  ;;  %10461 = vst [vmem:[#allocation39_spill] sm:$0xff] %v8764_v3  ;;  %v8813_v9 = vadd.f32 %v8804_v39, %v3543_v38  ;;  %v10475_v38 = vld [vmem:[#allocation52_spill] sm:$0xff] }
 0x64d   : > { %2659 = vst.msk [vmem:[%s7899_s20] sm:$0xff] %vm2658_vm3, %v2611_v60 }
 0x64e   : > { %10464 = vst [vmem:[#allocation23_spill] sm:$0xff] %v8813_v9 }
 0x650   : > { %v2623_v5 = vpop.permute.xlu1 %2622 }
 0x651   : > { %2665 = vst.msk [vmem:[%s7899_s20 + $0x30] sm:$0xff] %vm2658_vm3, %v2623_v5  ;;  %v3537_v5 = vmax.f32 %v3505_v55, %v3521_v11 }
 0x653   : > { %v8786_v41 = vadd.f32 %v8764_v3, %v3537_v5  ;;  %v10469_v5 = vld [vmem:[#allocation47_spill] sm:$0xff] }
 0x654   : > { %3100 = vmax.xlane.f32.xlu0 %v8719_v23  ;;  %v2619_v1 = vpop.permute.xlu1 %2618 }
 0x655   : > { %2663 = vst.msk [vmem:[%s7899_s20 + $0x20] sm:$0xff] %vm2658_vm3, %v2619_v1  ;;  %v8774_v1 = vld [vmem:[%s7084_s30 + $0x68] sm:$0xff]   ;;  %v6240_v25 = vpop.eup %6239 }
 0x656   : > { %v8781_v54 = vunpack.c.h.bf16 %v8774_v1 }
 0x66a   : > { %1532 = vrot.lane.b32.xlu0 %v1489_v43, %s6565_s12  ;;  %v3525_v43 = vmul.f32 0.01, %v3509_v51 }
 0x66c   : > { %v3541_v48 = vmax.f32 %v3509_v51, %v3525_v43  ;;  %v10471_v43 = vld [vmem:[#allocation50_spill] sm:$0xff] }
 0x66e   : > { %3560 = vmax.xlane.f32.xlu1 %v8738_v36  ;;  %v8801_v53 = vadd.f32 %v8795_v57, %v3541_v48 }
 0x670   : > { %10463 = vst [vmem:[#allocation49_spill] sm:$0xff] %v8801_v53 }
 0x672   : > { %3566 = vmax.xlane.f32.xlu1 %v8745_v6 }
 0x673   : > { %v3097_v49 = vpop.xlane.xlu0 %3096 }
 0x674   : > { %v3125_v62 = vsub.f32 %v8589_v26, %v3097_v49  ;;  %v8771_v26 = vadd.f32 %v8751_v40, %v3535_v45  ;;  %v8810_v49 = vadd.f32 %v8798_v12, %v3064_v52  ;;  %v10465_v45 = vld [vmem:[#allocation58_spill] sm:$0xff] }
 0x676   : > { %v3144_v44 = vmul.f32 1.442695, %v3125_v62  ;;  %3570 = vmax.xlane.f32.xlu1 %v8757_v34  ;;  %v1487_v62 = vmul.f32 %v8418_v22, %v8066_v17  ;;  %v10467_v17 = vld [vmem:[#allocation37_spill] sm:$0xff]  ;;  %v10468_v22 = vld [vmem:[#allocation70_spill] sm:$0xff] }
 0x677   : > { %v1525_v60 = vpop.permute.xlu0 %1524  ;;  %v3033_v51 = vadd.f32 %v8468_v21, %v10468_v22 }
 0x678   : > { %6241 = vpow2.f32 %v3144_v44  ;;  %1566 = vst.msk [vmem:[%s7899_s20 + $0x38] sm:$0xff] %vm1558_vm1, %v1525_v60  ;;  %v10466_v44 = vld [vmem:[#allocation40_spill] sm:$0xff] }
 0x679   : > { %2116 = vst.msk [vmem:[%s7899_s20 + $0x38] sm:$0xff] %vm2108_vm2, %v8586_v4  ;;  %v8792_v4 = vadd.f32 %v8781_v54, %v3539_v10  ;;  %v3049_v50 = vmul.f32 0.01, %v3033_v51 }
 0x67a   : > { %3574 = vmax.xlane.f32.xlu1 %v8771_v26 }
 0x67b   : > { %10462 = vst [vmem:[#allocation43_spill] sm:$0xff] %v8792_v4  ;;  %v3065_v10 = vmax.f32 %v3033_v51, %v3049_v50 }
 0x67d   : > { %v8845_v14 = vadd.f32 %v8751_v40, %v3065_v10  ;;  %v10480_v10 = vld [vmem:[#allocation22_spill] sm:$0xff] }
 0x67e   : > { %3578 = vmax.xlane.f32.xlu1 %v8786_v41 }
 0x682   : > { %3582 = vmax.xlane.f32.xlu1 %v8792_v4 }
 0x685   : > { %v6242_v55 = vpop.eup %6241  ;;  %v8806_v31 = vpop.xlane.xlu1 %3114 }
 0x686   : > { %3586 = vmax.xlane.f32.xlu1 %v8801_v53  ;;  %v3171_v7 = vpack.c.bf16 %v6242_v55, %v6240_v25  ;;  %v10474_v25 = vmov 6   ;;  %v10476_v55 = vld [vmem:[#allocation45_spill] sm:$0xff] }
 0x688   : > { %5677 = vmatmul.mubr.bf16.vlgmr.msra.gmra.mxu1 %v3171_v7  ;;  %v10477_v7 = vld [vmem:[#allocation38_spill] sm:$0xff] }
 0x689   : > { %3102 = vmax.xlane.f32.xlu0 %v8810_v49  ;;  %v2631_v28 = vpop.permute.xlu1 %2630 }
 0x68a   : > { %2669 = vst.msk [vmem:[%s7899_s20 + $0x50] sm:$0xff] %vm2658_vm3, %v2631_v28  ;;  %3590 = vmax.xlane.f32.xlu1 %v8813_v9  ;;  %v10478_v28 = vld [vmem:[#allocation14_spill] sm:$0xff]  ;;  %v10492_v9 = vld [vmem:[#allocation5_spill] sm:$0xff] }
 0x68d   : > { %v2627_v56 = vpop.permute.xlu1 %2626 }
 0x68e   : > { %2667 = vst.msk [vmem:[%s7899_s20 + $0x40] sm:$0xff] %vm2658_vm3, %v2627_v56  ;;  %v1493_v56 = vmul.f32 %v10478_v28, %v10477_v7  ;;  %v10483_v7 = vld [vmem:[#allocation56_spill] sm:$0xff] }
 0x69b   : > { %3658 = vrot.lane.b32.xlu1 %v7959_v0, %s6562_s22 }
 0x69f   : > { %1528 = vrot.lane.b32.xlu0 %v1487_v62, %s6565_s12  ;;  %3660 = vrot.lane.b32.xlu1 %v8154_v33, %s6562_s22  ;;  %v10479_v62 = vld [vmem:[#allocation20_spill] sm:$0xff] }
 0x6a3   : > { %3664 = vrot.lane.b32.xlu1 %v8136_v27, %s6562_s22 }
 0x6a7   : > { %3668 = vrot.lane.b32.xlu1 %v10465_v45, %s6562_s22 }
 0x6a8   : > { %v3099_v11 = vpop.xlane.xlu0 %3098 }
 0x6ab   : > { %3986 = vperm.xlu1 %5945, %v10466_v44  }
 0x6ac   : > { %v1521_v60 = vpop.permute.xlu0 %1520 }
 0x6ad   : > { %1564 = vst.msk [vmem:[%s7899_s20 + $0x28] sm:$0xff] %vm1558_vm1, %v1521_v60  ;;  %v3126_v60 = vsub.f32 %v8643_v20, %v3099_v11  ;;  %v10481_v20 = vld [vmem:[#allocation44_spill] sm:$0xff] }
 0x6ae   : > { %2114 = vst.msk [vmem:[%s7899_s20 + $0x28] sm:$0xff] %vm2108_vm2, %v8594_v46  ;;  %v3034_v11 = vadd.f32 %v8468_v21, %v10481_v20 }
 0x6af   : > { %3994 = vperm.xlu1 %5945, %v10467_v17   ;;  %v3146_v22 = vmul.f32 1.442695, %v3126_v60  ;;  %v10484_v60 = vld [vmem:[#allocation60_spill] sm:$0xff] }
 0x6b1   : > { %6243 = vpow2.f32 %v3146_v22  ;;  %v10485_v22 = vmov 32  }
 0x6b3   : > { %3998 = vperm.xlu1 %5945, %v10469_v5  }
 0x6b7   : > { %4006 = vperm.xlu1 %5945, %v10470_v8  }
 0x6bb   : > { %4014 = vperm.xlu1 %5945, %v10471_v43  }
 0x6be   : > { %3104 = vmax.xlane.f32.xlu0 %v8845_v14  ;;  %v8848_v46 = vpop.xlane.xlu1 %3118 }
 0x6bf   : > { %4022 = vperm.xlu1 %5945, %v10472_v18  }
 0x6c2   : > { %v2639_v48 = vpop.permute.xlu1 %2638 }
 0x6c3   : > { %2673 = vst.msk [vmem:[%s7899_s20 + $0x70] sm:$0xff] %vm2658_vm3, %v2639_v48  ;;  %5947 = vset.pattern.permute.xlu1 %v10473_v24  ;;  %v8884_v48 = vunpack.c.l.bf16 %v8760_v37 }
 0x6c4   : > { %4555 = vperm.xlu1 %5947, %v10470_v8  }
 0x6c6   : > { %v2635_v52 = vpop.permute.xlu1 %2634 }
 0x6c7   : > { %2671 = vst.msk [vmem:[%s7899_s20 + $0x60] sm:$0xff] %vm2658_vm3, %v2635_v52 }
 0x6c8   : > { %5948 = vset.pattern.permute.xlu1 %v10474_v25 }
 0x6c9   : > { %4026 = vperm.xlu1 %5948, %v10475_v38  }
 0x6cd   : > { %5949 = vset.pattern.permute.xlu1 %v10473_v24 }
 0x6ce   : > { %4559 = vperm.xlu1 %5949, %v10476_v55  }
 0x6d2   : > { %4563 = vperm.xlu1 %5949, %v10471_v43  }
 0x6d4   : > { %1540 = vrot.lane.b32.xlu0 %v1493_v56, %s6565_s12 }
 0x6d6   : > { %5950 = vset.pattern.permute.xlu1 %v10474_v25 }
 0x6d7   : > { %4038 = vperm.xlu1 %5950, %v10479_v62  }
 0x6db   : > { %5951 = vset.pattern.permute.xlu1 %v10473_v24 }
 0x6dc   : > { %4571 = vperm.xlu1 %5951, %v10472_v18   ;;  %v10482_v18 = vld [vmem:[#allocation59_spill] sm:$0xff] }
 0x6dd   : > { %v3101_v51 = vpop.xlane.xlu0 %3100 }
 0x6de   : > { %v3127_v50 = vsub.f32 %v8719_v23, %v3101_v51  ;;  %v3050_v23 = vmul.f32 0.01, %v3034_v11 }
 0x6e0   : > { %v3148_v8 = vmul.f32 1.442695, %v3127_v50  ;;  %5952 = vset.pattern.permute.xlu1 %v10474_v25  ;;  %v3066_v52 = vmax.f32 %v3034_v11, %v3050_v23  ;;  %v6244_v25 = vpop.eup %6243 }
 0x6e1   : > { %4042 = vperm.xlu1 %5952, %v10480_v10   ;;  %v1533_v43 = vpop.permute.xlu0 %1532 }
 0x6e2   : > { %6245 = vpow2.f32 %v3148_v8  ;;  %1570 = vst.msk [vmem:[%s7899_s20 + $0x58] sm:$0xff] %vm1558_vm1, %v1533_v43  ;;  %v10486_v8 = vld [vmem:[#allocation15_spill] sm:$0xff]  ;;  %v10487_v43 = vld [vmem:[#allocation29_spill] sm:$0xff] }
 0x6e3   : > { %2120 = vst.msk [vmem:[%s7899_s20 + $0x58] sm:$0xff] %vm2108_vm2, %v8602_v63  ;;  %v8888_v63 = vadd.f32 %v8884_v48, %v3066_v52  ;;  %v1491_v20 = vmul.f32 %v10487_v43, %v10486_v8 }
 0x6e5   : > { %5954 = vset.pattern.permute.xlu1 %v10473_v24 }
 0x6e6   : > { %4575 = vperm.xlu1 %5954, %v10475_v38  }
 0x6ea   : > { %4579 = vperm.xlu1 %5954, %v10482_v18  }
 0x6ee   : > { %4539 = vperm.xlu1 %5954, %v10483_v7  }
 0x6ef   : > { %v6246_v28 = vpop.eup %6245 }
 0x6f0   : > { %v3172_v56 = vpack.c.bf16 %v6246_v28, %v6244_v25 }
 0x6f2   : > { %4583 = vperm.xlu1 %5954, %v10484_v60   ;;  %5680 = vmatprep.mubr.bf16.mxu1 %v3172_v56  ;;  %v10491_v56 = vld [vmem:[#allocation19_spill] sm:$0xff] }
 0x6f3   : > { %3106 = vmax.xlane.f32.xlu0 %v8888_v63  ;;  %v3035_v8 = vadd.f32 %v8468_v21, %v10491_v56 }
 0x6f6   : > { %4543 = vperm.xlu1 %5954, %v10467_v17  }
 0x6f7   : > { %v8893_v38 = vpop.xlane.xlu1 %3560 }
 0x6fa   : > { %4591 = vperm.xlu1 %5954, %v10480_v10  }
 0x6fb   : > { %v8896_v37 = vpop.xlane.xlu1 %3566 }
 0x6fe   : > { %5956 = vset.pattern.permute.xlu1 %v10485_v22 }
 0x6ff   : > { %v8899_v51 = vpop.xlane.xlu1 %3570 }
 0x703   : > { %v8901_v50 = vpop.xlane.xlu1 %3574 }
 0x707   : > { %v8905_v11 = vpop.xlane.xlu1 %3578 }
 0x709   : > { %1536 = vrot.lane.b32.xlu0 %v1491_v20, %s6565_s12  ;;  %v3051_v20 = vmul.f32 0.01, %v3035_v8 }
 0x70b   : > { %v8908_v17 = vpop.xlane.xlu1 %3582  ;;  %v3067_v33 = vmax.f32 %v3035_v8, %v3051_v20 }
 0x70c   : > { %10488 = vst [vmem:[#allocation6_spill] sm:$0xff] %v8908_v17 }
 0x70d   : > { %v8935_v40 = vadd.f32 %v8764_v3, %v3067_v33 }
 0x70f   : > { %v8910_v23 = vpop.xlane.xlu1 %3586 }
 0x710   : > { %10489 = vst [vmem:[#allocation58_spill] sm:$0xff] %v8910_v23 }
 0x712   : > { %v3103_v10 = vpop.xlane.xlu0 %3102 }
 0x713   : > { %v8912_v52 = vpop.xlane.xlu1 %3590 }
 0x714   : > { %10490 = vst [vmem:[#allocation40_spill] sm:$0xff] %v8912_v52  ;;  %v10493_v52 = vsub.s32 2, %v10492_v9 }
 0x716   : > { %v1529_v25 = vpop.permute.xlu0 %1528 }
 0x717   : > { %1568 = vst.msk [vmem:[%s7899_s20 + $0x48] sm:$0xff] %vm1558_vm1, %v1529_v25  ;;  %v8916_v28 = vpop.permute.xlu1 %3658  ;;  %v8932_v25 = vrot.slane %v8464_v59, %v10493_v52 }
 0x718   : > { %2118 = vst.msk [vmem:[%s7899_s20 + $0x48] sm:$0xff] %vm2108_vm2, %v8614_v19 }
 0x71b   : > { %v8923_v43 = vpop.permute.xlu1 %3660 }
 0x71f   : > { %v8925_v0 = vpop.permute.xlu1 %3664 }
 0x723   : > { %v8927_v27 = vpop.permute.xlu1 %3668 }
 0x727   : > { %v3987_v19 = vpop.permute.xlu1 %3986 }
 0x728   : > { %v4053_v53 = vadd.f32 %v8932_v25, %v3987_v19  ;;  %3108 = vmax.xlane.f32.xlu0 %v8935_v40 }
 0x72a   : > { %v4069_v56 = vmul.f32 0.01, %v4053_v53 }
 0x72b   : > { %v3995_v23 = vpop.permute.xlu1 %3994 }
 0x72c   : > { %v4085_v4 = vmax.f32 %v4053_v53, %v4069_v56  ;;  %v4055_v8 = vadd.f32 %v8932_v25, %v3995_v23  ;;  %v10497_v23 = vld [vmem:[#allocation61_spill] sm:$0xff] }
 0x72e   : > { %v4071_v20 = vmul.f32 0.01, %v4055_v8  ;;  %v8941_v17 = vadd.f32 %v8478_v42, %v4085_v4  ;;  %v10496_v4 = vld [vmem:[#allocation51_spill] sm:$0xff] }
 0x72f   : > { %v3999_v9 = vpop.permute.xlu1 %3998  ;;  %v2581_v56 = vmul.f32 %v10497_v23, %v10496_v4 }
 0x730   : > { %v4087_v52 = vmax.f32 %v4055_v8, %v4071_v20  ;;  %v4056_v59 = vadd.f32 %v8932_v25, %v3999_v9  ;;  %4117 = vmax.xlane.f32.xlu1 %v8941_v17  ;;  %v3128_v9 = vsub.f32 %v8810_v49, %v3103_v10  ;;  %v8968_v10 = vunpack.c.l.bf16 %v8774_v1  ;;  %v10500_v1 = vld [vmem:[#allocation54_spill] sm:$0xff] }
 0x732   : > { %v4072_v33 = vmul.f32 0.01, %v4056_v59  ;;  %v8946_v19 = vadd.f32 %v8517_v58, %v4087_v52  ;;  %v3150_v8 = vmul.f32 1.442695, %v3128_v9 }
 0x734   : > { %10494 = vst [vmem:[#allocation37_spill] sm:$0xff] %v8946_v19  ;;  %v4088_v3 = vmax.f32 %v4056_v59, %v4072_v33  ;;  %4121 = vmax.xlane.f32.xlu1 %v8946_v19  ;;  %6247 = vpow2.f32 %v3150_v8  ;;  %v10498_v33 = vld [vmem:[#allocation13_spill] sm:$0xff]  ;;  %v10524_v19 = vld [vmem:[#allocation12_spill] sm:$0xff] }
 0x735   : > { %v3036_v4 = vadd.f32 %v8468_v21, %v10498_v33  ;;  %v10501_v33 = vld [vmem:[#allocation71_spill] sm:$0xff] }
 0x736   : > { %v8950_v53 = vadd.f32 %v8582_v47, %v4088_v3 }
 0x737   : > { %v3052_v49 = vmul.f32 0.01, %v3036_v4 }
 0x738   : > { %10495 = vst [vmem:[#allocation70_spill] sm:$0xff] %v8950_v53  ;;  %4123 = vmax.xlane.f32.xlu1 %v8950_v53 }
 0x73e   : > { %2616 = vrot.lane.b32.xlu0 %v2581_v56, %s6562_s22 }
 0x741   : > { %v6248_v23 = vpop.eup %6247 }
 0x747   : > { %v3105_v20 = vpop.xlane.xlu0 %3104 }
 0x748   : > { %v3129_v52 = vsub.f32 %v8845_v14, %v3105_v20  ;;  %v3068_v14 = vmax.f32 %v3036_v4, %v3052_v49  ;;  %v4007_v20 = vpop.permute.xlu1 %4006  ;;  %v2579_v4 = vmul.f32 %v10501_v33, %v10500_v1  ;;  %v10505_v33 = vld [vmem:[#allocation11_spill] sm:$0xff] }
 0x749   : > { %4217 = vrot.lane.b32.xlu1 %v10465_v45, %s6563_s23 }
 0x74a   : > { %v3152_v59 = vmul.f32 1.442695, %v3129_v52  ;;  %v3084_v8 = vadd.f32 %v8968_v10, %v3068_v14  ;;  %v10502_v14 = vld [vmem:[#allocation27_spill] sm:$0xff] }
 0x74b   : > { %v1541_v3 = vpop.permute.xlu0 %1540 }
 0x74c   : > { %6249 = vpow2.f32 %v3152_v59  ;;  %1574 = vst.msk [vmem:[%s7899_s20 + $0x78] sm:$0xff] %vm1558_vm1, %v1541_v3 }
 0x74d   : > { %2124 = vst.msk [vmem:[%s7899_s20 + $0x78] sm:$0xff] %vm2108_vm2, %v8622_v29  ;;  %v4058_v29 = vadd.f32 %v8932_v25, %v4007_v20 }
 0x74f   : > { %v4074_v52 = vmul.f32 0.01, %v4058_v29 }
 0x751   : > { %v4090_v59 = vmax.f32 %v4058_v29, %v4074_v52  ;;  %v10503_v52 = vld [vmem:[#allocation31_spill] sm:$0xff] }
 0x753   : > { %v8973_v3 = vadd.f32 %v8714_v15, %v4090_v59  ;;  %v10504_v59 = vld [vmem:[#allocation62_spill] sm:$0xff] }
 0x754   : > { %v2585_v1 = vmul.f32 %v10504_v59, %v10503_v52 }
 0x755   : > { %10499 = vst [vmem:[#allocation47_spill] sm:$0xff] %v8973_v3 }
 0x759   : > { %v6250_v56 = vpop.eup %6249 }
 0x75a   : > { %v3173_v9 = vpack.c.bf16 %v6250_v56, %v6248_v23  ;;  %v3037_v56 = vadd.f32 %v8468_v21, %v10502_v14 }
 0x75c   : > { %5681 = vmatmul.mubr.bf16.gmra.mxu1 %v3173_v9  ;;  %v3053_v9 = vmul.f32 0.01, %v3037_v56 }
 0x75d   : > { %3110 = vmax.xlane.f32.xlu0 %v3084_v8 }
 0x75e   : > { %v3069_v20 = vmax.f32 %v3037_v56, %v3053_v9 }
 0x760   : > { %v3085_v29 = vadd.f32 %v8781_v54, %v3069_v20  ;;  %v10506_v20 = vld [vmem:[#allocation25_spill] sm:$0xff] }
 0x761   : > { %v3039_v52 = vadd.f32 %v8468_v21, %v10506_v20  ;;  %v10511_v20 = vld [vmem:[#allocation33_spill] sm:$0xff] }
 0x763   : > { %v3055_v59 = vmul.f32 0.01, %v3039_v52 }
 0x76d   : > { %4127 = vmax.xlane.f32.xlu1 %v8973_v3 }
 0x773   : > { %2612 = vrot.lane.b32.xlu0 %v2579_v4, %s6562_s22  ;;  %v2583_v4 = vmul.f32 %v8512_v2, %v10505_v33 }
 0x77c   : > { %v3107_v49 = vpop.xlane.xlu0 %3106 }
 0x780   : > { %v1537_v23 = vpop.permute.xlu0 %1536 }
 0x781   : > { %1572 = vst.msk [vmem:[%s7899_s20 + $0x68] sm:$0xff] %vm1558_vm1, %v1537_v23 }
 0x782   : > { %2122 = vst.msk [vmem:[%s7899_s20 + $0x68] sm:$0xff] %vm2108_vm2, %v8625_v30  ;;  %v3130_v30 = vsub.f32 %v8888_v63, %v3107_v49 }
 0x784   : > { %v3154_v23 = vmul.f32 1.442695, %v3130_v30  ;;  %v10509_v30 = vld [vmem:[#allocation16_spill] sm:$0xff] }
 0x786   : > { %6251 = vpow2.f32 %v3154_v23  ;;  %v10510_v23 = vld [vmem:[#allocation26_spill] sm:$0xff] }
 0x792   : > { %3112 = vmax.xlane.f32.xlu0 %v3085_v29 }
 0x793   : > { %v6252_v2 = vpop.eup %6251 }
 0x7a8   : > { %2624 = vrot.lane.b32.xlu0 %v2585_v1, %s6562_s22 }
 0x7ac   : > { %2620 = vrot.lane.b32.xlu0 %v2583_v4, %s6562_s22  ;;  %v3071_v4 = vmax.f32 %v3039_v52, %v3055_v59  ;;  %v3041_v52 = vadd.f32 %v8468_v21, %v10511_v20 }
 0x7ae   : > { %v9000_v63 = vadd.f32 %v8795_v57, %v3071_v4  ;;  %v3057_v59 = vmul.f32 0.01, %v3041_v52  ;;  %v10512_v4 = vld [vmem:[#allocation21_spill] sm:$0xff] }
 0x7b1   : > { %v3109_v14 = vpop.xlane.xlu0 %3108 }
 0x7b2   : > { %v3131_v3 = vsub.f32 %v8935_v40, %v3109_v14  ;;  %v10507_v40 = vld [vmem:[#allocation8_spill] sm:$0xff]  ;;  %v2587_v14 = vmul.f32 %v10510_v23, %v10509_v30  ;;  %v10514_v23 = vld [vmem:[#allocation63_spill] sm:$0xff] }
 0x7b4   : > { %v3156_v56 = vmul.f32 1.442695, %v3131_v3  ;;  %v10508_v3 = vld [vmem:[#allocation18_spill] sm:$0xff] }
 0x7b5   : > { %v2617_v9 = vpop.permute.xlu0 %2616  ;;  %v2589_v49 = vmul.f32 %v10508_v3, %v10507_v40  ;;  %v10513_v40 = vld [vmem:[#allocation7_spill] sm:$0xff] }
 0x7b6   : > { %6253 = vpow2.f32 %v3156_v56  ;;  %2662 = vst.msk [vmem:[%s7899_s20 + $0x18] sm:$0xff] %vm2658_vm3, %v2617_v9  ;;  %v2593_v3 = vmul.f32 %v10513_v40, %v10512_v4 }
 0x7c3   : > { %v6254_v1 = vpop.eup %6253 }
 0x7c4   : > { %v3174_v33 = vpack.c.bf16 %v6254_v1, %v6252_v2  ;;  %v3073_v2 = vmax.f32 %v3041_v52, %v3057_v59 }
 0x7c6   : > { %5684 = vmatprep.mubr.bf16.mxu1 %v3174_v33  ;;  %v9014_v1 = vadd.f32 %v8804_v39, %v3073_v2 }
 0x7cb   : > { %3116 = vmax.xlane.f32.xlu0 %v9000_v63 }
 0x7e1   : > { %2632 = vrot.lane.b32.xlu0 %v2589_v49, %s6562_s22 }
 0x7e5   : > { %2628 = vrot.lane.b32.xlu0 %v2587_v14, %s6562_s22  ;;  %v10515_v14 = vld [vmem:[#allocation17_spill] sm:$0xff] }
 0x7e6   : > { %v3111_v56 = vpop.xlane.xlu0 %3110  ;;  %v2591_v21 = vmul.f32 %v10515_v14, %v10514_v23  ;;  %v10518_v23 = vld [vmem:[#allocation66_spill] sm:$0xff] }
 0x7e7   : > { %v3132_v33 = vsub.f32 %v3084_v8, %v3111_v56  ;;  %v3500_v14 = vadd.f32 %v8726_v13, %v10518_v23 }
 0x7e9   : > { %v3158_v49 = vmul.f32 1.442695, %v3132_v33  ;;  %v10516_v33 = vld [vmem:[#allocation64_spill] sm:$0xff] }
 0x7ea   : > { %v2613_v9 = vpop.permute.xlu0 %2612  ;;  %v3497_v4 = vadd.f32 %v8726_v13, %v10516_v33 }
 0x7eb   : > { %2660 = vst.msk [vmem:[%s7899_s20 + $0x8] sm:$0xff] %vm2658_vm3, %v2613_v9  ;;  %6255 = vpow2.f32 %v3158_v49 }
 0x7ec   : > { %v3513_v40 = vmul.f32 0.01, %v3497_v4 }
 0x7f8   : > { %v6256_v56 = vpop.eup %6255 }
 0x804   : > { %3120 = vmax.xlane.f32.xlu0 %v9014_v1 }
 0x81a   : > { %2640 = vrot.lane.b32.xlu0 %v2593_v3, %s6562_s22 }
 0x81b   : > { %v3113_v30 = vpop.xlane.xlu0 %3112 }
 0x81c   : > { %v3133_v9 = vsub.f32 %v3085_v29, %v3113_v30  ;;  %v10517_v29 = vld [vmem:[#allocation65_spill] sm:$0xff]  ;;  %v3529_v30 = vmax.f32 %v3497_v4, %v3513_v40  ;;  %v10521_v4 = vld [vmem:[#allocation68_spill] sm:$0xff] }
 0x81d   : > { %v3498_v3 = vadd.f32 %v8726_v13, %v10517_v29  ;;  %v3504_v40 = vadd.f32 %v8726_v13, %v10521_v4 }
 0x81e   : > { %v3160_v20 = vmul.f32 1.442695, %v3133_v9  ;;  %2636 = vrot.lane.b32.xlu0 %v2591_v21, %s6562_s22  ;;  %v10519_v21 = vld [vmem:[#allocation28_spill] sm:$0xff] }
 0x81f   : > { %v2625_v52 = vpop.permute.xlu0 %2624  ;;  %v3514_v49 = vmul.f32 0.01, %v3498_v3  ;;  %v9034_v9 = vadd.f32 %v10519_v21, %v3529_v30  ;;  %v3520_v30 = vmul.f32 0.01, %v3504_v40 }
 0x820   : > { %6257 = vpow2.f32 %v3160_v20  ;;  %2666 = vst.msk [vmem:[%s7899_s20 + $0x38] sm:$0xff] %vm2658_vm3, %v2625_v52  ;;  %v3516_v52 = vmul.f32 0.01, %v3500_v14 }
 0x821   : > { %v3530_v20 = vmax.f32 %v3498_v3, %v3514_v49  ;;  %v10522_v49 = vld [vmem:[#allocation69_spill] sm:$0xff] }
 0x822   : > { %v3506_v23 = vadd.f32 %v8726_v13, %v10522_v49  ;;  %v3510_v49 = vadd.f32 %v8726_v13, %v10524_v19 }
 0x823   : > { %v2621_v8 = vpop.permute.xlu0 %2620 }
 0x824   : > { %2664 = vst.msk [vmem:[%s7899_s20 + $0x28] sm:$0xff] %vm2658_vm3, %v2621_v8  ;;  %v10520_v8 = vld [vmem:[#allocation67_spill] sm:$0xff] }
 0x82d   : > { %v6258_v59 = vpop.eup %6257 }
 0x82e   : > { %v3175_v2 = vpack.c.bf16 %v6258_v59, %v6256_v56  ;;  %v3502_v56 = vadd.f32 %v8726_v13, %v10520_v8  ;;  %v9040_v59 = vadd.f32 %v8517_v58, %v3530_v20  ;;  %v10523_v8 = vld [vmem:[#allocation72_spill] sm:$0xff] }
 0x82f   : > { %v3508_v4 = vadd.f32 %v8726_v13, %v10523_v8  ;;  %v3134_v8 = vsub.f32 %v8617_v32, %v8806_v31 }
 0x830   : > { %5685 = vmatmul.mubr.bf16.gmra.mxu1 %v3175_v2  ;;  %v3532_v2 = vmax.f32 %v3500_v14, %v3516_v52  ;;  %v3518_v33 = vmul.f32 0.01, %v3502_v56  ;;  %v3536_v14 = vmax.f32 %v3504_v40, %v3520_v30  ;;  %v3522_v52 = vmul.f32 0.01, %v3506_v23 }
 0x831   : > { %v3526_v30 = vmul.f32 0.01, %v3510_v49  ;;  %v3162_v53 = vmul.f32 1.442695, %v3134_v8  ;;  %v10529_v8 = vld [vmem:[#allocation41_spill] sm:$0xff] }
 0x832   : > { %v9046_v29 = vadd.f32 %v8640_v35, %v3532_v2  ;;  %v3534_v3 = vmax.f32 %v3502_v56, %v3518_v33  ;;  %v9058_v2 = vadd.f32 %v8884_v48, %v3536_v14  ;;  %v3538_v56 = vmax.f32 %v3506_v23, %v3522_v52  ;;  %v10525_v14 = vld [vmem:[#allocation35_spill] sm:$0xff] }
 0x833   : > { %v3524_v33 = vmul.f32 0.01, %v3508_v4  ;;  %v3542_v52 = vmax.f32 %v3510_v49, %v3526_v30  ;;  %6259 = vpow2.f32 %v3162_v53  ;;  %v10527_v30 = vld [vmem:[#allocation48_spill] sm:$0xff]  ;;  %v10528_v53 = vld [vmem:[#allocation42_spill] sm:$0xff] }
 0x834   : > { %v9052_v20 = vadd.f32 %v8798_v12, %v3534_v3  ;;  %v9064_v3 = vadd.f32 %v8968_v10, %v3538_v56 }
 0x835   : > { %v3540_v40 = vmax.f32 %v3508_v4, %v3524_v33  ;;  %v9075_v4 = vadd.f32 %v8658_v16, %v3542_v52  ;;  %v10530_v52 = vld [vmem:[#allocation32_spill] sm:$0xff] }
 0x837   : > { %v9070_v23 = vadd.f32 %v10525_v14, %v3540_v40 }
 0x83d   : > { %3562 = vmax.xlane.f32.xlu0 %v9034_v9 }
 0x840   : > { %v6260_v31 = vpop.eup %6259 }
 0x841   : > { %3564 = vmax.xlane.f32.xlu0 %v9040_v59 }
 0x845   : > { %3568 = vmax.xlane.f32.xlu0 %v9046_v29 }
 0x849   : > { %3572 = vmax.xlane.f32.xlu0 %v9052_v20 }
 0x84d   : > { %3576 = vmax.xlane.f32.xlu0 %v9058_v2 }
 0x851   : > { %3580 = vmax.xlane.f32.xlu0 %v9064_v3 }
 0x854   : > { %v3117_v13 = vpop.xlane.xlu0 %3116 }
 0x855   : > { %v3135_v19 = vsub.f32 %v9000_v63, %v3117_v13  ;;  %3584 = vmax.xlane.f32.xlu0 %v9070_v23  ;;  %v10526_v63 = vld [vmem:[#allocation36_spill] sm:$0xff]  ;;  %v3136_v13 = vsub.f32 %v8668_v61, %v8848_v46  ;;  %v10532_v61 = vld [vmem:[#allocation9_spill] sm:$0xff] }
 0x857   : > { %v3164_v56 = vmul.f32 1.442695, %v3135_v19  ;;  %v10531_v19 = vld [vmem:[#allocation53_spill] sm:$0xff] }
 0x858   : > { %v2633_v33 = vpop.permute.xlu0 %2632 }
 0x859   : > { %6261 = vpow2.f32 %v3164_v56  ;;  %2670 = vst.msk [vmem:[%s7899_s20 + $0x58] sm:$0xff] %vm2658_vm3, %v2633_v33  ;;  %3588 = vmax.xlane.f32.xlu0 %v9075_v4  ;;  %v3166_v56 = vmul.f32 1.442695, %v3136_v13 }
 0x85b   : > { %6263 = vpow2.f32 %v3166_v56 }
 0x85c   : > { %v2629_v32 = vpop.permute.xlu0 %2628 }
 0x85d   : > { %2668 = vst.msk [vmem:[%s7899_s20 + $0x48] sm:$0xff] %vm2658_vm3, %v2629_v32 }
 0x866   : > { %v6262_v49 = vpop.eup %6261 }
 0x867   : > { %v3176_v40 = vpack.c.bf16 %v6262_v49, %v6260_v31 }
 0x868   : > { %v6264_v46 = vpop.eup %6263 }
 0x869   : > { %5688 = vmatprep.mubr.bf16.mxu1 %v3176_v40 }
 0x86f   : > { %3656 = vrot.lane.b32.xlu0 %v10526_v63, %s6562_s22 }
 0x873   : > { %3662 = vrot.lane.b32.xlu0 %v10527_v30, %s6562_s22 }
 0x877   : > { %3666 = vrot.lane.b32.xlu0 %v10528_v53, %s6562_s22 }
 0x87b   : > { %3670 = vrot.lane.b32.xlu0 %v10529_v8, %s6562_s22 }
 0x87f   : > { %3990 = vperm.xlu0 %5946, %v10483_v7  }
 0x883   : > { %4002 = vperm.xlu0 %5946, %v10530_v52  }
 0x887   : > { %4010 = vperm.xlu0 %5946, %v10476_v55  }
 0x88b   : > { %4018 = vperm.xlu0 %5946, %v10531_v19  }
 0x88d   : > { %v3121_v33 = vpop.xlane.xlu0 %3120 }
 0x88e   : > { %v3137_v32 = vsub.f32 %v9014_v1, %v3121_v33 }
 0x88f   : > { %4030 = vperm.xlu0 %5946, %v10482_v18  }
 0x890   : > { %v3168_v31 = vmul.f32 1.442695, %v3137_v32 }
 0x891   : > { %v2641_v49 = vpop.permute.xlu0 %2640 }
 0x892   : > { %6265 = vpow2.f32 %v3168_v31  ;;  %2674 = vst.msk [vmem:[%s7899_s20 + $0x78] sm:$0xff] %vm2658_vm3, %v2641_v49 }
 0x893   : > { %4034 = vperm.xlu0 %5946, %v10484_v60  }
 0x895   : > { %v2637_v55 = vpop.permute.xlu0 %2636 }
 0x896   : > { %2672 = vst.msk [vmem:[%s7899_s20 + $0x68] sm:$0xff] %vm2658_vm3, %v2637_v55 }
 0x897   : > { %4046 = vperm.xlu0 %5946, %v10532_v61  }
 0x89b   : > { %5953 = vset.pattern.permute.xlu0 %v10473_v24  ;;  %v3592_v24 = vsub.f32 %v8738_v36, %v8893_v38 }
 0x89c   : > { %4551 = vperm.xlu0 %5953, %v10530_v52  }
 0x89d   : > { %v3608_v60 = vmul.f32 1.442695, %v3592_v24 }
 0x89f   : > { %v6266_v7 = vpop.eup %6265  ;;  %6267 = vpow2.f32 %v3608_v60 }
 0x8a0   : > { %4567 = vperm.xlu0 %5953, %v10531_v19   ;;  %v3177_v18 = vpack.c.bf16 %v6266_v7, %v6264_v46  ;;  %v3595_v46 = vsub.f32 %v8745_v6, %v8896_v37  ;;  %v3685_v6 = vsel %vm321_vm0, %v8925_v0, 1065369472  ;;  %v4015_v37 = vpop.permute.xlu1 %4014 }
 0x8a2   : > { %5689 = vmatmul.mubr.bf16.gmra.mxu1 %v3177_v18 }
 0x8a4   : > { %4535 = vperm.xlu0 %5953, %v10466_v44  }
 0x8a8   : > { %4587 = vperm.xlu0 %5953, %v10479_v62  }
 0x8ac   : > { %4547 = vperm.xlu0 %5953, %v10469_v5   ;;  %v6268_v56 = vpop.eup %6267 }
 0x8b0   : > { %4595 = vperm.xlu0 %5953, %v10532_v61   ;;  %v3691_v61 = vsel %vm321_vm0, %v8927_v27, 1065369472 }
 0x8b4   : > { %5955 = vset.pattern.permute.xlu0 %v10485_v22 }
 0x8c6   : > { %v3563_v1 = vpop.xlane.xlu0 %3562 }
 0x8c7   : > { %v3593_v40 = vsub.f32 %v9034_v9, %v3563_v1 }
 0x8c9   : > { %v3610_v52 = vmul.f32 1.442695, %v3593_v40  ;;  %v3597_v40 = vsub.f32 %v8757_v34, %v8899_v51 }
 0x8ca   : > { %v3565_v13 = vpop.xlane.xlu0 %3564 }
 0x8cb   : > { %6269 = vpow2.f32 %v3610_v52  ;;  %v3594_v18 = vsub.f32 %v9040_v59, %v3565_v13  ;;  %v3614_v52 = vmul.f32 1.442695, %v3595_v46 }
 0x8cd   : > { %6271 = vpow2.f32 %v3614_v52 }
 0x8ce   : > { %v3569_v44 = vpop.xlane.xlu0 %3568 }
 0x8cf   : > { %v3596_v60 = vsub.f32 %v9046_v29, %v3569_v44  ;;  %v4060_v29 = vadd.f32 %v8932_v25, %v4015_v37 }
 0x8d1   : > { %v3616_v59 = vmul.f32 1.442695, %v3596_v60  ;;  %v10534_v60 = vld [vmem:[#allocation43_spill] sm:$0xff] }
 0x8d2   : > { %v3573_v19 = vpop.xlane.xlu0 %3572 }
 0x8d3   : > { %v3598_v0 = vsub.f32 %v9052_v20, %v3573_v19  ;;  %v3679_v20 = vsel %vm321_vm0, %v8923_v43, 1065369472  ;;  %v10533_v43 = vld [vmem:[#allocation6_spill] sm:$0xff] }
 0x8d5   : > { %v3620_v19 = vmul.f32 1.442695, %v3598_v0  ;;  %v10538_v0 = vld [vmem:[#allocation40_spill] sm:$0xff] }
 0x8d6   : > { %v3577_v62 = vpop.xlane.xlu0 %3576 }
 0x8d8   : > { %v6270_v5 = vpop.eup %6269 }
 0x8d9   : > { %v3640_v33 = vpack.c.bf16 %v6270_v5, %v6268_v56  ;;  %v3612_v56 = vmul.f32 1.442695, %v3594_v18 }
 0x8da   : > { %v9115_v32 = vpop.xlane.xlu0 %3580 }
 0x8db   : > { %5708 = vmatprep.mubr.bf16.mxu1 %v3640_v33  ;;  %v3618_v33 = vmul.f32 1.442695, %v3597_v40  ;;  %6273 = vpow2.f32 %v3612_v56  ;;  %v10536_v40 = vld [vmem:[#allocation49_spill] sm:$0xff] }
 0x8dc   : > { %6275 = vpow2.f32 %v3616_v59 }
 0x8dd   : > { %6277 = vpow2.f32 %v3618_v33 }
 0x8de   : > { %v9117_v22 = vpop.xlane.xlu0 %3584  ;;  %6279 = vpow2.f32 %v3620_v19 }
 0x8e2   : > { %v9119_v36 = vpop.xlane.xlu0 %3588 }
 0x8e6   : > { %v9121_v38 = vpop.permute.xlu0 %3656 }
 0x8ea   : > { %v3663_v9 = vpop.permute.xlu0 %3662 }
 0x8eb   : > { %v3682_v34 = vsel %vm321_vm0, %v3663_v9, 1065369472  ;;  %v3601_v9 = vsub.f32 %v8786_v41, %v8905_v11  ;;  %v3602_v41 = vsub.f32 %v9064_v3, %v9115_v32  ;;  %v3604_v11 = vsub.f32 %v9070_v23, %v9117_v22  ;;  %v10537_v3 = vld [vmem:[#allocation30_spill] sm:$0xff] }
 0x8ed   : > { %v3626_v18 = vmul.f32 1.442695, %v3601_v9  ;;  %v3628_v37 = vmul.f32 1.442695, %v3602_v41  ;;  %v3632_v22 = vmul.f32 1.442695, %v3604_v11 }
 0x8ee   : > { %v3667_v31 = vpop.permute.xlu0 %3666 }
 0x8ef   : > { %v3688_v7 = vsel %vm321_vm0, %v3667_v31, 1065369472  ;;  %v3600_v31 = vsub.f32 %v9058_v2, %v3577_v62 }
 0x8f1   : > { %v3624_v2 = vmul.f32 1.442695, %v3600_v31 }
 0x8f2   : > { %v3671_v49 = vpop.permute.xlu0 %3670 }
 0x8f3   : > { %v3694_v55 = vsel %vm321_vm0, %v3671_v49, 1065369472  ;;  %6281 = vpow2.f32 %v3624_v2 }
 0x8f4   : > { %5692 = vmatprep.subr.bf16.mxu1 %v3694_v55 }
 0x8f5   : > { %5693 = vmatpush3.bf16.msra.mxu1 %v3694_v55  ;;  %v3599_v55 = vsub.f32 %v8771_v26, %v8901_v50  ;;  %v3676_v26 = vsel %vm321_vm0, %v8916_v28, 1065369472  ;;  %v10535_v28 = vld [vmem:[#allocation58_spill] sm:$0xff] }
 0x8f6   : > { %5694 = vmatprep.subr.bf16.mxu1 %v3691_v61  ;;  %v3605_v52 = vsub.f32 %v10536_v40, %v10535_v28 }
 0x8f8   : > { %v3634_v33 = vmul.f32 1.442695, %v3605_v52  ;;  %v4023_v52 = vpop.permute.xlu1 %4022 }
 0x8f9   : > { %5695 = vmatpush3.bf16.msra.mxu1 %v3691_v61  ;;  %v4076_v61 = vmul.f32 0.01, %v4060_v29 }
 0x8fa   : > { %5696 = vmatprep.subr.bf16.mxu1 %v3688_v7  ;;  %v3991_v24 = vpop.permute.xlu0 %3990 }
 0x8fb   : > { %v4054_v1 = vadd.f32 %v8932_v25, %v3991_v24  ;;  %v4092_v24 = vmax.f32 %v4060_v29, %v4076_v61  ;;  %v3606_v29 = vsub.f32 %v9075_v4, %v9119_v36 }
 0x8fd   : > { %v4070_v27 = vmul.f32 0.01, %v4054_v1  ;;  %5697 = vmatpush3.bf16.msra.mxu1 %v3688_v7  ;;  %v3622_v7 = vmul.f32 1.442695, %v3599_v55  ;;  %v9170_v32 = vadd.f32 %v10537_v3, %v4092_v24 }
 0x8fe   : > { %5698 = vmatprep.subr.bf16.mxu1 %v3685_v6  ;;  %v9136_v5 = vpop.permute.xlu0 %4002 }
 0x8ff   : > { %v4086_v13 = vmax.f32 %v4054_v1, %v4070_v27  ;;  %6283 = vpow2.f32 %v3622_v7  ;;  %v3603_v1 = vsub.f32 %v10534_v60, %v10533_v43  ;;  %v3673_v27 = vsel %vm321_vm0, %v9121_v38, 1065369472  ;;  %v10540_v7 = vld [vmem:[#allocation46_spill] sm:$0xff] }
 0x900   : > { %6285 = vpow2.f32 %v3626_v18 }
 0x901   : > { %5699 = vmatpush3.bf16.msra.mxu1 %v3685_v6  ;;  %v9141_v51 = vadd.f32 %v10519_v21, %v4086_v13  ;;  %v6272_v6 = vpop.eup %6271  ;;  %v3630_v59 = vmul.f32 1.442695, %v3603_v1  ;;  %6287 = vpow2.f32 %v3628_v37  ;;  %v4057_v1 = vadd.f32 %v8932_v25, %v9136_v5  ;;  %v9189_v37 = vpop.permute.xlu1 %4555  ;;  %v10543_v5 = vld [vmem:[#allocation24_spill] sm:$0xff] }
 0x902   : > { %5700 = vmatprep.subr.bf16.mxu1 %v3682_v34  ;;  %v4011_v44 = vpop.permute.xlu0 %4010  ;;  %v6274_v23 = vpop.eup %6273  ;;  %6289 = vpow2.f32 %v3632_v22  ;;  %v4062_v22 = vadd.f32 %v8932_v25, %v4023_v52 }
 0x903   : > { %v4059_v49 = vadd.f32 %v8932_v25, %v4011_v44  ;;  %4119 = vmax.xlane.f32.xlu0 %v9141_v51  ;;  %v6276_v56 = vpop.eup %6275  ;;  %v3641_v38 = vpack.c.bf16 %v6272_v6, %v6274_v23  ;;  %6291 = vpow2.f32 %v3630_v59  ;;  %v10539_v44 = vld [vmem:[#allocation23_spill] sm:$0xff] }
 0x904   : > { %v6278_v13 = vpop.eup %6277  ;;  %v3607_v31 = vsub.f32 %v10539_v44, %v10538_v0  ;;  %6293 = vpow2.f32 %v3634_v33 }
 0x905   : > { %v4075_v46 = vmul.f32 0.01, %v4059_v49  ;;  %5701 = vmatpush3.bf16.msra.mxu1 %v3682_v34  ;;  %v3642_v34 = vpack.c.bf16 %v6278_v13, %v6276_v56  ;;  %v6280_v55 = vpop.eup %6279  ;;  %v10541_v13 = vld [vmem:[#allocation5_spill] sm:$0xff] }
 0x906   : > { %5702 = vmatprep.subr.bf16.mxu1 %v3679_v20  ;;  %v6282_v9 = vpop.eup %6281  ;;  %v3638_v61 = vmul.f32 1.442695, %v3607_v31  ;;  %v4019_v2 = vpop.permute.xlu0 %4018  ;;  %v10542_v33 = vsub.s32 3, %v10541_v13 }
 0x907   : > { %v4091_v62 = vmax.f32 %v4059_v49, %v4075_v46  ;;  %v3636_v49 = vmul.f32 1.442695, %v3606_v29 }
 0x908   : > { %v9198_v29 = vrot.slane %v10543_v5, %v10542_v33 }
 0x909   : > { %5703 = vmatpush3.bf16.msra.mxu1 %v3679_v20  ;;  %v9156_v50 = vadd.f32 %v8798_v12, %v4091_v62  ;;  %6295 = vpow2.f32 %v3636_v49 }
 0x90a   : > { %5704 = vmatprep.subr.bf16.mxu1 %v3676_v26  ;;  %6297 = vpow2.f32 %v3638_v61  ;;  %v9181_v11 = vpop.permute.xlu0 %4030 }
 0x90b   : > { %4129 = vmax.xlane.f32.xlu1 %v9156_v50 }
 0x90c   : > { %v6284_v46 = vpop.eup %6283 }
 0x90d   : > { %5705 = vmatpush3.bf16.msra.mxu1 %v3676_v26  ;;  %v6286_v20 = vpop.eup %6285  ;;  %v3643_v4 = vpack.c.bf16 %v6284_v46, %v6280_v55 }
 0x90e   : > { %5706 = vmatprep.subr.bf16.mxu1 %v3673_v27  ;;  %v3644_v36 = vpack.c.bf16 %v6286_v20, %v6282_v9  ;;  %v6288_v19 = vpop.eup %6287  ;;  %v9185_v40 = vpop.permute.xlu0 %4034  ;;  %v10544_v9 = vld [vmem:[#allocation39_spill] sm:$0xff] }
 0x90f   : > { %4131 = vmax.xlane.f32.xlu1 %v9170_v32  ;;  %v6290_v62 = vpop.eup %6289 }
 0x910   : > { %v6292_v18 = vpop.eup %6291 }
 0x911   : > { %5707 = vmatpush3.bf16.msra.mxu1 %v3673_v27  ;;  %v6294_v24 = vpop.eup %6293  ;;  %v3645_v26 = vpack.c.bf16 %v6292_v18, %v6288_v19  ;;  %v4073_v27 = vmul.f32 0.01, %v4057_v1  ;;  %v4061_v18 = vadd.f32 %v8932_v25, %v4019_v2 }
 0x912   : > { %v3646_v41 = vpack.c.bf16 %v6294_v24, %v6290_v62  ;;  %v9187_v6 = vpop.permute.xlu0 %4046 }
 0x913   : > { %v4089_v23 = vmax.f32 %v4057_v1, %v4073_v27  ;;  %v4077_v24 = vmul.f32 0.01, %v4061_v18 }
 0x914   : > { %5709 = vmatmul.mubr.bf16.vlgmr.msra.gmra.mxu1 %v3641_v38  ;;  %v4027_v38 = vpop.permute.xlu1 %4026 }
 0x915   : > { %5712 = vmatprep.mubr.bf16.mxu1 %v3642_v34  ;;  %v9193_v56 = vadd.f32 %v8640_v35, %v4089_v23  ;;  %v4078_v34 = vmul.f32 0.01, %v4062_v22  ;;  %v4063_v1 = vadd.f32 %v8932_v25, %v4027_v38 }
 0x916   : > { %v6296_v43 = vpop.eup %6295 }
 0x917   : > { %v6298_v60 = vpop.eup %6297  ;;  %v4552_v59 = vpop.permute.xlu0 %4551  ;;  %v4094_v44 = vmax.f32 %v4062_v22, %v4078_v34 }
 0x918   : > { %v3647_v28 = vpack.c.bf16 %v6298_v60, %v6296_v43  ;;  %v4606_v0 = vadd.f32 %v9198_v29, %v4552_v59  ;;  %v4560_v31 = vpop.permute.xlu1 %4559 }
 0x919   : > { %4219 = vrot.lane.b32.xlu0 %v10529_v8, %s6563_s23  ;;  %v9203_v61 = vadd.f32 %v10544_v9, %v4094_v44 }
 0x91a   : > { %v4622_v49 = vmul.f32 0.01, %v4606_v0 }
 0x91c   : > { %5713 = vmatmul.mubr.bf16.gmra.mxu1 %v3643_v4  ;;  %v4638_v55 = vmax.f32 %v4606_v0, %v4622_v49  ;;  %v4564_v46 = vpop.permute.xlu1 %4563 }
 0x91d   : > { %5716 = vmatprep.mubr.bf16.mxu1 %v3644_v36 }
 0x91e   : > { %v9207_v20 = vadd.f32 %v8640_v35, %v4638_v55 }
 0x920   : > { %4213 = vrot.lane.b32.xlu1 %v10540_v7, %s6563_s23  ;;  %v9210_v4 = vpop.permute.xlu1 %4038 }
 0x924   : > { %5717 = vmatmul.mubr.bf16.gmra.mxu1 %v3645_v26  ;;  %v9214_v36 = vpop.permute.xlu1 %4571  ;;  %v4093_v26 = vmax.f32 %v4061_v18, %v4077_v24 }
 0x925   : > { %5720 = vmatprep.mubr.bf16.mxu1 %v3646_v41 }
 0x926   : > { %v9228_v43 = vadd.f32 %v8884_v48, %v4093_v26 }
 0x928   : > { %v9216_v19 = vpop.permute.xlu1 %4042 }
 0x92c   : > { %5721 = vmatmul.mubr.bf16.gmra.mxu1 %v3647_v28  ;;  %v9220_v62 = vpop.permute.xlu1 %4575  ;;  %v4079_v28 = vmul.f32 0.01, %v4063_v1 }
 0x92e   : > { %v4095_v27 = vmax.f32 %v4063_v1, %v4079_v28  ;;  %v4607_v28 = vadd.f32 %v9198_v29, %v9189_v37 }
 0x930   : > { %v9223_v35 = vpop.permute.xlu1 %4579  ;;  %v9241_v22 = vadd.f32 %v8968_v10, %v4095_v27 }
 0x934   : > { %v9225_v41 = vpop.permute.xlu1 %4539 }
 0x938   : > { %4125 = vmax.xlane.f32.xlu0 %v9193_v56  ;;  %v9231_v60 = vpop.permute.xlu1 %4583 }
 0x93c   : > { %v9234_v52 = vpop.permute.xlu1 %4543 }
 0x940   : > { %v9238_v23 = vpop.permute.xlu1 %4591 }
 0x944   : > { %4135 = vmax.xlane.f32.xlu1 %v9203_v61  ;;  %v4118_v13 = vpop.xlane.xlu1 %4117 }
 0x945   : > { %v4149_v38 = vsub.f32 %v8941_v17, %v4118_v13  ;;  %v4608_v13 = vadd.f32 %v9198_v29, %v4560_v31 }
 0x947   : > { %v4165_v44 = vmul.f32 1.442695, %v4149_v38 }
 0x948   : > { %4674 = vmax.xlane.f32.xlu1 %v9207_v20  ;;  %v9250_v5 = vpop.xlane.xlu1 %4121 }
 0x949   : > { %6299 = vpow2.f32 %v4165_v44 }
 0x94c   : > { %v9255_v0 = vpop.xlane.xlu1 %4123 }
 0x94e   : > { %4215 = vrot.lane.b32.xlu0 %v10528_v53, %s6563_s23 }
 0x950   : > { %v4218_v24 = vpop.permute.xlu1 %4217 }
 0x951   : > { %v4240_v17 = vsel %vm321_vm0, %v4218_v24, 1065369472 }
 0x956   : > { %v6300_v44 = vpop.eup %6299 }
 0x959   : > { %4768 = vrot.lane.b32.xlu1 %v10529_v8, %s6565_s12  ;;  %v4568_v8 = vpop.permute.xlu0 %4567 }
 0x95d   : > { %v9236_v2 = vpop.permute.xlu0 %4535 }
 0x961   : > { %v9243_v59 = vpop.permute.xlu0 %4587 }
 0x965   : > { %v9246_v33 = vpop.permute.xlu0 %4547 }
 0x969   : > { %v9253_v34 = vpop.permute.xlu0 %4595 }
 0x96d   : > { %4133 = vmax.xlane.f32.xlu0 %v9228_v43 }
 0x97d   : > { %4137 = vmax.xlane.f32.xlu1 %v9241_v22 }
 0x983   : > { %4211 = vrot.lane.b32.xlu0 %v10527_v30, %s6563_s23 }
 0x98c   : > { %v4120_v49 = vpop.xlane.xlu0 %4119 }
 0x98d   : > { %v4150_v55 = vsub.f32 %v9141_v51, %v4120_v49  ;;  %v4623_v51 = vmul.f32 0.01, %v4607_v28 }
 0x98e   : > { %4766 = vrot.lane.b32.xlu1 %v10465_v45, %s6565_s12  ;;  %v4064_v45 = vadd.f32 %v8932_v25, %v9181_v11  ;;  %v4066_v11 = vadd.f32 %v8932_v25, %v9210_v4 }
 0x98f   : > { %v4167_v18 = vmul.f32 1.442695, %v4150_v55  ;;  %v4639_v27 = vmax.f32 %v4607_v28, %v4623_v51 }
 0x990   : > { %v4220_v26 = vpop.permute.xlu0 %4219  ;;  %v4080_v38 = vmul.f32 0.01, %v4064_v45  ;;  %v4082_v51 = vmul.f32 0.01, %v4066_v11 }
 0x991   : > { %6301 = vpow2.f32 %v4167_v18  ;;  %v4243_v1 = vsel %vm321_vm0, %v4220_v26, 1065369472  ;;  %v4624_v18 = vmul.f32 0.01, %v4608_v13  ;;  %v4609_v26 = vadd.f32 %v9198_v29, %v4564_v46 }
 0x992   : > { %5724 = vmatprep.subr.bf16.mxu0 %v4243_v1  ;;  %v4096_v24 = vmax.f32 %v4064_v45, %v4080_v38  ;;  %v4610_v46 = vadd.f32 %v9198_v29, %v4568_v8  ;;  %v4098_v45 = vmax.f32 %v4066_v11, %v4082_v51  ;;  %v4065_v51 = vadd.f32 %v8932_v25, %v9185_v40 }
 0x993   : > { %5725 = vmatpush3.bf16.msra.mxu0 %v4243_v1  ;;  %v9269_v1 = vadd.f32 %v8714_v15, %v4639_v27  ;;  %v4640_v37 = vmax.f32 %v4608_v13, %v4624_v18  ;;  %v4611_v27 = vadd.f32 %v9198_v29, %v9214_v36 }
 0x994   : > { %5726 = vmatprep.subr.bf16.mxu0 %v4240_v17  ;;  %v9275_v31 = vadd.f32 %v8781_v54, %v4096_v24  ;;  %v4626_v13 = vmul.f32 0.01, %v4610_v46  ;;  %v10549_v24 = vld [vmem:[#allocation10_spill] sm:$0xff] }
 0x995   : > { %v9280_v15 = vadd.f32 %v8798_v12, %v4640_v37  ;;  %v4627_v38 = vmul.f32 0.01, %v4611_v27 }
 0x997   : > { %5727 = vmatpush3.bf16.msra.mxu0 %v4240_v17  ;;  %v4625_v17 = vmul.f32 0.01, %v4609_v26  ;;  %10545 = vst [vmem:[#allocation55_spill] sm:$0xff] %v9280_v15  ;;  %v4643_v12 = vmax.f32 %v4611_v27, %v4627_v38  ;;  %v4081_v27 = vmul.f32 0.01, %v4065_v51 }
 0x999   : > { %v4641_v28 = vmax.f32 %v4609_v26, %v4625_v17 }
 0x99b   : > { %v9286_v4 = vadd.f32 %v10537_v3, %v4641_v28  ;;  %v9300_v3 = vadd.f32 %v10544_v9, %v4643_v12 }
 0x99d   : > { %10546 = vst [vmem:[#allocation50_spill] sm:$0xff] %v9286_v4  ;;  %10548 = vst [vmem:[#allocation52_spill] sm:$0xff] %v9300_v3 }
 0x99e   : > { %v6302_v49 = vpop.eup %6301 }
 0x99f   : > { %v4197_v55 = vpack.c.bf16 %v6302_v49, %v6300_v44  ;;  %v4642_v44 = vmax.f32 %v4610_v46, %v4626_v13  ;;  %v9290_v49 = vadd.f32 %v8795_v57, %v4098_v45  ;;  %v4097_v13 = vmax.f32 %v4065_v51, %v4081_v27 }
 0x9a0   : > { %v4067_v51 = vadd.f32 %v8932_v25, %v9216_v19 }
 0x9a1   : > { %5740 = vmatprep.mubr.bf16.mxu0 %v4197_v55  ;;  %v9294_v8 = vadd.f32 %v8884_v48, %v4642_v44  ;;  %v9296_v55 = vpop.xlane.xlu1 %4127  ;;  %v9329_v38 = vadd.f32 %v10525_v14, %v4097_v13 }
 0x9a2   : > { %4676 = vmax.xlane.f32.xlu0 %v9269_v1  ;;  %v4083_v13 = vmul.f32 0.01, %v4067_v51 }
 0x9a3   : > { %10547 = vst [vmem:[#allocation57_spill] sm:$0xff] %v9294_v8 }
 0x9a5   : > { %v9302_v36 = vpop.xlane.xlu1 %4129 }
 0x9a6   : > { %4139 = vmax.xlane.f32.xlu0 %v9275_v31 }
 0x9a9   : > { %v9305_v18 = vpop.xlane.xlu1 %4131 }
 0x9aa   : > { %4678 = vmax.xlane.f32.xlu0 %v9280_v15 }
 0x9ad   : > { %v4214_v48 = vpop.permute.xlu1 %4213 }
 0x9ae   : > { %4680 = vmax.xlane.f32.xlu0 %v9286_v4  ;;  %v4234_v9 = vsel %vm321_vm0, %v4214_v48, 1065369472 }
 0x9b2   : > { %4143 = vmax.xlane.f32.xlu1 %v9290_v49 }
 0x9b6   : > { %4682 = vmax.xlane.f32.xlu1 %v9294_v8 }
 0x9ba   : > { %4684 = vmax.xlane.f32.xlu1 %v9300_v3 }
 0x9c1   : > { %v9307_v26 = vpop.xlane.xlu0 %4125 }
 0x9c4   : > { %4209 = vrot.lane.b32.xlu0 %v10549_v24, %s6563_s23 }
 0x9c5   : > { %v4216_v37 = vpop.permute.xlu0 %4215 }
 0x9c6   : > { %v4237_v17 = vsel %vm321_vm0, %v4216_v37, 1065369472  ;;  %v10550_v37 = vld [vmem:[#allocation34_spill] sm:$0xff] }
 0x9c7   : > { %5728 = vmatprep.subr.bf16.mxu0 %v4237_v17 }
 0x9c8   : > { %5729 = vmatpush3.bf16.msra.mxu0 %v4237_v17 }
 0x9c9   : > { %5730 = vmatprep.subr.bf16.mxu0 %v4234_v9 }
 0x9cb   : > { %4764 = vrot.lane.b32.xlu1 %v10528_v53, %s6565_s12  ;;  %v4068_v53 = vadd.f32 %v8932_v25, %v9187_v6 }
 0x9cc   : > { %5731 = vmatpush3.bf16.msra.mxu0 %v4234_v9 }
 0x9cd   : > { %v9315_v11 = vpop.xlane.xlu1 %4135  ;;  %v4084_v44 = vmul.f32 0.01, %v4068_v53 }
 0x9cf   : > { %v4100_v40 = vmax.f32 %v4068_v53, %v4084_v44  ;;  %v4612_v53 = vadd.f32 %v9198_v29, %v9220_v62  ;;  %v4099_v44 = vmax.f32 %v4067_v51, %v4083_v13  ;;  %v4604_v13 = vadd.f32 %v9198_v29, %v9234_v52 }
 0x9d1   : > { %v9317_v28 = vpop.xlane.xlu1 %4674  ;;  %v9333_v12 = vadd.f32 %v8804_v39, %v4100_v40  ;;  %v4628_v40 = vmul.f32 0.01, %v4612_v53 }
 0x9d3   : > { %v4644_v25 = vmax.f32 %v4612_v53, %v4628_v40  ;;  %v4620_v40 = vmul.f32 0.01, %v4604_v13 }
 0x9d5   : > { %v4769_v46 = vpop.permute.xlu1 %4768  ;;  %v4636_v52 = vmax.f32 %v4604_v13, %v4620_v40 }
 0x9d6   : > { %v9322_v45 = vsel %vm321_vm0, %v4769_v46, 1065369472 }
 0x9d7   : > { %5788 = vmatprep.subr.bf16.mxu1 %v9322_v45  ;;  %v9395_v13 = vadd.f32 %v8517_v58, %v4636_v52 }
 0x9d8   : > { %5796 = vmatpush3.bf16.msra.mxu1 %v9322_v45 }
 0x9d9   : > { %10554 = vst [vmem:[#allocation20_spill] sm:$0xff] %v9395_v13 }
 0x9e3   : > { %4141 = vmax.xlane.f32.xlu0 %v9329_v38 }
 0x9ef   : > { %4147 = vmax.xlane.f32.xlu1 %v9333_v12 }
 0x9f6   : > { %v9336_v48 = vpop.xlane.xlu0 %4133 }
 0x9f9   : > { %4207 = vrot.lane.b32.xlu0 %v10550_v37, %s6563_s23 }
 0x9fa   : > { %v4212_v17 = vpop.permute.xlu0 %4211 }
 0x9fb   : > { %v4231_v6 = vsel %vm321_vm0, %v4212_v17, 1065369472  ;;  %v9356_v17 = vpop.f32.mrf.mxu1 }
 0x9fc   : > { %5732 = vmatprep.subr.bf16.mxu0 %v4231_v6 }
 0x9fd   : > { %5733 = vmatpush3.bf16.msra.mxu0 %v4231_v6  ;;  %v4603_v6 = vadd.f32 %v9198_v29, %v9225_v41  ;;  %v9363_v8 = vpop.f32.mrf.mxu1 }
 0x9ff   : > { %v4619_v51 = vmul.f32 0.01, %v4603_v6  ;;  %v9371_v53 = vpop.f32.mrf.mxu1 }
 0xa00   : > { %4762 = vrot.lane.b32.xlu1 %v10540_v7, %s6565_s12  ;;  %v4613_v7 = vadd.f32 %v9198_v29, %v9223_v35  ;;  %v9369_v35 = vadd.f32 %v8968_v10, %v4644_v25  ;;  %v4616_v10 = vadd.f32 %v9198_v29, %v9238_v23  ;;  %v4702_v23 = vsub.f32 %v9207_v20, %v9317_v28 }
 0xa01   : > { %v4635_v41 = vmax.f32 %v4603_v6, %v4619_v51 }
 0xa02   : > { %v4629_v19 = vmul.f32 0.01, %v4613_v7  ;;  %10551 = vst [vmem:[#allocation45_spill] sm:$0xff] %v9369_v35 }
 0xa03   : > { %v9387_v6 = vadd.f32 %v10519_v21, %v4635_v41 }
 0xa04   : > { %v4645_v62 = vmax.f32 %v4613_v7, %v4629_v19  ;;  %v9379_v7 = vpop.f32.mrf.mxu1 }
 0xa05   : > { %10553 = vst [vmem:[#allocation14_spill] sm:$0xff] %v9387_v6 }
 0xa06   : > { %v9343_v9 = vpop.xlane.xlu1 %4137  ;;  %v9377_v3 = vadd.f32 %v8781_v54, %v4645_v62  ;;  %v9384_v25 = vpop.f32.mrf.mxu1  ;;  %v4617_v62 = vadd.f32 %v9198_v29, %v9253_v34 }
 0xa08   : > { %10552 = vst [vmem:[#allocation38_spill] sm:$0xff] %v9377_v3  ;;  %v9390_v51 = vpop.f32.mrf.mxu1  ;;  %v4633_v41 = vmul.f32 0.01, %v4617_v62 }
 0xa0a   : > { %v4767_v46 = vpop.permute.xlu1 %4766  ;;  %v9400_v21 = vpop.f32.mrf.mxu1  ;;  %v4649_v34 = vmax.f32 %v4617_v62, %v4633_v41 }
 0xa0b   : > { %v9348_v27 = vsel %vm321_vm0, %v4767_v46, 1065369472  ;;  %v9361_v46 = vadd.f32 %v8658_v16, %v4099_v44  ;;  %v4605_v44 = vadd.f32 %v9198_v29, %v9246_v33  ;;  %v4632_v33 = vmul.f32 0.01, %v4616_v10 }
 0xa0c   : > { %5789 = vmatprep.subr.bf16.mxu1 %v9348_v27  ;;  %v9407_v58 = vpop.f32.mrf.mxu1 }
 0xa0d   : > { %5797 = vmatpush3.bf16.msra.mxu1 %v9348_v27  ;;  %v4621_v19 = vmul.f32 0.01, %v4605_v44  ;;  %v4648_v40 = vmax.f32 %v4616_v10, %v4632_v33 }
 0xa0e   : > { %v9414_v10 = vpop.f32.mrf.mxu1 }
 0xa0f   : > { %v4637_v54 = vmax.f32 %v4605_v44, %v4621_v19  ;;  %v9410_v20 = vadd.f32 %v8658_v16, %v4648_v40 }
 0xa10   : > { %v9422_v33 = vpop.f32.mrf.mxu1 }
 0xa11   : > { %10556 = vst [vmem:[#allocation44_spill] sm:$0xff] %v9410_v20 }
 0xa18   : > { %4145 = vmax.xlane.f32.xlu0 %v9361_v46 }
 0xa1c   : > { %4686 = vmax.xlane.f32.xlu0 %v9369_v35  ;;  %v9403_v35 = vadd.f32 %v8582_v47, %v4637_v54  ;;  %v9418_v47 = vadd.f32 %v8804_v39, %v4649_v34 }
 0xa1e   : > { %10555 = vst [vmem:[#allocation22_spill] sm:$0xff] %v9403_v35  ;;  %10557 = vst [vmem:[#allocation59_spill] sm:$0xff] %v9418_v47 }
 0xa20   : > { %4688 = vmax.xlane.f32.xlu0 %v9377_v3  ;;  %v4722_v3 = vmul.f32 1.442695, %v4702_v23 }
 0xa22   : > { %6303 = vpow2.f32 %v4722_v3  ;;  %v9430_v3 = vpop.f32.mrf.mxu1 }
 0xa24   : > { %4668 = vmax.xlane.f32.xlu1 %v9387_v6  ;;  %v9435_v23 = vpop.f32.mrf.mxu1 }
 0xa28   : > { %4670 = vmax.xlane.f32.xlu1 %v9395_v13 }
 0xa2b   : > { %v4677_v44 = vpop.xlane.xlu0 %4676 }
 0xa2c   : > { %v4703_v19 = vsub.f32 %v9269_v1, %v4677_v44  ;;  %4672 = vmax.xlane.f32.xlu1 %v9403_v35  ;;  %v9438_v44 = vpop.f32.mrf.mxu1 }
 0xa2e   : > { %v4724_v52 = vmul.f32 1.442695, %v4703_v19 }
 0xa2f   : > { %v9412_v28 = vpop.xlane.xlu0 %4139  ;;  %v6304_v62 = vpop.eup %6303 }
 0xa30   : > { %6305 = vpow2.f32 %v4724_v52  ;;  %4694 = vmax.xlane.f32.xlu1 %v9410_v20  ;;  %v9443_v52 = vpop.f32.mrf.mxu1 }
 0xa31   : > { %6307 = vrcp.f32 %v9363_v8 }
 0xa32   : > { %6309 = vrcp.f32 %v9356_v17 }
 0xa33   : > { %v9420_v1 = vpop.xlane.xlu0 %4678  ;;  %6311 = vrcp.f32 %v9371_v53 }
 0xa34   : > { %10558 = vst [vmem:[#allocation56_spill] sm:$0xff] %v9420_v1  ;;  %4696 = vmax.xlane.f32.xlu1 %v9418_v47  ;;  %6313 = vrcp.f32 %v9390_v51 }
 0xa35   : > { %6315 = vrcp.f32 %v9407_v58 }
 0xa36   : > { %4205 = vrot.lane.b32.xlu0 %v10526_v63, %s6563_s23  ;;  %6317 = vrcp.f32 %v9384_v25 }
 0xa37   : > { %v9428_v16 = vpop.xlane.xlu0 %4680  ;;  %6319 = vrcp.f32 %v9400_v21 }
 0xa38   : > { %10559 = vst [vmem:[#allocation60_spill] sm:$0xff] %v9428_v16  ;;  %6321 = vrcp.f32 %v9422_v33 }
 0xa39   : > { %6323 = vrcp.f32 %v9435_v23 }
 0xa3a   : > { %6325 = vrcp.f32 %v9430_v3 }
 0xa3b   : > { %v9433_v54 = vpop.xlane.xlu1 %4143  ;;  %v4210_v39 = vpop.permute.xlu0 %4209 }
 0xa3c   : > { %v4228_v40 = vsel %vm321_vm0, %v4210_v39, 1065369472  ;;  %v9448_v39 = vpop.f32.mrf.mxu1 }
 0xa3d   : > { %v6306_v41 = vpop.eup %6305  ;;  %5734 = vmatprep.subr.bf16.mxu0 %v4228_v40 }
 0xa3e   : > { %5735 = vmatpush3.bf16.msra.mxu0 %v4228_v40  ;;  %v4748_v19 = vpack.c.bf16 %v6306_v41, %v6304_v62  ;;  %v6308_v47 = vpop.eup %6307  ;;  %v4602_v62 = vadd.f32 %v9198_v29, %v9236_v2 }
 0xa3f   : > { %v9441_v34 = vpop.xlane.xlu1 %4682  ;;  %v6310_v41 = vpop.eup %6309 }
 0xa40   : > { %10560 = vst [vmem:[#allocation15_spill] sm:$0xff] %v9441_v34  ;;  %5776 = vmatprep.mubr.bf16.mxu1 %v4748_v19  ;;  %v9457_v19 = vpop.f32.mrf.mxu1  ;;  %v4618_v13 = vmul.f32 0.01, %v4602_v62 }
 0xa41   : > { %6327 = vrcp.f32 %v9457_v19 }
 0xa42   : > { %v9463_v2 = vpop.f32.mrf.mxu1  ;;  %6329 = vrcp.f32 %v9448_v39 }
 0xa43   : > { %v9446_v20 = vpop.xlane.xlu1 %4684  ;;  %10562 = vst [vmem:[#allocation19_spill] sm:$0xff] %v9463_v2  ;;  %6331 = vrcp.f32 %v9379_v7 }
 0xa44   : > { %10561 = vst [vmem:[#allocation29_spill] sm:$0xff] %v9446_v20  ;;  %v6312_v20 = vpop.eup %6311  ;;  %v9468_v16 = vpop.f32.mrf.mxu1 }
 0xa45   : > { %3317 = vperm.xlu1 %5956, %v6308_v47   ;;  %v4614_v47 = vadd.f32 %v9198_v29, %v9231_v60  ;;  %v6314_v4 = vpop.eup %6313  ;;  %10563 = vst [vmem:[#allocation51_spill] sm:$0xff] %v9468_v16  ;;  %6333 = vrcp.f32 %v9468_v16 }
 0xa46   : > { %v6316_v6 = vpop.eup %6315  ;;  %6335 = vrcp.f32 %v9414_v10 }
 0xa47   : > { %v4765_v40 = vpop.permute.xlu1 %4764  ;;  %v4630_v35 = vmul.f32 0.01, %v4614_v47  ;;  %6337 = vrcp.f32 %v9463_v2 }
 0xa48   : > { %v9454_v34 = vsel %vm321_vm0, %v4765_v40, 1065369472  ;;  %v4634_v40 = vmax.f32 %v4602_v62, %v4618_v13  ;;  %6339 = vrcp.f32 %v9443_v52 }
 0xa49   : > { %5790 = vmatprep.subr.bf16.mxu1 %v9454_v34  ;;  %3327 = vperm.xlu1 %5956, %v6310_v41   ;;  %v4615_v41 = vadd.f32 %v9198_v29, %v9243_v59  ;;  %v4646_v15 = vmax.f32 %v4614_v47, %v4630_v35 }
 0xa4a   : > { %5798 = vmatpush3.bf16.msra.mxu1 %v9454_v34  ;;  %v9472_v1 = vadd.f32 %v8478_v42, %v4634_v40 }
 0xa4b   : > { %v4631_v60 = vmul.f32 0.01, %v4615_v41  ;;  %v9479_v59 = vadd.f32 %v10525_v14, %v4646_v15 }
 0xa4d   : > { %3332 = vperm.xlu1 %5956, %v6312_v20   ;;  %v9474_v20 = vpop.f32.mrf.mxu1  ;;  %v4647_v29 = vmax.f32 %v4615_v41, %v4631_v60  ;;  %10565 = vst [vmem:[#allocation13_spill] sm:$0xff] %v9479_v59 }
 0xa4e   : > { %10564 = vst [vmem:[#allocation61_spill] sm:$0xff] %v9474_v20  ;;  %6341 = vrcp.f32 %v9474_v20 }
 0xa4f   : > { %v9481_v35 = vpop.f32.mrf.mxu1  ;;  %v9486_v42 = vadd.f32 %v8795_v57, %v4647_v29  ;;  %6343 = vrcp.f32 %v9438_v44 }
 0xa51   : > { %3337 = vperm.xlu1 %5956, %v6314_v4   ;;  %v6318_v4 = vpop.eup %6317  ;;  %v9488_v62 = vpop.f32.mrf.mxu1 }
 0xa52   : > { %v6320_v13 = vpop.eup %6319 }
 0xa53   : > { %v6322_v14 = vpop.eup %6321  ;;  %v9492_v15 = vpop.f32.mrf.mxu1 }
 0xa55   : > { %4666 = vmax.xlane.f32.xlu0 %v9472_v1  ;;  %3342 = vperm.xlu1 %5956, %v6316_v6   ;;  %v6324_v6 = vpop.eup %6323  ;;  %v9495_v47 = vpop.f32.mrf.mxu1 }
 0xa56   : > { %v6326_v57 = vpop.eup %6325 }
 0xa57   : > { %v9499_v40 = vpop.f32.mrf.mxu1  ;;  %v6328_v41 = vpop.eup %6327 }
 0xa58   : > { %10566 = vst [vmem:[#allocation54_spill] sm:$0xff] %v9499_v40  ;;  %6345 = vrcp.f32 %v9499_v40 }
 0xa59   : > { %4690 = vmax.xlane.f32.xlu0 %v9479_v59  ;;  %3347 = vperm.xlu1 %5956, %v6318_v4   ;;  %v9503_v60 = vpop.f32.mrf.mxu1  ;;  %v6330_v4 = vpop.eup %6329  ;;  %6347 = vrcp.f32 %v9481_v35 }
 0xa5a   : > { %10567 = vst [vmem:[#allocation71_spill] sm:$0xff] %v9503_v60  ;;  %6349 = vrcp.f32 %v9492_v15 }
 0xa5d   : > { %4692 = vmax.xlane.f32.xlu0 %v9486_v42  ;;  %3352 = vperm.xlu1 %5956, %v6320_v13   ;;  %v9509_v13 = vpop.f32.mrf.mxu1 }
 0xa5e   : > { %10568 = vst [vmem:[#allocation27_spill] sm:$0xff] %v9509_v13  ;;  %6351 = vrcp.f32 %v9509_v13 }
 0xa5f   : > { %v9514_v16 = vpop.f32.mrf.mxu1  ;;  %6353 = vrcp.f32 %v9488_v62 }
 0xa60   : > { %10569 = vst [vmem:[#allocation31_spill] sm:$0xff] %v9514_v16  ;;  %6355 = vrcp.f32 %v9503_v60 }
 0xa61   : > { %3357 = vperm.xlu1 %5956, %v6322_v14   ;;  %v9517_v59 = vpop.f32.mrf.mxu1 }
 0xa62   : > { %10570 = vst [vmem:[#allocation62_spill] sm:$0xff] %v9517_v59 }
 0xa65   : > { %3362 = vperm.xlu1 %5956, %v6324_v6  }
 0xa69   : > { %3372 = vperm.xlu1 %5956, %v6326_v57   ;;  %v6332_v57 = vpop.eup %6331 }
 0xa6a   : > { %v6334_v2 = vpop.eup %6333 }
 0xa6c   : > { %v9505_v29 = vpop.xlane.xlu0 %4141 }
 0xa6d   : > { %3382 = vperm.xlu1 %5956, %v6328_v41   ;;  %v6336_v41 = vpop.eup %6335 }
 0xa6e   : > { %v6338_v20 = vpop.eup %6337 }
 0xa70   : > { %v4208_v14 = vpop.permute.xlu0 %4207 }
 0xa71   : > { %3392 = vperm.xlu1 %5956, %v6330_v4   ;;  %v4225_v6 = vsel %vm321_vm0, %v4208_v14, 1065369472  ;;  %v6340_v14 = vpop.eup %6339 }
 0xa72   : > { %5736 = vmatprep.subr.bf16.mxu0 %v4225_v6 }
 0xa73   : > { %3322 = vperm.xlu0 %5955, %v6332_v57   ;;  %5737 = vmatpush3.bf16.msra.mxu0 %v4225_v6  ;;  %v6342_v6 = vpop.eup %6341  ;;  %v9523_v57 = vpop.f32.mrf.mxu1 }
 0xa74   : > { %10571 = vst [vmem:[#allocation11_spill] sm:$0xff] %v9523_v57 }
 0xa75   : > { %3811 = vperm.xlu1 %5956, %v6334_v2  }
 0xa77   : > { %3367 = vperm.xlu0 %5955, %v6336_v41   ;;  %v6344_v41 = vpop.eup %6343 }
 0xa78   : > { %v9519_v4 = vpop.xlane.xlu1 %4147 }
 0xa79   : > { %3821 = vperm.xlu1 %5956, %v6338_v20   ;;  %v6346_v20 = vpop.eup %6345 }
 0xa7a   : > { %v6348_v13 = vpop.eup %6347 }
 0xa7b   : > { %3377 = vperm.xlu0 %5955, %v6340_v14   ;;  %v9532_v14 = vpop.f32.mrf.mxu1 }
 0xa7c   : > { %v4763_v40 = vpop.permute.xlu1 %4762  ;;  %10572 = vst [vmem:[#allocation25_spill] sm:$0xff] %v9532_v14  ;;  %6357 = vrcp.f32 %v9532_v14 }
 0xa7d   : > { %v9527_v2 = vsel %vm321_vm0, %v4763_v40, 1065369472  ;;  %3826 = vperm.xlu1 %5956, %v6342_v6   ;;  %v6350_v40 = vpop.eup %6349  ;;  %6359 = vrcp.f32 %v9523_v57 }
 0xa7e   : > { %5791 = vmatprep.subr.bf16.mxu1 %v9527_v2  ;;  %v6352_v6 = vpop.eup %6351  ;;  %6361 = vrcp.f32 %v9495_v47 }
 0xa7f   : > { %5799 = vmatpush3.bf16.msra.mxu1 %v9527_v2  ;;  %3387 = vperm.xlu0 %5955, %v6344_v41   ;;  %v6354_v60 = vpop.eup %6353  ;;  %6363 = vrcp.f32 %v9517_v59 }
 0xa80   : > { %v6356_v41 = vpop.eup %6355  ;;  %6365 = vrcp.f32 %v9514_v16 }
 0xa81   : > { %3836 = vperm.xlu1 %5956, %v6346_v20  }
 0xa83   : > { %3816 = vperm.xlu0 %5955, %v6348_v13  }
 0xa85   : > { %4758 = vrot.lane.b32.xlu1 %v10549_v24, %s6565_s12  ;;  %v9542_v24 = vpop.f32.mrf.mxu1 }
 0xa87   : > { %3831 = vperm.xlu0 %5955, %v6350_v40  }
 0xa89   : > { %3851 = vperm.xlu1 %5956, %v6352_v6   ;;  %v6358_v20 = vpop.eup %6357 }
 0xa8a   : > { %v6360_v13 = vpop.eup %6359 }
 0xa8b   : > { %3841 = vperm.xlu0 %5955, %v6354_v60   ;;  %v9547_v60 = vpop.f32.mrf.mxu1  ;;  %v6362_v6 = vpop.eup %6361 }
 0xa8c   : > { %6367 = vrcp.f32 %v9547_v60 }
 0xa8d   : > { %3861 = vperm.xlu1 %5956, %v6356_v41   ;;  %v4153_v41 = vsub.f32 %v9193_v56, %v9307_v26  ;;  %6369 = vrcp.f32 %v9542_v24 }
 0xa8f   : > { %4760 = vrot.lane.b32.xlu0 %v10527_v30, %s6565_s12  ;;  %v10573_v30 = vld [vmem:[#allocation70_spill] sm:$0xff]  ;;  %v4173_v14 = vmul.f32 1.442695, %v4153_v41 }
 0xa90   : > { %v4152_v40 = vsub.f32 %v10573_v30, %v9255_v0  ;;  %v4156_v30 = vsub.f32 %v9170_v32, %v9305_v18 }
 0xa91   : > { %3871 = vperm.xlu1 %5956, %v6358_v20  }
 0xa92   : > { %v4171_v16 = vmul.f32 1.442695, %v4152_v40  ;;  %v4158_v40 = vsub.f32 %v9203_v61, %v9315_v11  ;;  %v4159_v61 = vsub.f32 %v9241_v22, %v9343_v9  ;;  %v4162_v11 = vsub.f32 %v9290_v49, %v9433_v54 }
 0xa93   : > { %4756 = vrot.lane.b32.xlu0 %v10550_v37, %s6565_s12  ;;  %v10574_v37 = vld [vmem:[#allocation37_spill] sm:$0xff] }
 0xa94   : > { %v4151_v20 = vsub.f32 %v10574_v37, %v9250_v5  ;;  %6371 = vpow2.f32 %v4171_v16  ;;  %v4157_v5 = vsub.f32 %v9228_v43, %v9336_v48  ;;  %v4160_v43 = vsub.f32 %v9275_v31, %v9412_v28 }
 0xa95   : > { %3881 = vperm.xlu1 %5956, %v6360_v13   ;;  %v10575_v13 = vld [vmem:[#allocation47_spill] sm:$0xff]  ;;  %6373 = vpow2.f32 %v4173_v14  ;;  %v4183_v14 = vmul.f32 1.442695, %v4158_v40 }
 0xa96   : > { %v4154_v57 = vsub.f32 %v10575_v13, %v9296_v55  ;;  %v4169_v59 = vmul.f32 1.442695, %v4151_v20  ;;  %v4155_v55 = vsub.f32 %v9156_v50, %v9302_v36  ;;  %v4181_v32 = vmul.f32 1.442695, %v4157_v5 }
 0xa97   : > { %4754 = vrot.lane.b32.xlu0 %v10526_v63, %s6565_s12  ;;  %v6364_v63 = vpop.eup %6363  ;;  %v4161_v36 = vsub.f32 %v9329_v38, %v9505_v29  ;;  %v4191_v29 = vmul.f32 1.442695, %v4162_v11 }
 0xa98   : > { %v4175_v0 = vmul.f32 1.442695, %v4154_v57  ;;  %v6366_v26 = vpop.eup %6365  ;;  %6375 = vpow2.f32 %v4169_v59  ;;  %v4179_v57 = vmul.f32 1.442695, %v4156_v30  ;;  %v4177_v18 = vmul.f32 1.442695, %v4155_v55 }
 0xa99   : > { %v4187_v59 = vmul.f32 1.442695, %v4160_v43  ;;  %v4189_v37 = vmul.f32 1.442695, %v4161_v36  ;;  %v4164_v30 = vsub.f32 %v9333_v12, %v9519_v4 }
 0xa9a   : > { %6377 = vpow2.f32 %v4175_v0 }
 0xa9b   : > { %3846 = vperm.xlu0 %5955, %v6362_v6   ;;  %v6368_v6 = vpop.eup %6367  ;;  %6379 = vpow2.f32 %v4179_v57  ;;  %v4195_v55 = vmul.f32 1.442695, %v4164_v30 }
 0xa9c   : > { %v6370_v50 = vpop.eup %6369  ;;  %6381 = vpow2.f32 %v4181_v32 }
 0xa9d   : > { %6383 = vpow2.f32 %v4177_v18 }
 0xa9e   : > { %6385 = vpow2.f32 %v4183_v14 }
 0xa9f   : > { %3856 = vperm.xlu0 %5955, %v6364_v63   ;;  %v4185_v63 = vmul.f32 1.442695, %v4159_v61  ;;  %6387 = vpow2.f32 %v4187_v59 }
 0xaa0   : > { %6389 = vpow2.f32 %v4189_v37 }
 0xaa1   : > { %v4146_v56 = vpop.xlane.xlu0 %4145  ;;  %v6372_v28 = vpop.eup %6371  ;;  %6391 = vpow2.f32 %v4185_v63 }
 0xaa2   : > { %v6374_v13 = vpop.eup %6373  ;;  %v4163_v9 = vsub.f32 %v9361_v46, %v4146_v56  ;;  %6393 = vpow2.f32 %v4191_v29  ;;  %v10576_v29 = vld [vmem:[#allocation14_spill] sm:$0xff] }
 0xaa3   : > { %3866 = vperm.xlu0 %5955, %v6366_v26  }
 0xaa4   : > { %v4193_v26 = vmul.f32 1.442695, %v4163_v9 }
 0xaa5   : > { %v9569_v16 = vpop.xlane.xlu0 %4686  ;;  %v6376_v38 = vpop.eup %6375 }
 0xaa6   : > { %v4198_v49 = vpack.c.bf16 %v6372_v28, %v6376_v38  ;;  %6395 = vpow2.f32 %v4193_v26 }
 0xaa7   : > { %3876 = vperm.xlu0 %5955, %v6368_v6   ;;  %v6378_v22 = vpop.eup %6377  ;;  %6397 = vpow2.f32 %v4195_v55 }
 0xaa8   : > { %v4199_v54 = vpack.c.bf16 %v6378_v22, %v6374_v13  ;;  %v6380_v46 = vpop.eup %6379 }
 0xaa9   : > { %v9573_v48 = vpop.xlane.xlu0 %4688  ;;  %v6382_v56 = vpop.eup %6381 }
 0xaaa   : > { %v6384_v40 = vpop.eup %6383 }
 0xaab   : > { %3886 = vperm.xlu0 %5955, %v6370_v50   ;;  %v6386_v57 = vpop.eup %6385  ;;  %v4200_v12 = vpack.c.bf16 %v6380_v46, %v6384_v40 }
 0xaac   : > { %v4201_v4 = vpack.c.bf16 %v6386_v57, %v6382_v56  ;;  %v6388_v32 = vpop.eup %6387 }
 0xaad   : > { %v9581_v41 = vpop.xlane.xlu1 %4668  ;;  %v4206_v31 = vpop.permute.xlu0 %4205 }
 0xaae   : > { %v4222_v20 = vsel %vm321_vm0, %v4206_v31, 1065369472  ;;  %v4699_v22 = vsub.f32 %v10576_v29, %v9581_v41  ;;  %v10585_v29 = vld [vmem:[#allocation15_spill] sm:$0xff] }
 0xaaf   : > { %5738 = vmatprep.subr.bf16.mxu0 %v4222_v20 }
 0xab0   : > { %5739 = vmatpush3.bf16.msra.mxu0 %v4222_v20 }
 0xab1   : > { %v9585_v0 = vpop.xlane.xlu1 %4670  ;;  %5756 = vmatprep.subr.bf16.mxu0 %v9322_v45 }
 0xab3   : > { %5741 = vmatmul.mubr.bf16.vlgmr.msra.gmra.mxu0 %v4198_v49  ;;  %v4716_v49 = vmul.f32 1.442695, %v4699_v22  ;;  %v10586_v22 = vld [vmem:[#allocation57_spill] sm:$0xff] }
 0xab4   : > { %5744 = vmatprep.mubr.bf16.mxu0 %v4199_v54  ;;  %5757 = vmatpush3.bf16.msra.mxu0 %v9322_v45 }
 0xab5   : > { %v9591_v5 = vpop.xlane.xlu1 %4672  ;;  %5758 = vmatprep.subr.bf16.mxu0 %v9348_v27  ;;  %6399 = vpow2.f32 %v4716_v49 }
 0xab8   : > { %5759 = vmatpush3.bf16.msra.mxu0 %v9348_v27  ;;  %v6390_v27 = vpop.eup %6389 }
 0xab9   : > { %v9595_v6 = vpop.xlane.xlu1 %4694  ;;  %5760 = vmatprep.subr.bf16.mxu0 %v9454_v34  ;;  %v6392_v18 = vpop.eup %6391 }
 0xaba   : > { %v6394_v14 = vpop.eup %6393  ;;  %v4202_v50 = vpack.c.bf16 %v6388_v32, %v6392_v18 }
 0xabb   : > { %5745 = vmatmul.mubr.bf16.gmra.mxu0 %v4200_v12  ;;  %v4203_v61 = vpack.c.bf16 %v6394_v14, %v6390_v27  ;;  %v6396_v11 = vpop.eup %6395 }
 0xabc   : > { %5748 = vmatprep.mubr.bf16.mxu0 %v4201_v4  ;;  %5761 = vmatpush3.bf16.msra.mxu0 %v9454_v34  ;;  %v6398_v31 = vpop.eup %6397 }
 0xabd   : > { %v9599_v45 = vpop.xlane.xlu1 %4696  ;;  %5762 = vmatprep.subr.bf16.mxu0 %v9527_v2  ;;  %v4204_v28 = vpack.c.bf16 %v6398_v31, %v6396_v11  ;;  %v10580_v31 = vld [vmem:[#allocation50_spill] sm:$0xff] }
 0xac0   : > { %5763 = vmatpush3.bf16.msra.mxu0 %v9527_v2 }
 0xac1   : > { %v3318_v43 = vpop.permute.xlu1 %3317 }
 0xac2   : > { %v3395_v36 = vmul.f32 %v3318_v43, %v9363_v8  ;;  %v6400_v12 = vpop.eup %6399 }
 0xac3   : > { %5749 = vmatmul.mubr.bf16.gmra.mxu0 %v4202_v50 }
 0xac4   : > { %5251 = vst.msk [vmem:[%s7899_s20 + $0x80] sm:$0xff] %vm321_vm0, %v3395_v36  ;;  %5752 = vmatprep.mubr.bf16.mxu0 %v4203_v61 }
 0xac5   : > { %v3328_v34 = vpop.permute.xlu1 %3327 }
 0xac6   : > { %v3397_v59 = vmul.f32 %v9356_v17, %v3328_v34  ;;  %v10578_v34 = vld [vmem:[#allocation55_spill] sm:$0xff] }
 0xac8   : > { %5253 = vst.msk [vmem:[%s7899_s20 + $0x90] sm:$0xff] %vm321_vm0, %v3397_v59  ;;  %v10579_v59 = vld [vmem:[#allocation60_spill] sm:$0xff] }
 0xac9   : > { %v3333_v2 = vpop.permute.xlu1 %3332 }
 0xaca   : > { %v3398_v8 = vmul.f32 %v9371_v53, %v3333_v2  ;;  %v4705_v2 = vsub.f32 %v10580_v31, %v10579_v59 }
 0xacb   : > { %5753 = vmatmul.mubr.bf16.gmra.mxu0 %v4204_v28 }
 0xacc   : > { %5254 = vst.msk [vmem:[%s7899_s20 + $0x98] sm:$0xff] %vm321_vm0, %v3398_v8 }
 0xacd   : > { %v3338_v37 = vpop.permute.xlu1 %3337 }
 0xace   : > { %v3399_v20 = vmul.f32 %v3338_v37, %v9390_v51  ;;  %v10582_v37 = vld [vmem:[#allocation29_spill] sm:$0xff] }
 0xad0   : > { %5255 = vst.msk [vmem:[%s7899_s20 + $0xa0] sm:$0xff] %vm321_vm0, %v3399_v20  ;;  %v10583_v20 = vld [vmem:[#allocation52_spill] sm:$0xff] }
 0xad1   : > { %v3343_v13 = vpop.permute.xlu1 %3342 }
 0xad2   : > { %v3400_v17 = vmul.f32 %v3343_v13, %v9407_v58 }
 0xad4   : > { %5256 = vst.msk [vmem:[%s7899_s20 + $0xa8] sm:$0xff] %vm321_vm0, %v3400_v17  ;;  %v10584_v17 = vld [vmem:[#allocation20_spill] sm:$0xff] }
 0xad5   : > { %v3348_v63 = vpop.permute.xlu1 %3347 }
 0xad6   : > { %v3401_v38 = vmul.f32 %v9384_v25, %v3348_v63  ;;  %v4700_v63 = vsub.f32 %v10584_v17, %v9585_v0 }
 0xad8   : > { %5257 = vst.msk [vmem:[%s7899_s20 + $0xb0] sm:$0xff] %vm321_vm0, %v3401_v38 }
 0xad9   : > { %v3353_v53 = vpop.permute.xlu1 %3352 }
 0xada   : > { %v3402_v51 = vmul.f32 %v9400_v21, %v3353_v53  ;;  %v4728_v53 = vmul.f32 1.442695, %v4705_v2 }
 0xadc   : > { %5258 = vst.msk [vmem:[%s7899_s20 + $0xb8] sm:$0xff] %vm321_vm0, %v3402_v51  ;;  %v4706_v51 = vsub.f32 %v10586_v22, %v10585_v29 }
 0xadd   : > { %v3358_v9 = vpop.permute.xlu1 %3357 }
 0xade   : > { %v3403_v58 = vmul.f32 %v3358_v9, %v9422_v33  ;;  %v4667_v54 = vpop.xlane.xlu0 %4666 }
 0xadf   : > { %v4698_v25 = vsub.f32 %v9472_v1, %v4667_v54  ;;  %v4730_v54 = vmul.f32 1.442695, %v4706_v51 }
 0xae0   : > { %5259 = vst.msk [vmem:[%s7899_s20 + $0xc0] sm:$0xff] %vm321_vm0, %v3403_v58 }
 0xae1   : > { %v4714_v30 = vmul.f32 1.442695, %v4698_v25  ;;  %v3363_v26 = vpop.permute.xlu1 %3362  ;;  %v10587_v25 = vld [vmem:[#allocation38_spill] sm:$0xff] }
 0xae2   : > { %v3404_v41 = vmul.f32 %v3363_v26, %v9435_v23  ;;  %v9633_v21 = vpop.xlane.xlu0 %4690 }
 0xae3   : > { %6401 = vpow2.f32 %v4714_v30  ;;  %v4709_v30 = vsub.f32 %v10587_v25, %v9573_v48 }
 0xae4   : > { %5260 = vst.msk [vmem:[%s7899_s20 + $0xc8] sm:$0xff] %vm321_vm0, %v3404_v41 }
 0xae5   : > { %v3373_v46 = vpop.permute.xlu1 %3372 }
 0xae6   : > { %v3406_v33 = vmul.f32 %v9430_v3, %v3373_v46  ;;  %v9638_v56 = vpop.xlane.xlu0 %4692 }
 0xae7   : > { %v4711_v41 = vsub.f32 %v9486_v42, %v9638_v56 }
 0xae8   : > { %5262 = vst.msk [vmem:[%s7899_s20 + $0xd8] sm:$0xff] %vm321_vm0, %v3406_v33  ;;  %v10588_v33 = vld [vmem:[#allocation45_spill] sm:$0xff] }
 0xae9   : > { %v3383_v1 = vpop.permute.xlu1 %3382  ;;  %v4740_v56 = vmul.f32 1.442695, %v4711_v41 }
 0xaea   : > { %v3408_v55 = vmul.f32 %v3383_v1, %v9457_v19  ;;  %v4708_v1 = vsub.f32 %v10588_v33, %v9569_v16 }
 0xaec   : > { %5264 = vst.msk [vmem:[%s7899_s20 + $0xe8] sm:$0xff] %vm321_vm0, %v3408_v55  ;;  %v10589_v55 = vld [vmem:[#allocation13_spill] sm:$0xff] }
 0xaed   : > { %v3393_v23 = vpop.permute.xlu1 %3392 }
 0xaee   : > { %v3410_v40 = vmul.f32 %v9448_v39, %v3393_v23  ;;  %v3323_v57 = vpop.permute.xlu0 %3322  ;;  %v4710_v23 = vsub.f32 %v10589_v55, %v9633_v21 }
 0xaef   : > { %v3396_v4 = vmul.f32 %v3323_v57, %v9379_v7  ;;  %v4734_v57 = vmul.f32 1.442695, %v4708_v1 }
 0xaf0   : > { %v6402_v3 = vpop.eup %6401  ;;  %5266 = vst.msk [vmem:[%s7899_s20 + $0xf8] sm:$0xff] %vm321_vm0, %v3410_v40  ;;  %v4736_v40 = vmul.f32 1.442695, %v4709_v30 }
 0xaf1   : > { %5252 = vst.msk [vmem:[%s7899_s20 + $0x88] sm:$0xff] %vm321_vm0, %v3396_v4  ;;  %v4746_v32 = vpack.c.bf16 %v6400_v12, %v6402_v3  ;;  %v9649_v27 = vpop.permute.xlu1 %3811  ;;  %v4738_v12 = vmul.f32 1.442695, %v4710_v23  ;;  %v10590_v4 = vld [vmem:[#allocation59_spill] sm:$0xff] }
 0xaf2   : > { %v3368_v19 = vpop.permute.xlu0 %3367  ;;  %v4713_v3 = vsub.f32 %v10590_v4, %v9599_v45 }
 0xaf3   : > { %v3405_v18 = vmul.f32 %v9414_v10, %v3368_v19  ;;  %5772 = vmatprep.mubr.bf16.mxu0 %v4746_v32  ;;  %v10577_v10 = vld [vmem:[#allocation56_spill] sm:$0xff] }
 0xaf4   : > { %v4704_v11 = vsub.f32 %v10578_v34, %v10577_v10  ;;  %v10591_v32 = vld [vmem:[#allocation44_spill] sm:$0xff] }
 0xaf5   : > { %5261 = vst.msk [vmem:[%s7899_s20 + $0xd0] sm:$0xff] %vm321_vm0, %v3405_v18  ;;  %v9655_v43 = vpop.permute.xlu1 %3821  ;;  %v4712_v19 = vsub.f32 %v10591_v32, %v9595_v6 }
 0xaf6   : > { %v3378_v39 = vpop.permute.xlu0 %3377  ;;  %v4726_v13 = vmul.f32 1.442695, %v4704_v11 }
 0xaf7   : > { %v3407_v14 = vmul.f32 %v3378_v39, %v9443_v52  ;;  %v10581_v52 = vld [vmem:[#allocation22_spill] sm:$0xff]  ;;  %v4742_v10 = vmul.f32 1.442695, %v4712_v19 }
 0xaf8   : > { %v4701_v28 = vsub.f32 %v10581_v52, %v9591_v5  ;;  %6403 = vpow2.f32 %v4726_v13  ;;  %v4718_v5 = vmul.f32 1.442695, %v4700_v63 }
 0xaf9   : > { %5263 = vst.msk [vmem:[%s7899_s20 + $0xe0] sm:$0xff] %vm321_vm0, %v3407_v14  ;;  %v9662_v36 = vpop.permute.xlu1 %3826  ;;  %6405 = vpow2.f32 %v4728_v53 }
 0xafa   : > { %v3388_v7 = vpop.permute.xlu0 %3387  ;;  %v4720_v9 = vmul.f32 1.442695, %v4701_v28 }
 0xafb   : > { %v3409_v50 = vmul.f32 %v9438_v44, %v3388_v7  ;;  %v4707_v44 = vsub.f32 %v10583_v20, %v10582_v37  ;;  %v4744_v7 = vmul.f32 1.442695, %v4713_v3 }
 0xafc   : > { %6407 = vpow2.f32 %v4720_v9 }
 0xafd   : > { %5265 = vst.msk [vmem:[%s7899_s20 + $0xf0] sm:$0xff] %vm321_vm0, %v3409_v50  ;;  %v9678_v38 = vpop.permute.xlu1 %3836  ;;  %v4732_v58 = vmul.f32 1.442695, %v4707_v44 }
 0xafe   : > { %v9664_v61 = vpop.permute.xlu0 %3816 }
 0xaff   : > { %6409 = vpow2.f32 %v4732_v58 }
 0xb00   : > { %6411 = vpow2.f32 %v4718_v5 }
 0xb01   : > { %v4759_v26 = vpop.permute.xlu1 %4758  ;;  %6413 = vpow2.f32 %v4730_v54 }
 0xb02   : > { %v9672_v8 = vpop.permute.xlu0 %3831  ;;  %v4777_v48 = vsel %vm321_vm0, %v4759_v26, 1065369472  ;;  %6415 = vpow2.f32 %v4736_v40 }
 0xb03   : > { %6417 = vpow2.f32 %v4740_v56 }
 0xb04   : > { %6419 = vpow2.f32 %v4734_v57 }
 0xb05   : > { %v6404_v18 = vpop.eup %6403  ;;  %6421 = vpow2.f32 %v4738_v12 }
 0xb06   : > { %v9682_v49 = vpop.permute.xlu0 %3841  ;;  %v6406_v14 = vpop.eup %6405  ;;  %6423 = vpow2.f32 %v4744_v7 }
 0xb07   : > { %v4749_v6 = vpack.c.bf16 %v6406_v14, %v6404_v18  ;;  %6425 = vpow2.f32 %v4742_v10 }
 0xb09   : > { %v6408_v50 = vpop.eup %6407 }
 0xb0a   : > { %v4761_v0 = vpop.permute.xlu0 %4760 }
 0xb0b   : > { %v4780_v46 = vsel %vm321_vm0, %v4761_v0, 1065369472 }
 0xb0c   : > { %5764 = vmatprep.subr.bf16.mxu0 %v4780_v46  ;;  %5792 = vmatprep.subr.bf16.mxu1 %v4780_v46  ;;  %v6410_v45 = vpop.eup %6409 }
 0xb0d   : > { %5765 = vmatpush3.bf16.msra.mxu0 %v4780_v46  ;;  %5800 = vmatpush3.bf16.msra.mxu1 %v4780_v46  ;;  %v6412_v34 = vpop.eup %6411 }
 0xb0e   : > { %5766 = vmatprep.subr.bf16.mxu0 %v4777_v48  ;;  %5793 = vmatprep.subr.bf16.mxu1 %v4777_v48  ;;  %v4757_v42 = vpop.permute.xlu0 %4756  ;;  %v6414_v11 = vpop.eup %6413  ;;  %v4747_v59 = vpack.c.bf16 %v6408_v50, %v6412_v34 }
 0xb0f   : > { %v4774_v16 = vsel %vm321_vm0, %v4757_v42, 1065369472  ;;  %v4750_v31 = vpack.c.bf16 %v6410_v45, %v6414_v11  ;;  %v6416_v2 = vpop.eup %6415 }
 0xb10   : > { %v6418_v52 = vpop.eup %6417 }
 0xb11   : > { %5767 = vmatpush3.bf16.msra.mxu0 %v4777_v48  ;;  %5801 = vmatpush3.bf16.msra.mxu1 %v4777_v48  ;;  %v6420_v28 = vpop.eup %6419 }
 0xb12   : > { %5768 = vmatprep.subr.bf16.mxu0 %v4774_v16  ;;  %5794 = vmatprep.subr.bf16.mxu1 %v4774_v16  ;;  %v4755_v21 = vpop.permute.xlu0 %4754  ;;  %v6422_v37 = vpop.eup %6421  ;;  %v4751_v20 = vpack.c.bf16 %v6416_v2, %v6420_v28 }
 0xb13   : > { %v4771_v39 = vsel %vm321_vm0, %v4755_v21, 1065369472  ;;  %v4752_v44 = vpack.c.bf16 %v6418_v52, %v6422_v37  ;;  %v6424_v13 = vpop.eup %6423 }
 0xb14   : > { %v6426_v17 = vpop.eup %6425 }
 0xb15   : > { %5769 = vmatpush3.bf16.msra.mxu0 %v4774_v16  ;;  %5802 = vmatpush3.bf16.msra.mxu1 %v4774_v16  ;;  %v4753_v63 = vpack.c.bf16 %v6424_v13, %v6426_v17 }
 0xb16   : > { %5770 = vmatprep.subr.bf16.mxu0 %v4771_v39  ;;  %5795 = vmatprep.subr.bf16.mxu1 %v4771_v39 }
 0xb19   : > { %5771 = vmatpush3.bf16.msra.mxu0 %v4771_v39  ;;  %5803 = vmatpush3.bf16.msra.mxu1 %v4771_v39 }
 0xb1c   : > { %5773 = vmatmul.mubr.bf16.vlgmr.msra.gmra.mxu0 %v4747_v59  ;;  %5777 = vmatmul.mubr.bf16.vlgmr.msra.gmra.mxu1 %v4749_v6 }
 0xb1d   : > { %5780 = vmatprep.mubr.bf16.mxu1 %v4750_v31 }
 0xb24   : > { %5781 = vmatmul.mubr.bf16.gmra.mxu1 %v4751_v20 }
 0xb25   : > { %5784 = vmatprep.mubr.bf16.mxu1 %v4752_v44 }
 0xb2c   : > { %5785 = vmatmul.mubr.bf16.gmra.mxu1 %v4753_v63 }
 0xb73   : > { %v9700_v53 = vpop.f32.mrf.mxu0 }
 0xb75   : > { %v9702_v29 = vpop.f32.mrf.mxu0 }
 0xb76   : > { %6427 = vrcp.f32 %v9702_v29 }
 0xb77   : > { %v9705_v22 = vpop.f32.mrf.mxu0  ;;  %6429 = vrcp.f32 %v9700_v53 }
 0xb79   : > { %v9708_v51 = vpop.f32.mrf.mxu0 }
 0xb7a   : > { %6431 = vrcp.f32 %v9708_v51 }
 0xb7b   : > { %v9711_v9 = vpop.f32.mrf.mxu0  ;;  %6433 = vrcp.f32 %v9705_v22 }
 0xb7d   : > { %v9714_v58 = vpop.f32.mrf.mxu0 }
 0xb7e   : > { %6435 = vrcp.f32 %v9714_v58 }
 0xb7f   : > { %v9717_v5 = vpop.f32.mrf.mxu0  ;;  %6437 = vrcp.f32 %v9711_v9 }
 0xb81   : > { %v9720_v54 = vpop.f32.mrf.mxu0 }
 0xb82   : > { %6439 = vrcp.f32 %v9720_v54 }
 0xb83   : > { %v6428_v25 = vpop.eup %6427  ;;  %v9723_v30 = vpop.f32.mrf.mxu0  ;;  %6441 = vrcp.f32 %v9717_v5 }
 0xb84   : > { %4360 = vperm.xlu1 %5956, %v6428_v25   ;;  %v6430_v0 = vpop.eup %6429 }
 0xb85   : > { %v9726_v26 = vpop.f32.mrf.mxu0 }
 0xb86   : > { %6443 = vrcp.f32 %v9726_v26 }
 0xb87   : > { %v6432_v41 = vpop.eup %6431  ;;  %v9729_v46 = vpop.f32.mrf.mxu0  ;;  %6445 = vrcp.f32 %v9723_v30 }
 0xb88   : > { %4370 = vperm.xlu1 %5956, %v6430_v0   ;;  %4365 = vperm.xlu0 %5955, %v6432_v41   ;;  %v6434_v1 = vpop.eup %6433 }
 0xb89   : > { %v9732_v33 = vpop.f32.mrf.mxu0 }
 0xb8a   : > { %6447 = vrcp.f32 %v9732_v33 }
 0xb8b   : > { %v6436_v55 = vpop.eup %6435  ;;  %v9735_v23 = vpop.f32.mrf.mxu0  ;;  %6449 = vrcp.f32 %v9729_v46 }
 0xb8c   : > { %4375 = vperm.xlu0 %5955, %v6434_v1   ;;  %4380 = vperm.xlu1 %5956, %v6436_v55   ;;  %v6438_v40 = vpop.eup %6437 }
 0xb8d   : > { %v9738_v48 = vpop.f32.mrf.mxu0 }
 0xb8e   : > { %6451 = vrcp.f32 %v9738_v48 }
 0xb8f   : > { %v6440_v42 = vpop.eup %6439  ;;  %v9741_v56 = vpop.f32.mrf.mxu0  ;;  %6453 = vrcp.f32 %v9735_v23 }
 0xb90   : > { %4390 = vperm.xlu1 %5956, %v6438_v40   ;;  %4385 = vperm.xlu0 %5955, %v6440_v42   ;;  %v6442_v12 = vpop.eup %6441 }
 0xb91   : > { %v9744_v57 = vpop.f32.mrf.mxu0 }
 0xb92   : > { %6455 = vrcp.f32 %v9744_v57 }
 0xb93   : > { %v6444_v16 = vpop.eup %6443  ;;  %6457 = vrcp.f32 %v9741_v56 }
 0xb94   : > { %4395 = vperm.xlu0 %5955, %v6442_v12   ;;  %4400 = vperm.xlu1 %5956, %v6444_v16   ;;  %v6446_v4 = vpop.eup %6445  ;;  %v3847_v16 = vpop.permute.xlu0 %3846 }
 0xb97   : > { %v6448_v3 = vpop.eup %6447 }
 0xb98   : > { %4410 = vperm.xlu1 %5956, %v6446_v4   ;;  %4405 = vperm.xlu0 %5955, %v6448_v3   ;;  %v6450_v21 = vpop.eup %6449 }
 0xb9b   : > { %v6452_v32 = vpop.eup %6451 }
 0xb9c   : > { %4415 = vperm.xlu0 %5955, %v6450_v21   ;;  %4420 = vperm.xlu1 %5956, %v6452_v32   ;;  %v6454_v19 = vpop.eup %6453  ;;  %v3852_v21 = vpop.permute.xlu1 %3851 }
 0xb9f   : > { %v6456_v18 = vpop.eup %6455 }
 0xba0   : > { %4430 = vperm.xlu1 %5956, %v6454_v19   ;;  %4425 = vperm.xlu0 %5955, %v6456_v18   ;;  %v6458_v39 = vpop.eup %6457  ;;  %v3857_v18 = vpop.permute.xlu0 %3856 }
 0xba4   : > { %4435 = vperm.xlu0 %5955, %v6458_v39   ;;  %v3862_v39 = vpop.permute.xlu1 %3861 }
 0xbdc   : > { %v9748_v14 = vpop.f32.mrf.mxu0  ;;  %v9750_v7 = vpop.f32.mrf.mxu1 }
 0xbde   : > { %v9752_v50 = vpop.f32.mrf.mxu0  ;;  %v9754_v45 = vpop.f32.mrf.mxu1 }
 0xbdf   : > { %6459 = vrcp.f32 %v9752_v50 }
 0xbe0   : > { %v9757_v10 = vpop.f32.mrf.mxu0  ;;  %v9759_v34 = vpop.f32.mrf.mxu1  ;;  %6461 = vrcp.f32 %v9748_v14 }
 0xbe2   : > { %v9762_v11 = vpop.f32.mrf.mxu0  ;;  %v9764_v59 = vpop.f32.mrf.mxu1 }
 0xbe3   : > { %6463 = vrcp.f32 %v9762_v11 }
 0xbe4   : > { %v9767_v6 = vpop.f32.mrf.mxu1  ;;  %6465 = vrcp.f32 %v9754_v45 }
 0xbe5   : > { %6467 = vrcp.f32 %v9757_v10 }
 0xbe6   : > { %v9770_v31 = vpop.f32.mrf.mxu1  ;;  %6469 = vrcp.f32 %v9750_v7 }
 0xbe7   : > { %6471 = vrcp.f32 %v9764_v59 }
 0xbe8   : > { %v9773_v2 = vpop.f32.mrf.mxu1  ;;  %6473 = vrcp.f32 %v9759_v34 }
 0xbe9   : > { %6475 = vrcp.f32 %v9770_v31 }
 0xbea   : > { %v9776_v52 = vpop.f32.mrf.mxu1  ;;  %6477 = vrcp.f32 %v9767_v6 }
 0xbeb   : > { %6479 = vrcp.f32 %v9776_v52 }
 0xbec   : > { %v6460_v28 = vpop.eup %6459  ;;  %v9779_v37 = vpop.f32.mrf.mxu1  ;;  %6481 = vrcp.f32 %v9773_v2 }
 0xbed   : > { %4909 = vperm.xlu1 %5956, %v6460_v28   ;;  %v6462_v20 = vpop.eup %6461  ;;  %v10592_v28 = vld [vmem:[#allocation51_spill] sm:$0xff] }
 0xbee   : > { %v9783_v13 = vpop.f32.mrf.mxu1 }
 0xbef   : > { %6483 = vrcp.f32 %v9783_v13 }
 0xbf0   : > { %v6464_v44 = vpop.eup %6463  ;;  %v9787_v25 = vpop.f32.mrf.mxu1  ;;  %6485 = vrcp.f32 %v9779_v37 }
 0xbf1   : > { %4919 = vperm.xlu1 %5956, %v6462_v20   ;;  %4914 = vperm.xlu0 %5955, %v6464_v44   ;;  %v6466_v17 = vpop.eup %6465  ;;  %v3889_v20 = vmul.f32 %v9649_v27, %v10592_v28  ;;  %v3893_v27 = vmul.f32 %v9672_v8, %v9492_v15  ;;  %v3896_v8 = vmul.f32 %v9495_v47, %v3847_v16  ;;  %v10597_v28 = vld [vmem:[#allocation71_spill] sm:$0xff] }
 0xbf2   : > { %v6468_v63 = vpop.eup %6467  ;;  %v9791_v1 = vpop.f32.mrf.mxu1  ;;  %v10601_v16 = vld [vmem:[#allocation11_spill] sm:$0xff] }
 0xbf3   : > { %v6470_v0 = vpop.eup %6469  ;;  %6487 = vrcp.f32 %v9791_v1 }
 0xbf4   : > { %v6472_v41 = vpop.eup %6471  ;;  %6489 = vrcp.f32 %v9787_v25 }
 0xbf5   : > { %4929 = vperm.xlu1 %5956, %v6466_v17   ;;  %4924 = vperm.xlu0 %5955, %v6468_v63   ;;  %v6474_v55 = vpop.eup %6473  ;;  %v3867_v17 = vpop.permute.xlu0 %3866  ;;  %v10593_v63 = vld [vmem:[#allocation19_spill] sm:$0xff] }
 0xbf6   : > { %v6476_v40 = vpop.eup %6475 }
 0xbf7   : > { %v6478_v42 = vpop.eup %6477 }
 0xbf8   : > { %v6480_v12 = vpop.eup %6479 }
 0xbf9   : > { %4939 = vperm.xlu1 %5956, %v6470_v0   ;;  %4934 = vperm.xlu0 %5955, %v6472_v41   ;;  %v6482_v4 = vpop.eup %6481  ;;  %v3891_v0 = vmul.f32 %v10593_v63, %v9655_v43  ;;  %v3890_v41 = vmul.f32 %v9664_v61, %v9481_v35  ;;  %v3895_v61 = vmul.f32 %v9488_v62, %v9682_v49  ;;  %v10599_v49 = vld [vmem:[#allocation25_spill] sm:$0xff] }
 0xbfc   : > { %v6484_v3 = vpop.eup %6483 }
 0xbfd   : > { %4949 = vperm.xlu1 %5956, %v6476_v40   ;;  %4944 = vperm.xlu0 %5955, %v6474_v55   ;;  %v6486_v32 = vpop.eup %6485  ;;  %v3872_v55 = vpop.permute.xlu1 %3871  ;;  %v10594_v40 = vld [vmem:[#allocation61_spill] sm:$0xff] }
 0xbfe   : > { %v3901_v63 = vmul.f32 %v3872_v55, %v10599_v49 }
 0xc00   : > { %v6488_v19 = vpop.eup %6487 }
 0xc01   : > { %4959 = vperm.xlu1 %5956, %v6478_v42   ;;  %4954 = vperm.xlu0 %5955, %v6480_v12   ;;  %v6490_v44 = vpop.eup %6489  ;;  %v3892_v42 = vmul.f32 %v10594_v40, %v9662_v36  ;;  %v3877_v12 = vpop.permute.xlu0 %3876 }
 0xc02   : > { %v3882_v43 = vpop.permute.xlu1 %3881 }
 0xc03   : > { %v3903_v40 = vmul.f32 %v10601_v16, %v3882_v43 }
 0xc05   : > { %4969 = vperm.xlu1 %5956, %v6484_v3   ;;  %4964 = vperm.xlu0 %5955, %v6482_v4   ;;  %v10595_v4 = vld [vmem:[#allocation54_spill] sm:$0xff]  ;;  %v3887_v36 = vpop.permute.xlu0 %3886 }
 0xc06   : > { %v3894_v35 = vmul.f32 %v9678_v38, %v10595_v4  ;;  %v4361_v3 = vpop.permute.xlu1 %4360  ;;  %v3899_v38 = vmul.f32 %v10597_v28, %v3862_v39  ;;  %v3902_v39 = vmul.f32 %v3877_v12, %v9547_v60 }
 0xc07   : > { %v4438_v55 = vmul.f32 %v4361_v3, %v9702_v29 }
 0xc09   : > { %4979 = vperm.xlu1 %5956, %v6486_v32   ;;  %4974 = vperm.xlu0 %5955, %v6488_v19   ;;  %v10596_v32 = vld [vmem:[#allocation27_spill] sm:$0xff]  ;;  %v4366_v19 = vpop.permute.xlu0 %4365 }
 0xc0a   : > { %v3897_v15 = vmul.f32 %v3852_v21, %v10596_v32  ;;  %v4371_v62 = vpop.permute.xlu1 %4370  ;;  %v4439_v43 = vmul.f32 %v4366_v19, %v9708_v51 }
 0xc0d   : > { %3921 = vrot.lane.b32.xlu1 %v3889_v20, %s6565_s12  ;;  %4984 = vperm.xlu0 %5955, %v6490_v44   ;;  %v10598_v20 = vld [vmem:[#allocation62_spill] sm:$0xff] }
 0xc0e   : > { %v3898_v44 = vmul.f32 %v3857_v18, %v10598_v20  ;;  %v4381_v47 = vpop.permute.xlu1 %4380 }
 0xc0f   : > { %v4442_v12 = vmul.f32 %v4381_v47, %v9714_v58 }
 0xc11   : > { %3925 = vrot.lane.b32.xlu1 %v3891_v0, %s6565_s12  ;;  %3923 = vrot.lane.b32.xlu0 %v3890_v41, %s6565_s12  ;;  %v10600_v0 = vld [vmem:[#allocation31_spill] sm:$0xff]  ;;  %v4376_v41 = vpop.permute.xlu0 %4375 }
 0xc12   : > { %v3900_v21 = vmul.f32 %v10600_v0, %v3867_v17  ;;  %v4391_v17 = vpop.permute.xlu1 %4390 }
 0xc15   : > { %3929 = vrot.lane.b32.xlu1 %v3893_v27, %s6565_s12  ;;  %3927 = vrot.lane.b32.xlu0 %v3892_v42, %s6565_s12  ;;  %v4386_v18 = vpop.permute.xlu0 %4385  ;;  %v3904_v42 = vmul.f32 %v9542_v24, %v3887_v36  ;;  %v4440_v27 = vmul.f32 %v9700_v53, %v4371_v62  ;;  %v4441_v24 = vmul.f32 %v9705_v22, %v4376_v41 }
 0xc16   : > { %v4401_v60 = vpop.permute.xlu1 %4400  ;;  %v4443_v53 = vmul.f32 %v4386_v18, %v9720_v54 }
 0xc19   : > { %3933 = vrot.lane.b32.xlu1 %v3895_v61, %s6565_s12  ;;  %3931 = vrot.lane.b32.xlu0 %v3894_v35, %s6565_s12  ;;  %v4396_v4 = vpop.permute.xlu0 %4395  ;;  %v4444_v35 = vmul.f32 %v9711_v9, %v4391_v17  ;;  %v4446_v61 = vmul.f32 %v4401_v60, %v9726_v26 }
 0xc1a   : > { %v4411_v51 = vpop.permute.xlu1 %4410  ;;  %v4445_v58 = vmul.f32 %v9717_v5, %v4396_v4 }
 0xc1b   : > { %v4448_v3 = vmul.f32 %v9723_v30, %v4411_v51 }
 0xc1d   : > { %3937 = vrot.lane.b32.xlu1 %v3897_v15, %s6565_s12  ;;  %3935 = vrot.lane.b32.xlu0 %v3896_v8, %s6565_s12  ;;  %v4406_v29 = vpop.permute.xlu0 %4405 }
 0xc1e   : > { %v4421_v22 = vpop.permute.xlu1 %4420  ;;  %v4447_v9 = vmul.f32 %v4406_v29, %v9732_v33 }
 0xc1f   : > { %v4450_v32 = vmul.f32 %v4421_v22, %v9738_v48 }
 0xc21   : > { %3941 = vrot.lane.b32.xlu1 %v3899_v38, %s6565_s12  ;;  %3939 = vrot.lane.b32.xlu0 %v3898_v44, %s6565_s12  ;;  %v4416_v36 = vpop.permute.xlu0 %4415 }
 0xc22   : > { %v4449_v26 = vmul.f32 %v9729_v46, %v4416_v36  ;;  %v4431_v5 = vpop.permute.xlu1 %4430 }
 0xc23   : > { %v4452_v15 = vmul.f32 %v9735_v23, %v4431_v5 }
 0xc25   : > { %3945 = vrot.lane.b32.xlu1 %v3901_v63, %s6565_s12  ;;  %3943 = vrot.lane.b32.xlu0 %v3900_v21, %s6565_s12  ;;  %v4426_v54 = vpop.permute.xlu0 %4425 }
 0xc26   : > { %v4451_v30 = vmul.f32 %v4426_v54, %v9744_v57 }
 0xc29   : > { %3949 = vrot.lane.b32.xlu1 %v3903_v40, %s6565_s12  ;;  %3947 = vrot.lane.b32.xlu0 %v3902_v39, %s6565_s12  ;;  %v4436_v8 = vpop.permute.xlu0 %4435 }
 0xc2a   : > { %v4453_v33 = vmul.f32 %v9741_v56, %v4436_v8 }
 0xc2d   : > { %4470 = vrot.lane.b32.xlu1 %v4438_v55, %s6563_s23  ;;  %3951 = vrot.lane.b32.xlu0 %v3904_v42, %s6565_s12 }
 0xc31   : > { %4474 = vrot.lane.b32.xlu1 %v4440_v27, %s6563_s23  ;;  %4472 = vrot.lane.b32.xlu0 %v4439_v43, %s6563_s23 }
 0xc35   : > { %4478 = vrot.lane.b32.xlu1 %v4442_v12, %s6563_s23  ;;  %4476 = vrot.lane.b32.xlu0 %v4441_v24, %s6563_s23 }
 0xc39   : > { %4482 = vrot.lane.b32.xlu1 %v4444_v35, %s6563_s23  ;;  %4480 = vrot.lane.b32.xlu0 %v4443_v53, %s6563_s23 }
 0xc3d   : > { %4486 = vrot.lane.b32.xlu1 %v4446_v61, %s6563_s23  ;;  %4484 = vrot.lane.b32.xlu0 %v4445_v58, %s6563_s23 }
 0xc41   : > { %4490 = vrot.lane.b32.xlu1 %v4448_v3, %s6563_s23  ;;  %4488 = vrot.lane.b32.xlu0 %v4447_v9, %s6563_s23 }
 0xc45   : > { %4494 = vrot.lane.b32.xlu1 %v4450_v32, %s6563_s23  ;;  %4492 = vrot.lane.b32.xlu0 %v4449_v26, %s6563_s23 }
 0xc49   : > { %4498 = vrot.lane.b32.xlu1 %v4452_v15, %s6563_s23  ;;  %4496 = vrot.lane.b32.xlu0 %v4451_v30, %s6563_s23 }
 0xc4d   : > { %4500 = vrot.lane.b32.xlu0 %v4453_v33, %s6563_s23  ;;  %s5098_s23 = sshll.u32 %s7899_s20, 4  ;;  %s10000_s23 = int_to_ptr.vmem [resolvable:$true] %s5098_s23 }
 0xc4e   : > { %s6495_s29 = scalar_lea.vmem %s10000_s23, 4096  ;;  %p6502_p0 = scmp.lt.s32.totalorder %s10000_s23, %s6500_s6 }
 0xc4f   : > { %p6496_p11 = scmp.ne.s32.totalorder %s10000_s23, %s6495_s29  ;;  %p6503_p1 = scmp.lt.s32.totalorder %s6501_s7, %s6495_s29 }
 0xc51   : > { %p6497_p12 = pnand %p6496_p11, %p6632_p5  ;;  %p6504_p2 = por %p6503_p1, %p6502_p0 }
 0xc53   : > { %p6498_p13 = pneg %p6497_p12 }
 0xc55   : > { %p6505_p3 = pnand %p6504_p2, %p6498_p13 }
 0xc68   : > { %v4910_v48 = vpop.permute.xlu1 %4909 }
 0xc69   : > { %v4987_v46 = vmul.f32 %v4910_v48, %v9752_v50 }
 0xc6b   : > { %5019 = vrot.lane.b32.xlu1 %v4987_v46, %s6562_s22 }
 0xc6c   : > { %v4920_v19 = vpop.permute.xlu1 %4919  ;;  %v4915_v28 = vpop.permute.xlu0 %4914 }
 0xc6d   : > { %v4989_v23 = vmul.f32 %v9748_v14, %v4920_v19  ;;  %v4988_v57 = vmul.f32 %v4915_v28, %v9762_v11 }
 0xc6f   : > { %5023 = vrot.lane.b32.xlu1 %v4989_v23, %s6562_s22  ;;  %5021 = vrot.lane.b32.xlu0 %v4988_v57, %s6562_s22 }
 0xc70   : > { %v4930_v38 = vpop.permute.xlu1 %4929  ;;  %v4925_v20 = vpop.permute.xlu0 %4924 }
 0xc71   : > { %v4991_v56 = vmul.f32 %v4930_v38, %v9754_v45  ;;  %v4990_v44 = vmul.f32 %v9757_v10, %v4925_v20 }
 0xc73   : > { %5027 = vrot.lane.b32.xlu1 %v4991_v56, %s6562_s22  ;;  %5025 = vrot.lane.b32.xlu0 %v4990_v44, %s6562_s22 }
 0xc74   : > { %v4940_v50 = vpop.permute.xlu1 %4939  ;;  %v4935_v62 = vpop.permute.xlu0 %4934 }
 0xc75   : > { %v4993_v14 = vmul.f32 %v9750_v7, %v4940_v50  ;;  %v4992_v11 = vmul.f32 %v4935_v62, %v9764_v59 }
 0xc77   : > { %5031 = vrot.lane.b32.xlu1 %v4993_v14, %s6562_s22  ;;  %5029 = vrot.lane.b32.xlu0 %v4992_v11, %s6562_s22 }
 0xc78   : > { %v4950_v49 = vpop.permute.xlu1 %4949  ;;  %v4945_v63 = vpop.permute.xlu0 %4944 }
 0xc79   : > { %v4995_v45 = vmul.f32 %v4950_v49, %v9770_v31  ;;  %v4994_v10 = vmul.f32 %v9759_v34, %v4945_v63 }
 0xc7b   : > { %5035 = vrot.lane.b32.xlu1 %v4995_v45, %s6562_s22  ;;  %5033 = vrot.lane.b32.xlu0 %v4994_v10, %s6562_s22 }
 0xc7c   : > { %v4960_v0 = vpop.permute.xlu1 %4959  ;;  %v4955_v21 = vpop.permute.xlu0 %4954 }
 0xc7d   : > { %v4997_v7 = vmul.f32 %v9767_v6, %v4960_v0  ;;  %v4996_v59 = vmul.f32 %v4955_v21, %v9776_v52 }
 0xc7f   : > { %5039 = vrot.lane.b32.xlu1 %v4997_v7, %s6562_s22  ;;  %5037 = vrot.lane.b32.xlu0 %v4996_v59, %s6562_s22 }
 0xc80   : > { %v4970_v41 = vpop.permute.xlu1 %4969  ;;  %v4965_v47 = vpop.permute.xlu0 %4964 }
 0xc81   : > { %v4999_v31 = vmul.f32 %v4970_v41, %v9783_v13  ;;  %v4998_v34 = vmul.f32 %v9773_v2, %v4965_v47 }
 0xc83   : > { %5043 = vrot.lane.b32.xlu1 %v4999_v31, %s6562_s22  ;;  %5041 = vrot.lane.b32.xlu0 %v4998_v34, %s6562_s22 }
 0xc84   : > { %v4980_v6 = vpop.permute.xlu1 %4979  ;;  %v4975_v16 = vpop.permute.xlu0 %4974 }
 0xc85   : > { %v5001_v52 = vmul.f32 %v9779_v37, %v4980_v6  ;;  %v5000_v40 = vmul.f32 %v4975_v16, %v9791_v1 }
 0xc87   : > { %5047 = vrot.lane.b32.xlu1 %v5001_v52, %s6562_s22  ;;  %5045 = vrot.lane.b32.xlu0 %v5000_v40, %s6562_s22 }
 0xc88   : > { %v3922_v2 = vpop.permute.xlu1 %3921  ;;  %v4985_v13 = vpop.permute.xlu0 %4984 }
 0xc89   : > { %5267 = vst.msk [vmem:[%s7899_s20 + $0x80] sm:$0xff] %vm1558_vm1, %v3922_v2  ;;  %v5002_v39 = vmul.f32 %v9787_v25, %v4985_v13 }
 0xc8b   : > { %5049 = vrot.lane.b32.xlu0 %v5002_v39, %s6562_s22  ;;  %s5324_s22 = sshll.u32 %s6615_s19, 12  ;;  %s10006_s19 = scalar_lea.sflag [#allocation3], %s209_s13 }
 0xc8c   : > { %v3926_v37 = vpop.permute.xlu1 %3925  ;;  %v3924_v18 = vpop.permute.xlu0 %3923  ;;  %s9998_s30 = scalar_lea.hbm %s10050_s4, %s5324_s22 }
 0xc8d   : > { %5269 = vst.msk [vmem:[%s7899_s20 + $0x90] sm:$0xff] %vm1558_vm1, %v3926_v37  ;;  %5268 = vst.msk [vmem:[%s7899_s20 + $0x88] sm:$0xff] %vm1558_vm1, %v3924_v18 }
 0xc90   : > { %v3930_v1 = vpop.permute.xlu1 %3929  ;;  %v3928_v42 = vpop.permute.xlu0 %3927 }
 0xc91   : > { %5271 = vst.msk [vmem:[%s7899_s20 + $0xa0] sm:$0xff] %vm1558_vm1, %v3930_v1  ;;  %5270 = vst.msk [vmem:[%s7899_s20 + $0x98] sm:$0xff] %vm1558_vm1, %v3928_v42 }
 0xc94   : > { %v3934_v25 = vpop.permute.xlu1 %3933  ;;  %v3932_v55 = vpop.permute.xlu0 %3931 }
 0xc95   : > { %5273 = vst.msk [vmem:[%s7899_s20 + $0xb0] sm:$0xff] %vm1558_vm1, %v3934_v25  ;;  %5272 = vst.msk [vmem:[%s7899_s20 + $0xa8] sm:$0xff] %vm1558_vm1, %v3932_v55 }
 0xc98   : > { %v3938_v17 = vpop.permute.xlu1 %3937  ;;  %v3936_v27 = vpop.permute.xlu0 %3935 }
 0xc99   : > { %5275 = vst.msk [vmem:[%s7899_s20 + $0xc0] sm:$0xff] %vm1558_vm1, %v3938_v17  ;;  %5274 = vst.msk [vmem:[%s7899_s20 + $0xb8] sm:$0xff] %vm1558_vm1, %v3936_v27 }
 0xc9c   : > { %v3942_v43 = vpop.permute.xlu1 %3941  ;;  %v3940_v4 = vpop.permute.xlu0 %3939 }
 0xc9d   : > { %5277 = vst.msk [vmem:[%s7899_s20 + $0xd0] sm:$0xff] %vm1558_vm1, %v3942_v43  ;;  %5276 = vst.msk [vmem:[%s7899_s20 + $0xc8] sm:$0xff] %vm1558_vm1, %v3940_v4 }
 0xca0   : > { %v3946_v60 = vpop.permute.xlu1 %3945  ;;  %v3944_v12 = vpop.permute.xlu0 %3943 }
 0xca1   : > { %5279 = vst.msk [vmem:[%s7899_s20 + $0xe0] sm:$0xff] %vm1558_vm1, %v3946_v60  ;;  %5278 = vst.msk [vmem:[%s7899_s20 + $0xd8] sm:$0xff] %vm1558_vm1, %v3944_v12 }
 0xca4   : > { %v3950_v24 = vpop.permute.xlu1 %3949  ;;  %v3948_v29 = vpop.permute.xlu0 %3947 }
 0xca5   : > { %5281 = vst.msk [vmem:[%s7899_s20 + $0xf0] sm:$0xff] %vm1558_vm1, %v3950_v24  ;;  %5280 = vst.msk [vmem:[%s7899_s20 + $0xe8] sm:$0xff] %vm1558_vm1, %v3948_v29 }
 0xca8   : > { %v4471_v35 = vpop.permute.xlu1 %4470  ;;  %v3952_v53 = vpop.permute.xlu0 %3951 }
 0xca9   : > { %5283 = vst.msk [vmem:[%s7899_s20 + $0x80] sm:$0xff] %vm2108_vm2, %v4471_v35 }
 0xcaa   : > { %5282 = vst.msk [vmem:[%s7899_s20 + $0xf8] sm:$0xff] %vm1558_vm1, %v3952_v53 }
 0xcac   : > { %v4475_v51 = vpop.permute.xlu1 %4474  ;;  %v4473_v61 = vpop.permute.xlu0 %4472 }
 0xcad   : > { %5285 = vst.msk [vmem:[%s7899_s20 + $0x90] sm:$0xff] %vm2108_vm2, %v4475_v51  ;;  %5284 = vst.msk [vmem:[%s7899_s20 + $0x88] sm:$0xff] %vm2108_vm2, %v4473_v61 }
 0xcb0   : > { %v4479_v58 = vpop.permute.xlu1 %4478  ;;  %v4477_v36 = vpop.permute.xlu0 %4476 }
 0xcb1   : > { %5287 = vst.msk [vmem:[%s7899_s20 + $0xa0] sm:$0xff] %vm2108_vm2, %v4479_v58  ;;  %5286 = vst.msk [vmem:[%s7899_s20 + $0x98] sm:$0xff] %vm2108_vm2, %v4477_v36 }
 0xcb4   : > { %v4483_v22 = vpop.permute.xlu1 %4482  ;;  %v4481_v3 = vpop.permute.xlu0 %4480 }
 0xcb5   : > { %5289 = vst.msk [vmem:[%s7899_s20 + $0xb0] sm:$0xff] %vm2108_vm2, %v4483_v22  ;;  %5288 = vst.msk [vmem:[%s7899_s20 + $0xa8] sm:$0xff] %vm2108_vm2, %v4481_v3 }
 0xcb8   : > { %v4487_v9 = vpop.permute.xlu1 %4486  ;;  %v4485_v54 = vpop.permute.xlu0 %4484 }
 0xcb9   : > { %5291 = vst.msk [vmem:[%s7899_s20 + $0xc0] sm:$0xff] %vm2108_vm2, %v4487_v9  ;;  %5290 = vst.msk [vmem:[%s7899_s20 + $0xb8] sm:$0xff] %vm2108_vm2, %v4485_v54 }
 0xcbc   : > { %v4491_v32 = vpop.permute.xlu1 %4490  ;;  %v4489_v26 = vpop.permute.xlu0 %4488 }
 0xcbd   : > { %5293 = vst.msk [vmem:[%s7899_s20 + $0xd0] sm:$0xff] %vm2108_vm2, %v4491_v32  ;;  %5292 = vst.msk [vmem:[%s7899_s20 + $0xc8] sm:$0xff] %vm2108_vm2, %v4489_v26 }
 0xcc0   : > { %v4495_v5 = vpop.permute.xlu1 %4494  ;;  %v4493_v15 = vpop.permute.xlu0 %4492 }
 0xcc1   : > { %5295 = vst.msk [vmem:[%s7899_s20 + $0xe0] sm:$0xff] %vm2108_vm2, %v4495_v5  ;;  %5294 = vst.msk [vmem:[%s7899_s20 + $0xd8] sm:$0xff] %vm2108_vm2, %v4493_v15 }
 0xcc4   : > { %v4499_v30 = vpop.permute.xlu1 %4498  ;;  %v4497_v8 = vpop.permute.xlu0 %4496 }
 0xcc5   : > { %5297 = vst.msk [vmem:[%s7899_s20 + $0xf0] sm:$0xff] %vm2108_vm2, %v4499_v30  ;;  %5296 = vst.msk [vmem:[%s7899_s20 + $0xe8] sm:$0xff] %vm2108_vm2, %v4497_v8 }
 0xcc8   : > { %v4501_v33 = vpop.permute.xlu0 %4500 }
 0xcc9   : > { %5298 = vst.msk [vmem:[%s7899_s20 + $0xf8] sm:$0xff] %vm2108_vm2, %v4501_v33 }
 0xcdd   : > { %v5020_v48 = vpop.permute.xlu1 %5019 }
 0xcde   : > { %5299 = vst.msk [vmem:[%s7899_s20 + $0x80] sm:$0xff] %vm2658_vm3, %v5020_v48 }
 0xce1   : > { %v5024_v46 = vpop.permute.xlu1 %5023  ;;  %v5022_v19 = vpop.permute.xlu0 %5021 }
 0xce2   : > { %5301 = vst.msk [vmem:[%s7899_s20 + $0x90] sm:$0xff] %vm2658_vm3, %v5024_v46  ;;  %5300 = vst.msk [vmem:[%s7899_s20 + $0x88] sm:$0xff] %vm2658_vm3, %v5022_v19 }
 0xce5   : > { %v5028_v28 = vpop.permute.xlu1 %5027  ;;  %v5026_v23 = vpop.permute.xlu0 %5025 }
 0xce6   : > { %5303 = vst.msk [vmem:[%s7899_s20 + $0xa0] sm:$0xff] %vm2658_vm3, %v5028_v28  ;;  %5302 = vst.msk [vmem:[%s7899_s20 + $0x98] sm:$0xff] %vm2658_vm3, %v5026_v23 }
 0xce9   : > { %v5032_v57 = vpop.permute.xlu1 %5031  ;;  %v5030_v38 = vpop.permute.xlu0 %5029 }
 0xcea   : > { %5305 = vst.msk [vmem:[%s7899_s20 + $0xb0] sm:$0xff] %vm2658_vm3, %v5032_v57  ;;  %5304 = vst.msk [vmem:[%s7899_s20 + $0xa8] sm:$0xff] %vm2658_vm3, %v5030_v38 }
 0xced   : > { %v5036_v20 = vpop.permute.xlu1 %5035  ;;  %v5034_v56 = vpop.permute.xlu0 %5033 }
 0xcee   : > { %5307 = vst.msk [vmem:[%s7899_s20 + $0xc0] sm:$0xff] %vm2658_vm3, %v5036_v20  ;;  %5306 = vst.msk [vmem:[%s7899_s20 + $0xb8] sm:$0xff] %vm2658_vm3, %v5034_v56 }
 0xcf1   : > { %v5040_v44 = vpop.permute.xlu1 %5039  ;;  %v5038_v50 = vpop.permute.xlu0 %5037 }
 0xcf2   : > { %5309 = vst.msk [vmem:[%s7899_s20 + $0xd0] sm:$0xff] %vm2658_vm3, %v5040_v44  ;;  %5308 = vst.msk [vmem:[%s7899_s20 + $0xc8] sm:$0xff] %vm2658_vm3, %v5038_v50 }
 0xcf5   : > { %v5044_v62 = vpop.permute.xlu1 %5043  ;;  %v5042_v14 = vpop.permute.xlu0 %5041 }
 0xcf6   : > { %5311 = vst.msk [vmem:[%s7899_s20 + $0xe0] sm:$0xff] %vm2658_vm3, %v5044_v62  ;;  %5310 = vst.msk [vmem:[%s7899_s20 + $0xd8] sm:$0xff] %vm2658_vm3, %v5042_v14 }
 0xcf9   : > { %v5048_v11 = vpop.permute.xlu1 %5047  ;;  %v5046_v49 = vpop.permute.xlu0 %5045 }
 0xcfa   : > { %5313 = vst.msk [vmem:[%s7899_s20 + $0xf0] sm:$0xff] %vm2658_vm3, %v5048_v11  ;;  %5312 = vst.msk [vmem:[%s7899_s20 + $0xe8] sm:$0xff] %vm2658_vm3, %v5046_v49 }
 0xcfd   : > { %v5050_v63 = vpop.permute.xlu0 %5049 }
 0xcfe   : > { %5314 = vst.msk [vmem:[%s7899_s20 + $0xf8] sm:$0xff] %vm2658_vm3, %v5050_v63 }
 0xcff   : > { %6508 = shalt.err (!%p6505_p3)
}
 0xd00   : > { %s6509_s8 = scalar_lea.hbm %s9998_s30, 4096  ;;  %s6513_s11 = scalar_lea.hbm %s10050_s4, 8192 }
 0xd01   : > { %p6510_p4 = scmp.ne.s32.totalorder %s9998_s30, %s6509_s8  ;;  %p6514_p9 = scmp.lt.s32.totalorder %s9998_s30, %s10050_s4 }
 0xd02   : > { %p6515_p10 = scmp.lt.s32.totalorder %s6513_s11, %s6509_s8 }
 0xd03   : > { %p6511_p7 = pnand %p6510_p4, %p6632_p5 }
 0xd04   : > { %p6516_p11 = por %p6515_p10, %p6514_p9 }
 0xd05   : > { %p6512_p8 = pneg %p6511_p7 }
 0xd07   : > { %p6517_p12 = pnand %p6516_p11, %p6512_p8 }
 0xd09   : > { %6520 = shalt.err (!%p6517_p12)
}
 0xd0a   : > { %s6567_s14 = smov 128   ;;  %s6568_s20 = smov 8  }
 0xd0b   : > { %5804 = dma.vmem_to_hbm [thread:$0]  (%p6632_p5), %s10000_s23, 4096, %s9998_s30, %s10006_s19, %s6567_s14, %s6567_s14, %s6568_s20  }
 0xd0c PF: > { %p5810_p13 = scmp.ge.s32.totalorder %s6555_s18, 2  ;;  %s5113_s22 = sand.u32 1, %s6543_s15  }
 0xd0d   : > { %s5114_s27 = scalar_lea.sflag [#allocation3], %s5113_s22 }
 0xd0e   : > { %p5807_p0 = pnand %p5810_p13, %p6636_p6 }
 0xd10   : > { %p5808_p1 = pneg %p5807_p0 }
 0xd12   : > { %6538 = dma.done.wait (%p5808_p1), %s5114_s27, 4096  }
 0xd13   : > { %6540 = vsyncadd (%p5808_p1), %s5114_s27, 4294963200  ;;  %p14_p2 = scmp.ge.s32.totalorder %s6619_s21, 4   ;;  %s10602_s15 = smov %s6547_s16 }
 0xd14   : > { %s10603_s16 = smov %s6551_s17  ;;  %s10604_s17 = smov %s6630_s24 }
 0xd15   : > { %s10605_s18 = smov %s6619_s21  ;;  %16 = sbr.rel (!%p14_p2) target bundleno = 3 (0x3), region = 77 }
 0xd1a   :  { %5119 = vsyncpa [#allocation3], 1 }
 0xd1b   :  { %5121 = vsyncpa [#allocation3 + $0x1], 1 }

</bundles_post_ra>
